<compile_context>
chip_gen: v6e
topology: v6e:2x2x1
jax: 0.10.0
libtpu: 0.0.40
codegen_flags: <defaults>
</compile_context>

<pallas_src>
import math
import functools

import jax
import jax.numpy as jnp
from jax import lax
from jax.experimental import pallas as pl
from jax.experimental.pallas import tpu as pltpu

# ---- module hyper-parameters (from graphnn/train/gnn_vr_2.py) ----
IN_DIM = 32
NODE_FEAT_DIM = IN_DIM // 2      # 16
GNN_HID_DIM = 64
LSTM_HID_DIM = 128
TIME_EMB_DIM = 16
OUT_DIM = 26
TEACHER_DIM = OUT_DIM            # 26
LSTM_IN_DIM = GNN_HID_DIM * 2 + GNN_HID_DIM + TIME_EMB_DIM  # 208
K_IN = NODE_FEAT_DIM + TEACHER_DIM   # 42: folded kernel-input width [xh | xt]
K_PAD = 128                      # lane-dense padded kernel-input width
OUT_PAD = 128                    # lane-dense padded output width


# --------------------------------------------------------------------------
# Pallas kernel: one batched layer-1 gate GEMM (prologue) -> unrolled 2-layer
# LSTM recurrence (fused layer-2 matmul) -> MLP head.  Single invocation,
# all operands resident in VMEM.
# --------------------------------------------------------------------------
def dual_stream_gnn_kernel(
    xin_ref, b1t_ref,
    w_in_ref, whh1_ref, w2_ref, b2_ref,
    wf1_ref, bf1_ref, wf2_ref, bf2_ref, wf3_ref, bf3_ref,
    out_ref, gpre_ref,
):
    f32 = jnp.float32
    bf16 = jnp.bfloat16

    T, Bp, G = gpre_ref.shape        # G = 4H
    H = G // 4

    # ---- prologue: layer-1 input-path gates for ALL timesteps in ONE GEMM --
    # xin = [xh | xt | 0-pad] (bf16, lane-dense), w_in = stacked folded weight.
    gemm = jnp.dot(xin_ref[...], w_in_ref[...],
                   preferred_element_type=f32)                 # [T*Bp, 4H] f32
    gpre_ref[...] = gemm.reshape(T, Bp, G)

    # Gate columns pre-permuted (wrapper) to (i, f, o, g): one wide sigmoid
    # over the first 3H lanes + one tanh over the last H lanes.
    def gates_to_hc(gates, c):
        sig = jax.nn.sigmoid(gates[:, :3 * H])
        g = jnp.tanh(gates[:, 3 * H:])
        i = sig[:, 0 * H:1 * H]
        f = sig[:, 1 * H:2 * H]
        o = sig[:, 2 * H:3 * H]
        c_new = f * c + i * g
        h_new = o * jnp.tanh(c_new)
        return h_new, c_new

    # ---- recurrence ---------------------------------------------------------
    def step(t, carry):
        h1, c1, h2, c2 = carry
        g1 = (gpre_ref[t]
              + b1t_ref[pl.ds(t, 1), :]                         # per-t PE bias
              + jnp.dot(h1.astype(bf16), whh1_ref[...],
                        preferred_element_type=f32))
        h1, c1 = gates_to_hc(g1, c1)
        # TODO(synk): nn.LSTM inter-layer dropout is identity in eval mode.
        h12 = jnp.concatenate([h1, h2], axis=1).astype(bf16)    # [Bp, 2H]
        g2 = (jnp.dot(h12, w2_ref[...], preferred_element_type=f32)
              + b2_ref[...])
        h2, c2 = gates_to_hc(g2, c2)
        return (h1, c1, h2, c2)

    zeros = jnp.zeros((Bp, H), f32)
    unroll = True if T <= 16 else 4
    _, _, h2, _ = lax.fori_loop(0, T, step, (zeros, zeros, zeros, zeros),
                                unroll=unroll)

    # ---- MLP head: 128 -> 128 -> 64(pad 128) -> 26(pad 128), ReLU between --
    z = jnp.maximum(
        jnp.dot(h2.astype(bf16), wf1_ref[...], preferred_element_type=f32)
        + bf1_ref[...], 0.0)
    z = jnp.maximum(
        jnp.dot(z.astype(bf16), wf2_ref[...], preferred_element_type=f32)
        + bf2_ref[...], 0.0)
    out_ref[...] = (
        jnp.dot(z.astype(bf16), wf3_ref[...], preferred_element_type=f32)
        + bf3_ref[...])


# --------------------------------------------------------------------------
# Glue: positional encoding, parameter init/folding, pallas_call wrapper,
# pure-JAX reference.
# --------------------------------------------------------------------------
def make_positional_encoding(seq_len, d_model):
    pos = jnp.arange(seq_len, dtype=jnp.float32)[:, None]                  # [T,1]
    div = jnp.exp(jnp.arange(0, d_model, 2, dtype=jnp.float32)
                  * (-math.log(10000.0) / d_model))                        # [d/2]
    pe = jnp.zeros((seq_len, d_model), jnp.float32)
    pe = pe.at[:, 0::2].set(jnp.sin(pos * div))
    pe = pe.at[:, 1::2].set(jnp.cos(pos * div))
    return pe


def init_params(key):
    ks = iter(jax.random.split(key, 32))

    def uni(shape, fan_in):
        s = 1.0 / math.sqrt(fan_in)
        return jax.random.uniform(next(ks), shape, jnp.float32, -s, s)

    p = {}
    # GCNConv(16, 64): lin weight + bias (stored [in, out]).
    p["wg"] = uni((NODE_FEAT_DIM, GNN_HID_DIM), NODE_FEAT_DIM)
    p["bg"] = uni((1, GNN_HID_DIM), NODE_FEAT_DIM)
    # teacher_embedding: Linear(26, 64)
    p["wte"] = uni((TEACHER_DIM, GNN_HID_DIM), TEACHER_DIM)
    p["bte"] = uni((1, GNN_HID_DIM), TEACHER_DIM)
    # LSTM layer 1: input 208 -> 4*128 (gate order i,f,g,o), plus hidden->hidden.
    H = LSTM_HID_DIM
    p["wih1"] = uni((LSTM_IN_DIM, 4 * H), H)
    p["whh1"] = uni((H, 4 * H), H)
    p["b1"] = uni((1, 4 * H), H) + uni((1, 4 * H), H)   # b_ih + b_hh
    # LSTM layer 2: input 128 -> 4*128.
    p["wih2"] = uni((H, 4 * H), H)
    p["whh2"] = uni((H, 4 * H), H)
    p["b2"] = uni((1, 4 * H), H) + uni((1, 4 * H), H)
    # fc head: 128 -> 128 -> 64 -> 26
    p["wf1"] = uni((H, 128), H)
    p["bf1"] = uni((1, 128), H)
    p["wf2"] = uni((128, 64), 128)
    p["bf2"] = uni((1, 64), 128)
    p["wf3"] = uni((64, OUT_DIM), 64)
    p["bf3"] = uni((1, OUT_DIM), 64)
    return p


def _perm_gates(w):
    """Reorder the last (4H) axis from PyTorch gate order (i,f,g,o) to
    (i,f,o,g) so in-kernel nonlinearities are one wide sigmoid + one tanh."""
    H = LSTM_HID_DIM
    return jnp.concatenate(
        [w[..., :2 * H], w[..., 3 * H:4 * H], w[..., 2 * H:3 * H]], axis=-1)


def _fold_params(p, pe):
    """Fold GCN / teacher / PE linears into the LSTM layer-1 input weights
    (f32 HIGHEST, cast to bf16 only at the end), permute gate columns, stack
    layer-2 weights, and lane-pad the MLP head."""
    bf16 = jnp.bfloat16
    hdot = functools.partial(jnp.dot, precision=lax.Precision.HIGHEST)
    H = LSTM_HID_DIM

    wih1 = _perm_gates(p["wih1"])
    whh1 = _perm_gates(p["whh1"])
    b1 = _perm_gates(p["b1"])
    wih2 = _perm_gates(p["wih2"])
    whh2 = _perm_gates(p["whh2"])
    b2 = _perm_gates(p["b2"])

    # Split layer-1 input weight along the [gnn, gnn, pe, te] feature concat.
    w_gnn = wih1[:GNN_HID_DIM] + wih1[GNN_HID_DIM:2 * GNN_HID_DIM]        # [64, 4H]
    w_pe = wih1[2 * GNN_HID_DIM:2 * GNN_HID_DIM + TIME_EMB_DIM]           # [16, 4H]
    w_te = wih1[2 * GNN_HID_DIM + TIME_EMB_DIM:]                          # [64, 4H]

    # 2-node GCN (edge_index [[0,1],[1,0]] + self loops, sym-norm) reduces to
    # h = 0.5*(left+right) @ Wg + bg (identical for both nodes); fold the 0.5
    # into the weight so the kernel input is just (left + right).
    wg_fold = 0.5 * hdot(p["wg"], w_gnn)                                   # [16, 4H]
    wte_fold = hdot(p["wte"], w_te)                                        # [26, 4H]
    w_in = jnp.zeros((K_PAD, 4 * H), jnp.float32)
    w_in = w_in.at[:NODE_FEAT_DIM].set(wg_fold)
    w_in = w_in.at[NODE_FEAT_DIM:K_IN].set(wte_fold)

    # Positional encoding + constant biases folded into a per-timestep bias.
    b1t = (hdot(pe, w_pe) + hdot(p["bg"], w_gnn)
           + hdot(p["bte"], w_te) + b1)                                    # [T, 4H]

    # Fused layer-2 weight: g2 = [h1 | h2] @ w2 + b2 (K = 2H = 256).
    w2 = jnp.concatenate([wih2, whh2], axis=0)                             # [2H, 4H]

    # MLP head, padded lane-dense to 128 columns.
    wf2p = jnp.zeros((128, 128), jnp.float32).at[:, :64].set(p["wf2"])
    bf2p = jnp.zeros((1, 128), jnp.float32).at[:, :64].set(p["bf2"])
    wf3p = jnp.zeros((128, OUT_PAD), jnp.float32).at[:64, :OUT_DIM].set(p["wf3"])
    bf3p = jnp.zeros((1, OUT_PAD), jnp.float32).at[:, :OUT_DIM].set(p["bf3"])

    return (w_in.astype(bf16), b1t,
            whh1.astype(bf16), w2.astype(bf16), b2,
            p["wf1"].astype(bf16), p["bf1"],
            wf2p.astype(bf16), bf2p,
            wf3p.astype(bf16), bf3p)


@jax.jit
def dual_stream_gnn_forward(params, x_student, x_teacher):
    """x_student: [B, T, IN_DIM], x_teacher: [B, T, TEACHER_DIM] -> [B, OUT_DIM]."""
    B, T, _ = x_student.shape
    H = LSTM_HID_DIM
    Bp = max(16, ((B + 15) // 16) * 16)   # bf16 LHS packs 16 sublanes per vreg

    pe = make_positional_encoding(T, TIME_EMB_DIM)                         # [T, 16]

    (w_in, b1t, whh1, w2, b2,
     wf1, bf1, wf2p, bf2p, wf3p, bf3p) = _fold_params(params, pe)

    # Layout plumbing: [xh | xt] time-major, batch-padded, lane-padded, flat.
    xs = x_student.astype(jnp.float32)
    xh = xs[..., :NODE_FEAT_DIM] + xs[..., NODE_FEAT_DIM:]     # 0.5 folded into w_in
    xin = jnp.concatenate([xh, x_teacher.astype(jnp.float32)], axis=-1)    # [B,T,42]
    xin = jnp.transpose(xin, (1, 0, 2))                                    # [T,B,42]
    xin = jnp.pad(xin, ((0, 0), (0, Bp - B), (0, K_PAD - K_IN)))           # [T,Bp,128]
    xin = xin.reshape(T * Bp, K_PAD).astype(jnp.bfloat16)

    inputs = (xin, b1t, w_in, whh1, w2, b2,
              wf1, bf1, wf2p, bf2p, wf3p, bf3p)

    # Tight VMEM reservation: ~1.25x the actual footprint plus fixed headroom
    # (no BlockSpec double-buffering in a grid-less call).
    in_bytes = sum(int(a.size) * a.dtype.itemsize for a in inputs)
    scratch_bytes = T * Bp * 4 * H * 4       # precomputed-gate scratch, f32
    out_bytes = Bp * OUT_PAD * 4
    vmem_limit = max(8 << 20,
                     int(1.25 * (in_bytes + scratch_bytes + out_bytes)) + (4 << 20))

    vmem = pl.BlockSpec(memory_space=pltpu.MemorySpace.VMEM)
    out = pl.pallas_call(
        dual_stream_gnn_kernel,
        out_shape=jax.ShapeDtypeStruct((Bp, OUT_PAD), jnp.float32),
        in_specs=[vmem] * len(inputs),
        out_specs=vmem,
        scratch_shapes=[pltpu.VMEM((T, Bp, 4 * H), jnp.float32)],
        compiler_params=pltpu.CompilerParams(vmem_limit_bytes=int(vmem_limit)),
    )(*inputs)
    return out[:B, :OUT_DIM]


def reference_forward(params, x_student, x_teacher):
    """Pure-JAX reference mirroring the PyTorch forward (eval mode)."""
    B, T, _ = x_student.shape
    H = LSTM_HID_DIM
    pe = make_positional_encoding(T, TIME_EMB_DIM)
    dot = functools.partial(jnp.dot, precision=lax.Precision.HIGHEST)

    def cell(x, h, c, wih, whh, b):
        gates = dot(x, wih) + dot(h, whh) + b
        i = jax.nn.sigmoid(gates[:, 0 * H:1 * H])
        f = jax.nn.sigmoid(gates[:, 1 * H:2 * H])
        g = jnp.tanh(gates[:, 2 * H:3 * H])
        o = jax.nn.sigmoid(gates[:, 3 * H:4 * H])
        c = f * c + i * g
        return o * jnp.tanh(c), c

    h1 = c1 = h2 = c2 = jnp.zeros((B, H), jnp.float32)
    for t in range(T):
        frame = x_student[:, t, :]
        gnn = dot(0.5 * (frame[:, :NODE_FEAT_DIM] + frame[:, NODE_FEAT_DIM:]),
                  params["wg"]) + params["bg"]
        te = dot(x_teacher[:, t, :], params["wte"]) + params["bte"]
        pe_t = jnp.broadcast_to(pe[t][None, :], (B, TIME_EMB_DIM))
        feat = jnp.concatenate([gnn, gnn, pe_t, te], axis=1)
        h1, c1 = cell(feat, h1, c1, params["wih1"], params["whh1"], params["b1"])
        h2, c2 = cell(h1, h2, c2, params["wih2"], params["whh2"], params["b2"])

    z = jnp.maximum(dot(h2, params["wf1"]) + params["bf1"], 0.0)
    z = jnp.maximum(dot(z, params["wf2"]) + params["bf2"], 0.0)
    return dot(z, params["wf3"]) + params["bf3"]


if __name__ == "__main__":
    B, T = 2, 8
    key = jax.random.PRNGKey(0)
    k_s, k_t, k_p = jax.random.split(key, 3)

    x_student = jax.random.normal(k_s, (B, T, IN_DIM), jnp.float32)
    x_teacher = jax.random.normal(k_t, (B, T, TEACHER_DIM), jnp.float32)
    params = init_params(k_p)

    out = dual_stream_gnn_forward(params, x_student, x_teacher)
    out = jax.block_until_ready(out)

    assert out.shape == (B, OUT_DIM), out.shape
    assert bool(jnp.all(jnp.isfinite(out)))

    ref = reference_forward(params, x_student, x_teacher)
    assert bool(jnp.allclose(out, ref, rtol=5e-2, atol=5e-2)), (
        float(jnp.max(jnp.abs(out - ref))))

    print("KERNEL_OK")
</pallas_src>

<mosaic_0001>
module attributes {stable_mosaic.version = 11 : i64} {
  func.func @dual_stream_gnn_kernel(%arg0: memref<128x128xbf16, #tpu.memory_space<vmem>>, %arg1: memref<8x512xf32, #tpu.memory_space<vmem>>, %arg2: memref<128x512xbf16, #tpu.memory_space<vmem>>, %arg3: memref<128x512xbf16, #tpu.memory_space<vmem>>, %arg4: memref<256x512xbf16, #tpu.memory_space<vmem>>, %arg5: memref<1x512xf32, #tpu.memory_space<vmem>>, %arg6: memref<128x128xbf16, #tpu.memory_space<vmem>>, %arg7: memref<1x128xf32, #tpu.memory_space<vmem>>, %arg8: memref<128x128xbf16, #tpu.memory_space<vmem>>, %arg9: memref<1x128xf32, #tpu.memory_space<vmem>>, %arg10: memref<128x128xbf16, #tpu.memory_space<vmem>>, %arg11: memref<1x128xf32, #tpu.memory_space<vmem>>, %arg12: memref<16x128xf32, #tpu.memory_space<vmem>>, %arg13: memref<8x16x512xf32, #tpu.memory_space<vmem>>) attributes {dimension_semantics = [], scalar_prefetch = 0 : i64, scratch_operands = 1 : i64, tpu.core_type = #tpu.core_type<tc>} {
    %c0 = arith.constant 0 : index
    %c0_0 = arith.constant 0 : index
    %0 = vector.load %arg0[%c0, %c0_0] : memref<128x128xbf16, #tpu.memory_space<vmem>>, vector<128x128xbf16>
    %c0_1 = arith.constant 0 : index
    %c0_2 = arith.constant 0 : index
    %1 = vector.load %arg2[%c0_1, %c0_2] : memref<128x512xbf16, #tpu.memory_space<vmem>>, vector<128x512xbf16>
    %cst = arith.constant dense<0.000000e+00> : vector<128x512xf32>
    %2 = tpu.matmul %0, %1, %cst {dimension_numbers = #tpu.dot_dimension_numbers<[1], [0], [0], [1], [0, 0, 1, 1], [], []>} : vector<128x128xbf16>, vector<128x512xbf16>, vector<128x512xf32> -> vector<128x512xf32>
    %3 = vector.shape_cast %2 : vector<128x512xf32> to vector<8x16x512xf32>
    %c0_3 = arith.constant 0 : index
    %c0_4 = arith.constant 0 : index
    %c0_5 = arith.constant 0 : index
    %4 = vector.load %arg13[%c0_3, %c0_4, %c0_5] : memref<8x16x512xf32, #tpu.memory_space<vmem>>, vector<8x16x512xf32>
    tpu.vector_store %arg13[%c0_3, %c0_4, %c0_5], %3 {strides = array<i32>} : memref<8x16x512xf32, #tpu.memory_space<vmem>>, vector<8x16x512xf32>,
    %cst_6 = arith.constant 0.000000e+00 : f32
    %5 = vector.broadcast %cst_6 : f32 to vector<16x128xf32>
    %c0_i32 = arith.constant 0 : i32
    %6 = arith.index_cast %c0_i32 : i32 to index
    %c0_7 = arith.constant 0 : index
    %c0_8 = arith.constant 0 : index
    %7 = vector.load %arg13[%6, %c0_7, %c0_8] : memref<8x16x512xf32, #tpu.memory_space<vmem>>, vector<1x16x512xf32>
    %8 = vector.shape_cast %7 : vector<1x16x512xf32> to vector<16x512xf32>
    %9 = arith.index_cast %c0_i32 : i32 to index
    %c0_9 = arith.constant 0 : index
    %10 = vector.load %arg1[%9, %c0_9] : memref<8x512xf32, #tpu.memory_space<vmem>>, vector<1x512xf32>
    %11 = vector.broadcast %10 : vector<1x512xf32> to vector<16x512xf32>
    %12 = arith.addf %8, %11 : vector<16x512xf32>
    %13 = arith.truncf %5 : vector<16x128xf32> to vector<16x128xbf16>
    %c0_10 = arith.constant 0 : index
    %c0_11 = arith.constant 0 : index
    %14 = vector.load %arg3[%c0_10, %c0_11] : memref<128x512xbf16, #tpu.memory_space<vmem>>, vector<128x512xbf16>
    %cst_12 = arith.constant dense<0.000000e+00> : vector<16x512xf32>
    %15 = tpu.matmul %13, %14, %cst_12 {dimension_numbers = #tpu.dot_dimension_numbers<[1], [0], [0], [1], [0, 0, 1, 1], [], []>} : vector<16x128xbf16>, vector<128x512xbf16>, vector<16x512xf32> -> vector<16x512xf32>
    %16 = arith.addf %12, %15 : vector<16x512xf32>
    %17 = vector.extract_strided_slice %16 {offsets = [0, 0], sizes = [16, 384], strides = [1, 1]} : vector<16x512xf32> to vector<16x384xf32>
    %18 = arith.negf %17 : vector<16x384xf32>
    %19 = math.exp %18 : vector<16x384xf32>
    %cst_13 = arith.constant 1.000000e+00 : f32
    %20 = vector.broadcast %cst_13 : f32 to vector<16x384xf32>
    %21 = arith.addf %20, %19 : vector<16x384xf32>
    %22 = arith.divf %20, %21 : vector<16x384xf32>
    %23 = vector.extract_strided_slice %16 {offsets = [0, 384], sizes = [16, 128], strides = [1, 1]} : vector<16x512xf32> to vector<16x128xf32>
    %24 = math.tanh %23 : vector<16x128xf32>
    %25 = vector.extract_strided_slice %22 {offsets = [0, 0], sizes = [16, 128], strides = [1, 1]} : vector<16x384xf32> to vector<16x128xf32>
    %26 = vector.extract_strided_slice %22 {offsets = [0, 128], sizes = [16, 128], strides = [1, 1]} : vector<16x384xf32> to vector<16x128xf32>
    %27 = vector.extract_strided_slice %22 {offsets = [0, 256], sizes = [16, 128], strides = [1, 1]} : vector<16x384xf32> to vector<16x128xf32>
    %28 = arith.mulf %26, %5 : vector<16x128xf32>
    %29 = arith.mulf %25, %24 : vector<16x128xf32>
    %30 = arith.addf %28, %29 : vector<16x128xf32>
    %31 = math.tanh %30 : vector<16x128xf32>
    %32 = arith.mulf %27, %31 : vector<16x128xf32>
    %33 = tpu.concatenate %32, %5 in 1 : vector<16x128xf32>, vector<16x128xf32> -> vector<16x256xf32>
    %34 = arith.truncf %33 : vector<16x256xf32> to vector<16x256xbf16>
    %c0_14 = arith.constant 0 : index
    %c0_15 = arith.constant 0 : index
    %35 = vector.load %arg4[%c0_14, %c0_15] : memref<256x512xbf16, #tpu.memory_space<vmem>>, vector<256x512xbf16>
    %cst_16 = arith.constant dense<0.000000e+00> : vector<16x512xf32>
    %36 = tpu.matmul %34, %35, %cst_16 {dimension_numbers = #tpu.dot_dimension_numbers<[1], [0], [0], [1], [0, 0, 1, 1], [], []>} : vector<16x256xbf16>, vector<256x512xbf16>, vector<16x512xf32> -> vector<16x512xf32>
    %c0_17 = arith.constant 0 : index
    %c0_18 = arith.constant 0 : index
    %37 = vector.load %arg5[%c0_17, %c0_18] : memref<1x512xf32, #tpu.memory_space<vmem>>, vector<1x512xf32>
    %38 = vector.broadcast %37 : vector<1x512xf32> to vector<16x512xf32>
    %39 = arith.addf %36, %38 : vector<16x512xf32>
    %40 = vector.extract_strided_slice %39 {offsets = [0, 0], sizes = [16, 384], strides = [1, 1]} : vector<16x512xf32> to vector<16x384xf32>
    %41 = arith.negf %40 : vector<16x384xf32>
    %42 = math.exp %41 : vector<16x384xf32>
    %cst_19 = arith.constant 1.000000e+00 : f32
    %43 = vector.broadcast %cst_19 : f32 to vector<16x384xf32>
    %44 = arith.addf %43, %42 : vector<16x384xf32>
    %45 = arith.divf %43, %44 : vector<16x384xf32>
    %46 = vector.extract_strided_slice %39 {offsets = [0, 384], sizes = [16, 128], strides = [1, 1]} : vector<16x512xf32> to vector<16x128xf32>
    %47 = math.tanh %46 : vector<16x128xf32>
    %48 = vector.extract_strided_slice %45 {offsets = [0, 0], sizes = [16, 128], strides = [1, 1]} : vector<16x384xf32> to vector<16x128xf32>
    %49 = vector.extract_strided_slice %45 {offsets = [0, 128], sizes = [16, 128], strides = [1, 1]} : vector<16x384xf32> to vector<16x128xf32>
    %50 = vector.extract_strided_slice %45 {offsets = [0, 256], sizes = [16, 128], strides = [1, 1]} : vector<16x384xf32> to vector<16x128xf32>
    %51 = arith.mulf %49, %5 : vector<16x128xf32>
    %52 = arith.mulf %48, %47 : vector<16x128xf32>
    %53 = arith.addf %51, %52 : vector<16x128xf32>
    %54 = math.tanh %53 : vector<16x128xf32>
    %55 = arith.mulf %50, %54 : vector<16x128xf32>
    %c1_i32 = arith.constant 1 : i32
    %56 = arith.index_cast %c1_i32 : i32 to index
    %c0_20 = arith.constant 0 : index
    %c0_21 = arith.constant 0 : index
    %57 = vector.load %arg13[%56, %c0_20, %c0_21] : memref<8x16x512xf32, #tpu.memory_space<vmem>>, vector<1x16x512xf32>
    %58 = vector.shape_cast %57 : vector<1x16x512xf32> to vector<16x512xf32>
    %59 = arith.index_cast %c1_i32 : i32 to index
    %c0_22 = arith.constant 0 : index
    %60 = vector.load %arg1[%59, %c0_22] : memref<8x512xf32, #tpu.memory_space<vmem>>, vector<1x512xf32>
    %61 = vector.broadcast %60 : vector<1x512xf32> to vector<16x512xf32>
    %62 = arith.addf %58, %61 : vector<16x512xf32>
    %63 = arith.truncf %32 : vector<16x128xf32> to vector<16x128xbf16>
    %c0_23 = arith.constant 0 : index
    %c0_24 = arith.constant 0 : index
    %64 = vector.load %arg3[%c0_23, %c0_24] : memref<128x512xbf16, #tpu.memory_space<vmem>>, vector<128x512xbf16>
    %cst_25 = arith.constant dense<0.000000e+00> : vector<16x512xf32>
    %65 = tpu.matmul %63, %64, %cst_25 {dimension_numbers = #tpu.dot_dimension_numbers<[1], [0], [0], [1], [0, 0, 1, 1], [], []>} : vector<16x128xbf16>, vector<128x512xbf16>, vector<16x512xf32> -> vector<16x512xf32>
    %66 = arith.addf %62, %65 : vector<16x512xf32>
    %67 = vector.extract_strided_slice %66 {offsets = [0, 0], sizes = [16, 384], strides = [1, 1]} : vector<16x512xf32> to vector<16x384xf32>
    %68 = arith.negf %67 : vector<16x384xf32>
    %69 = math.exp %68 : vector<16x384xf32>
    %cst_26 = arith.constant 1.000000e+00 : f32
    %70 = vector.broadcast %cst_26 : f32 to vector<16x384xf32>
    %71 = arith.addf %70, %69 : vector<16x384xf32>
    %72 = arith.divf %70, %71 : vector<16x384xf32>
    %73 = vector.extract_strided_slice %66 {offsets = [0, 384], sizes = [16, 128], strides = [1, 1]} : vector<16x512xf32> to vector<16x128xf32>
    %74 = math.tanh %73 : vector<16x128xf32>
    %75 = vector.extract_strided_slice %72 {offsets = [0, 0], sizes = [16, 128], strides = [1, 1]} : vector<16x384xf32> to vector<16x128xf32>
    %76 = vector.extract_strided_slice %72 {offsets = [0, 128], sizes = [16, 128], strides = [1, 1]} : vector<16x384xf32> to vector<16x128xf32>
    %77 = vector.extract_strided_slice %72 {offsets = [0, 256], sizes = [16, 128], strides = [1, 1]} : vector<16x384xf32> to vector<16x128xf32>
    %78 = arith.mulf %76, %30 : vector<16x128xf32>
    %79 = arith.mulf %75, %74 : vector<16x128xf32>
    %80 = arith.addf %78, %79 : vector<16x128xf32>
    %81 = math.tanh %80 : vector<16x128xf32>
    %82 = arith.mulf %77, %81 : vector<16x128xf32>
    %83 = tpu.concatenate %82, %55 in 1 : vector<16x128xf32>, vector<16x128xf32> -> vector<16x256xf32>
    %84 = arith.truncf %83 : vector<16x256xf32> to vector<16x256xbf16>
    %c0_27 = arith.constant 0 : index
    %c0_28 = arith.constant 0 : index
    %85 = vector.load %arg4[%c0_27, %c0_28] : memref<256x512xbf16, #tpu.memory_space<vmem>>, vector<256x512xbf16>
    %cst_29 = arith.constant dense<0.000000e+00> : vector<16x512xf32>
    %86 = tpu.matmul %84, %85, %cst_29 {dimension_numbers = #tpu.dot_dimension_numbers<[1], [0], [0], [1], [0, 0, 1, 1], [], []>} : vector<16x256xbf16>, vector<256x512xbf16>, vector<16x512xf32> -> vector<16x512xf32>
    %c0_30 = arith.constant 0 : index
    %c0_31 = arith.constant 0 : index
    %87 = vector.load %arg5[%c0_30, %c0_31] : memref<1x512xf32, #tpu.memory_space<vmem>>, vector<1x512xf32>
    %88 = vector.broadcast %87 : vector<1x512xf32> to vector<16x512xf32>
    %89 = arith.addf %86, %88 : vector<16x512xf32>
    %90 = vector.extract_strided_slice %89 {offsets = [0, 0], sizes = [16, 384], strides = [1, 1]} : vector<16x512xf32> to vector<16x384xf32>
    %91 = arith.negf %90 : vector<16x384xf32>
    %92 = math.exp %91 : vector<16x384xf32>
    %cst_32 = arith.constant 1.000000e+00 : f32
    %93 = vector.broadcast %cst_32 : f32 to vector<16x384xf32>
    %94 = arith.addf %93, %92 : vector<16x384xf32>
    %95 = arith.divf %93, %94 : vector<16x384xf32>
    %96 = vector.extract_strided_slice %89 {offsets = [0, 384], sizes = [16, 128], strides = [1, 1]} : vector<16x512xf32> to vector<16x128xf32>
    %97 = math.tanh %96 : vector<16x128xf32>
    %98 = vector.extract_strided_slice %95 {offsets = [0, 0], sizes = [16, 128], strides = [1, 1]} : vector<16x384xf32> to vector<16x128xf32>
    %99 = vector.extract_strided_slice %95 {offsets = [0, 128], sizes = [16, 128], strides = [1, 1]} : vector<16x384xf32> to vector<16x128xf32>
    %100 = vector.extract_strided_slice %95 {offsets = [0, 256], sizes = [16, 128], strides = [1, 1]} : vector<16x384xf32> to vector<16x128xf32>
    %101 = arith.mulf %99, %53 : vector<16x128xf32>
    %102 = arith.mulf %98, %97 : vector<16x128xf32>
    %103 = arith.addf %101, %102 : vector<16x128xf32>
    %104 = math.tanh %103 : vector<16x128xf32>
    %105 = arith.mulf %100, %104 : vector<16x128xf32>
    %c2_i32 = arith.constant 2 : i32
    %106 = arith.index_cast %c2_i32 : i32 to index
    %c0_33 = arith.constant 0 : index
    %c0_34 = arith.constant 0 : index
    %107 = vector.load %arg13[%106, %c0_33, %c0_34] : memref<8x16x512xf32, #tpu.memory_space<vmem>>, vector<1x16x512xf32>
    %108 = vector.shape_cast %107 : vector<1x16x512xf32> to vector<16x512xf32>
    %109 = arith.index_cast %c2_i32 : i32 to index
    %c0_35 = arith.constant 0 : index
    %110 = vector.load %arg1[%109, %c0_35] : memref<8x512xf32, #tpu.memory_space<vmem>>, vector<1x512xf32>
    %111 = vector.broadcast %110 : vector<1x512xf32> to vector<16x512xf32>
    %112 = arith.addf %108, %111 : vector<16x512xf32>
    %113 = arith.truncf %82 : vector<16x128xf32> to vector<16x128xbf16>
    %c0_36 = arith.constant 0 : index
    %c0_37 = arith.constant 0 : index
    %114 = vector.load %arg3[%c0_36, %c0_37] : memref<128x512xbf16, #tpu.memory_space<vmem>>, vector<128x512xbf16>
    %cst_38 = arith.constant dense<0.000000e+00> : vector<16x512xf32>
    %115 = tpu.matmul %113, %114, %cst_38 {dimension_numbers = #tpu.dot_dimension_numbers<[1], [0], [0], [1], [0, 0, 1, 1], [], []>} : vector<16x128xbf16>, vector<128x512xbf16>, vector<16x512xf32> -> vector<16x512xf32>
    %116 = arith.addf %112, %115 : vector<16x512xf32>
    %117 = vector.extract_strided_slice %116 {offsets = [0, 0], sizes = [16, 384], strides = [1, 1]} : vector<16x512xf32> to vector<16x384xf32>
    %118 = arith.negf %117 : vector<16x384xf32>
    %119 = math.exp %118 : vector<16x384xf32>
    %cst_39 = arith.constant 1.000000e+00 : f32
    %120 = vector.broadcast %cst_39 : f32 to vector<16x384xf32>
    %121 = arith.addf %120, %119 : vector<16x384xf32>
    %122 = arith.divf %120, %121 : vector<16x384xf32>
    %123 = vector.extract_strided_slice %116 {offsets = [0, 384], sizes = [16, 128], strides = [1, 1]} : vector<16x512xf32> to vector<16x128xf32>
    %124 = math.tanh %123 : vector<16x128xf32>
    %125 = vector.extract_strided_slice %122 {offsets = [0, 0], sizes = [16, 128], strides = [1, 1]} : vector<16x384xf32> to vector<16x128xf32>
    %126 = vector.extract_strided_slice %122 {offsets = [0, 128], sizes = [16, 128], strides = [1, 1]} : vector<16x384xf32> to vector<16x128xf32>
    %127 = vector.extract_strided_slice %122 {offsets = [0, 256], sizes = [16, 128], strides = [1, 1]} : vector<16x384xf32> to vector<16x128xf32>
    %128 = arith.mulf %126, %80 : vector<16x128xf32>
    %129 = arith.mulf %125, %124 : vector<16x128xf32>
    %130 = arith.addf %128, %129 : vector<16x128xf32>
    %131 = math.tanh %130 : vector<16x128xf32>
    %132 = arith.mulf %127, %131 : vector<16x128xf32>
    %133 = tpu.concatenate %132, %105 in 1 : vector<16x128xf32>, vector<16x128xf32> -> vector<16x256xf32>
    %134 = arith.truncf %133 : vector<16x256xf32> to vector<16x256xbf16>
    %c0_40 = arith.constant 0 : index
    %c0_41 = arith.constant 0 : index
    %135 = vector.load %arg4[%c0_40, %c0_41] : memref<256x512xbf16, #tpu.memory_space<vmem>>, vector<256x512xbf16>
    %cst_42 = arith.constant dense<0.000000e+00> : vector<16x512xf32>
    %136 = tpu.matmul %134, %135, %cst_42 {dimension_numbers = #tpu.dot_dimension_numbers<[1], [0], [0], [1], [0, 0, 1, 1], [], []>} : vector<16x256xbf16>, vector<256x512xbf16>, vector<16x512xf32> -> vector<16x512xf32>
    %c0_43 = arith.constant 0 : index
    %c0_44 = arith.constant 0 : index
    %137 = vector.load %arg5[%c0_43, %c0_44] : memref<1x512xf32, #tpu.memory_space<vmem>>, vector<1x512xf32>
    %138 = vector.broadcast %137 : vector<1x512xf32> to vector<16x512xf32>
    %139 = arith.addf %136, %138 : vector<16x512xf32>
    %140 = vector.extract_strided_slice %139 {offsets = [0, 0], sizes = [16, 384], strides = [1, 1]} : vector<16x512xf32> to vector<16x384xf32>
    %141 = arith.negf %140 : vector<16x384xf32>
    %142 = math.exp %141 : vector<16x384xf32>
    %cst_45 = arith.constant 1.000000e+00 : f32
    %143 = vector.broadcast %cst_45 : f32 to vector<16x384xf32>
    %144 = arith.addf %143, %142 : vector<16x384xf32>
    %145 = arith.divf %143, %144 : vector<16x384xf32>
    %146 = vector.extract_strided_slice %139 {offsets = [0, 384], sizes = [16, 128], strides = [1, 1]} : vector<16x512xf32> to vector<16x128xf32>
    %147 = math.tanh %146 : vector<16x128xf32>
    %148 = vector.extract_strided_slice %145 {offsets = [0, 0], sizes = [16, 128], strides = [1, 1]} : vector<16x384xf32> to vector<16x128xf32>
    %149 = vector.extract_strided_slice %145 {offsets = [0, 128], sizes = [16, 128], strides = [1, 1]} : vector<16x384xf32> to vector<16x128xf32>
    %150 = vector.extract_strided_slice %145 {offsets = [0, 256], sizes = [16, 128], strides = [1, 1]} : vector<16x384xf32> to vector<16x128xf32>
    %151 = arith.mulf %149, %103 : vector<16x128xf32>
    %152 = arith.mulf %148, %147 : vector<16x128xf32>
    %153 = arith.addf %151, %152 : vector<16x128xf32>
    %154 = math.tanh %153 : vector<16x128xf32>
    %155 = arith.mulf %150, %154 : vector<16x128xf32>
    %c3_i32 = arith.constant 3 : i32
    %156 = arith.index_cast %c3_i32 : i32 to index
    %c0_46 = arith.constant 0 : index
    %c0_47 = arith.constant 0 : index
    %157 = vector.load %arg13[%156, %c0_46, %c0_47] : memref<8x16x512xf32, #tpu.memory_space<vmem>>, vector<1x16x512xf32>
    %158 = vector.shape_cast %157 : vector<1x16x512xf32> to vector<16x512xf32>
    %159 = arith.index_cast %c3_i32 : i32 to index
    %c0_48 = arith.constant 0 : index
    %160 = vector.load %arg1[%159, %c0_48] : memref<8x512xf32, #tpu.memory_space<vmem>>, vector<1x512xf32>
    %161 = vector.broadcast %160 : vector<1x512xf32> to vector<16x512xf32>
    %162 = arith.addf %158, %161 : vector<16x512xf32>
    %163 = arith.truncf %132 : vector<16x128xf32> to vector<16x128xbf16>
    %c0_49 = arith.constant 0 : index
    %c0_50 = arith.constant 0 : index
    %164 = vector.load %arg3[%c0_49, %c0_50] : memref<128x512xbf16, #tpu.memory_space<vmem>>, vector<128x512xbf16>
    %cst_51 = arith.constant dense<0.000000e+00> : vector<16x512xf32>
    %165 = tpu.matmul %163, %164, %cst_51 {dimension_numbers = #tpu.dot_dimension_numbers<[1], [0], [0], [1], [0, 0, 1, 1], [], []>} : vector<16x128xbf16>, vector<128x512xbf16>, vector<16x512xf32> -> vector<16x512xf32>
    %166 = arith.addf %162, %165 : vector<16x512xf32>
    %167 = vector.extract_strided_slice %166 {offsets = [0, 0], sizes = [16, 384], strides = [1, 1]} : vector<16x512xf32> to vector<16x384xf32>
    %168 = arith.negf %167 : vector<16x384xf32>
    %169 = math.exp %168 : vector<16x384xf32>
    %cst_52 = arith.constant 1.000000e+00 : f32
    %170 = vector.broadcast %cst_52 : f32 to vector<16x384xf32>
    %171 = arith.addf %170, %169 : vector<16x384xf32>
    %172 = arith.divf %170, %171 : vector<16x384xf32>
    %173 = vector.extract_strided_slice %166 {offsets = [0, 384], sizes = [16, 128], strides = [1, 1]} : vector<16x512xf32> to vector<16x128xf32>
    %174 = math.tanh %173 : vector<16x128xf32>
    %175 = vector.extract_strided_slice %172 {offsets = [0, 0], sizes = [16, 128], strides = [1, 1]} : vector<16x384xf32> to vector<16x128xf32>
    %176 = vector.extract_strided_slice %172 {offsets = [0, 128], sizes = [16, 128], strides = [1, 1]} : vector<16x384xf32> to vector<16x128xf32>
    %177 = vector.extract_strided_slice %172 {offsets = [0, 256], sizes = [16, 128], strides = [1, 1]} : vector<16x384xf32> to vector<16x128xf32>
    %178 = arith.mulf %176, %130 : vector<16x128xf32>
    %179 = arith.mulf %175, %174 : vector<16x128xf32>
    %180 = arith.addf %178, %179 : vector<16x128xf32>
    %181 = math.tanh %180 : vector<16x128xf32>
    %182 = arith.mulf %177, %181 : vector<16x128xf32>
    %183 = tpu.concatenate %182, %155 in 1 : vector<16x128xf32>, vector<16x128xf32> -> vector<16x256xf32>
    %184 = arith.truncf %183 : vector<16x256xf32> to vector<16x256xbf16>
    %c0_53 = arith.constant 0 : index
    %c0_54 = arith.constant 0 : index
    %185 = vector.load %arg4[%c0_53, %c0_54] : memref<256x512xbf16, #tpu.memory_space<vmem>>, vector<256x512xbf16>
    %cst_55 = arith.constant dense<0.000000e+00> : vector<16x512xf32>
    %186 = tpu.matmul %184, %185, %cst_55 {dimension_numbers = #tpu.dot_dimension_numbers<[1], [0], [0], [1], [0, 0, 1, 1], [], []>} : vector<16x256xbf16>, vector<256x512xbf16>, vector<16x512xf32> -> vector<16x512xf32>
    %c0_56 = arith.constant 0 : index
    %c0_57 = arith.constant 0 : index
    %187 = vector.load %arg5[%c0_56, %c0_57] : memref<1x512xf32, #tpu.memory_space<vmem>>, vector<1x512xf32>
    %188 = vector.broadcast %187 : vector<1x512xf32> to vector<16x512xf32>
    %189 = arith.addf %186, %188 : vector<16x512xf32>
    %190 = vector.extract_strided_slice %189 {offsets = [0, 0], sizes = [16, 384], strides = [1, 1]} : vector<16x512xf32> to vector<16x384xf32>
    %191 = arith.negf %190 : vector<16x384xf32>
    %192 = math.exp %191 : vector<16x384xf32>
    %cst_58 = arith.constant 1.000000e+00 : f32
    %193 = vector.broadcast %cst_58 : f32 to vector<16x384xf32>
    %194 = arith.addf %193, %192 : vector<16x384xf32>
    %195 = arith.divf %193, %194 : vector<16x384xf32>
    %196 = vector.extract_strided_slice %189 {offsets = [0, 384], sizes = [16, 128], strides = [1, 1]} : vector<16x512xf32> to vector<16x128xf32>
    %197 = math.tanh %196 : vector<16x128xf32>
    %198 = vector.extract_strided_slice %195 {offsets = [0, 0], sizes = [16, 128], strides = [1, 1]} : vector<16x384xf32> to vector<16x128xf32>
    %199 = vector.extract_strided_slice %195 {offsets = [0, 128], sizes = [16, 128], strides = [1, 1]} : vector<16x384xf32> to vector<16x128xf32>
    %200 = vector.extract_strided_slice %195 {offsets = [0, 256], sizes = [16, 128], strides = [1, 1]} : vector<16x384xf32> to vector<16x128xf32>
    %201 = arith.mulf %199, %153 : vector<16x128xf32>
    %202 = arith.mulf %198, %197 : vector<16x128xf32>
    %203 = arith.addf %201, %202 : vector<16x128xf32>
    %204 = math.tanh %203 : vector<16x128xf32>
    %205 = arith.mulf %200, %204 : vector<16x128xf32>
    %c4_i32 = arith.constant 4 : i32
    %206 = arith.index_cast %c4_i32 : i32 to index
    %c0_59 = arith.constant 0 : index
    %c0_60 = arith.constant 0 : index
    %207 = vector.load %arg13[%206, %c0_59, %c0_60] : memref<8x16x512xf32, #tpu.memory_space<vmem>>, vector<1x16x512xf32>
    %208 = vector.shape_cast %207 : vector<1x16x512xf32> to vector<16x512xf32>
    %209 = arith.index_cast %c4_i32 : i32 to index
    %c0_61 = arith.constant 0 : index
    %210 = vector.load %arg1[%209, %c0_61] : memref<8x512xf32, #tpu.memory_space<vmem>>, vector<1x512xf32>
    %211 = vector.broadcast %210 : vector<1x512xf32> to vector<16x512xf32>
    %212 = arith.addf %208, %211 : vector<16x512xf32>
    %213 = arith.truncf %182 : vector<16x128xf32> to vector<16x128xbf16>
    %c0_62 = arith.constant 0 : index
    %c0_63 = arith.constant 0 : index
    %214 = vector.load %arg3[%c0_62, %c0_63] : memref<128x512xbf16, #tpu.memory_space<vmem>>, vector<128x512xbf16>
    %cst_64 = arith.constant dense<0.000000e+00> : vector<16x512xf32>
    %215 = tpu.matmul %213, %214, %cst_64 {dimension_numbers = #tpu.dot_dimension_numbers<[1], [0], [0], [1], [0, 0, 1, 1], [], []>} : vector<16x128xbf16>, vector<128x512xbf16>, vector<16x512xf32> -> vector<16x512xf32>
    %216 = arith.addf %212, %215 : vector<16x512xf32>
    %217 = vector.extract_strided_slice %216 {offsets = [0, 0], sizes = [16, 384], strides = [1, 1]} : vector<16x512xf32> to vector<16x384xf32>
    %218 = arith.negf %217 : vector<16x384xf32>
    %219 = math.exp %218 : vector<16x384xf32>
    %cst_65 = arith.constant 1.000000e+00 : f32
    %220 = vector.broadcast %cst_65 : f32 to vector<16x384xf32>
    %221 = arith.addf %220, %219 : vector<16x384xf32>
    %222 = arith.divf %220, %221 : vector<16x384xf32>
    %223 = vector.extract_strided_slice %216 {offsets = [0, 384], sizes = [16, 128], strides = [1, 1]} : vector<16x512xf32> to vector<16x128xf32>
    %224 = math.tanh %223 : vector<16x128xf32>
    %225 = vector.extract_strided_slice %222 {offsets = [0, 0], sizes = [16, 128], strides = [1, 1]} : vector<16x384xf32> to vector<16x128xf32>
    %226 = vector.extract_strided_slice %222 {offsets = [0, 128], sizes = [16, 128], strides = [1, 1]} : vector<16x384xf32> to vector<16x128xf32>
    %227 = vector.extract_strided_slice %222 {offsets = [0, 256], sizes = [16, 128], strides = [1, 1]} : vector<16x384xf32> to vector<16x128xf32>
    %228 = arith.mulf %226, %180 : vector<16x128xf32>
    %229 = arith.mulf %225, %224 : vector<16x128xf32>
    %230 = arith.addf %228, %229 : vector<16x128xf32>
    %231 = math.tanh %230 : vector<16x128xf32>
    %232 = arith.mulf %227, %231 : vector<16x128xf32>
    %233 = tpu.concatenate %232, %205 in 1 : vector<16x128xf32>, vector<16x128xf32> -> vector<16x256xf32>
    %234 = arith.truncf %233 : vector<16x256xf32> to vector<16x256xbf16>
    %c0_66 = arith.constant 0 : index
    %c0_67 = arith.constant 0 : index
    %235 = vector.load %arg4[%c0_66, %c0_67] : memref<256x512xbf16, #tpu.memory_space<vmem>>, vector<256x512xbf16>
    %cst_68 = arith.constant dense<0.000000e+00> : vector<16x512xf32>
    %236 = tpu.matmul %234, %235, %cst_68 {dimension_numbers = #tpu.dot_dimension_numbers<[1], [0], [0], [1], [0, 0, 1, 1], [], []>} : vector<16x256xbf16>, vector<256x512xbf16>, vector<16x512xf32> -> vector<16x512xf32>
    %c0_69 = arith.constant 0 : index
    %c0_70 = arith.constant 0 : index
    %237 = vector.load %arg5[%c0_69, %c0_70] : memref<1x512xf32, #tpu.memory_space<vmem>>, vector<1x512xf32>
    %238 = vector.broadcast %237 : vector<1x512xf32> to vector<16x512xf32>
    %239 = arith.addf %236, %238 : vector<16x512xf32>
    %240 = vector.extract_strided_slice %239 {offsets = [0, 0], sizes = [16, 384], strides = [1, 1]} : vector<16x512xf32> to vector<16x384xf32>
    %241 = arith.negf %240 : vector<16x384xf32>
    %242 = math.exp %241 : vector<16x384xf32>
    %cst_71 = arith.constant 1.000000e+00 : f32
    %243 = vector.broadcast %cst_71 : f32 to vector<16x384xf32>
    %244 = arith.addf %243, %242 : vector<16x384xf32>
    %245 = arith.divf %243, %244 : vector<16x384xf32>
    %246 = vector.extract_strided_slice %239 {offsets = [0, 384], sizes = [16, 128], strides = [1, 1]} : vector<16x512xf32> to vector<16x128xf32>
    %247 = math.tanh %246 : vector<16x128xf32>
    %248 = vector.extract_strided_slice %245 {offsets = [0, 0], sizes = [16, 128], strides = [1, 1]} : vector<16x384xf32> to vector<16x128xf32>
    %249 = vector.extract_strided_slice %245 {offsets = [0, 128], sizes = [16, 128], strides = [1, 1]} : vector<16x384xf32> to vector<16x128xf32>
    %250 = vector.extract_strided_slice %245 {offsets = [0, 256], sizes = [16, 128], strides = [1, 1]} : vector<16x384xf32> to vector<16x128xf32>
    %251 = arith.mulf %249, %203 : vector<16x128xf32>
    %252 = arith.mulf %248, %247 : vector<16x128xf32>
    %253 = arith.addf %251, %252 : vector<16x128xf32>
    %254 = math.tanh %253 : vector<16x128xf32>
    %255 = arith.mulf %250, %254 : vector<16x128xf32>
    %c5_i32 = arith.constant 5 : i32
    %256 = arith.index_cast %c5_i32 : i32 to index
    %c0_72 = arith.constant 0 : index
    %c0_73 = arith.constant 0 : index
    %257 = vector.load %arg13[%256, %c0_72, %c0_73] : memref<8x16x512xf32, #tpu.memory_space<vmem>>, vector<1x16x512xf32>
    %258 = vector.shape_cast %257 : vector<1x16x512xf32> to vector<16x512xf32>
    %259 = arith.index_cast %c5_i32 : i32 to index
    %c0_74 = arith.constant 0 : index
    %260 = vector.load %arg1[%259, %c0_74] : memref<8x512xf32, #tpu.memory_space<vmem>>, vector<1x512xf32>
    %261 = vector.broadcast %260 : vector<1x512xf32> to vector<16x512xf32>
    %262 = arith.addf %258, %261 : vector<16x512xf32>
    %263 = arith.truncf %232 : vector<16x128xf32> to vector<16x128xbf16>
    %c0_75 = arith.constant 0 : index
    %c0_76 = arith.constant 0 : index
    %264 = vector.load %arg3[%c0_75, %c0_76] : memref<128x512xbf16, #tpu.memory_space<vmem>>, vector<128x512xbf16>
    %cst_77 = arith.constant dense<0.000000e+00> : vector<16x512xf32>
    %265 = tpu.matmul %263, %264, %cst_77 {dimension_numbers = #tpu.dot_dimension_numbers<[1], [0], [0], [1], [0, 0, 1, 1], [], []>} : vector<16x128xbf16>, vector<128x512xbf16>, vector<16x512xf32> -> vector<16x512xf32>
    %266 = arith.addf %262, %265 : vector<16x512xf32>
    %267 = vector.extract_strided_slice %266 {offsets = [0, 0], sizes = [16, 384], strides = [1, 1]} : vector<16x512xf32> to vector<16x384xf32>
    %268 = arith.negf %267 : vector<16x384xf32>
    %269 = math.exp %268 : vector<16x384xf32>
    %cst_78 = arith.constant 1.000000e+00 : f32
    %270 = vector.broadcast %cst_78 : f32 to vector<16x384xf32>
    %271 = arith.addf %270, %269 : vector<16x384xf32>
    %272 = arith.divf %270, %271 : vector<16x384xf32>
    %273 = vector.extract_strided_slice %266 {offsets = [0, 384], sizes = [16, 128], strides = [1, 1]} : vector<16x512xf32> to vector<16x128xf32>
    %274 = math.tanh %273 : vector<16x128xf32>
    %275 = vector.extract_strided_slice %272 {offsets = [0, 0], sizes = [16, 128], strides = [1, 1]} : vector<16x384xf32> to vector<16x128xf32>
    %276 = vector.extract_strided_slice %272 {offsets = [0, 128], sizes = [16, 128], strides = [1, 1]} : vector<16x384xf32> to vector<16x128xf32>
    %277 = vector.extract_strided_slice %272 {offsets = [0, 256], sizes = [16, 128], strides = [1, 1]} : vector<16x384xf32> to vector<16x128xf32>
    %278 = arith.mulf %276, %230 : vector<16x128xf32>
    %279 = arith.mulf %275, %274 : vector<16x128xf32>
    %280 = arith.addf %278, %279 : vector<16x128xf32>
    %281 = math.tanh %280 : vector<16x128xf32>
    %282 = arith.mulf %277, %281 : vector<16x128xf32>
    %283 = tpu.concatenate %282, %255 in 1 : vector<16x128xf32>, vector<16x128xf32> -> vector<16x256xf32>
    %284 = arith.truncf %283 : vector<16x256xf32> to vector<16x256xbf16>
    %c0_79 = arith.constant 0 : index
    %c0_80 = arith.constant 0 : index
    %285 = vector.load %arg4[%c0_79, %c0_80] : memref<256x512xbf16, #tpu.memory_space<vmem>>, vector<256x512xbf16>
    %cst_81 = arith.constant dense<0.000000e+00> : vector<16x512xf32>
    %286 = tpu.matmul %284, %285, %cst_81 {dimension_numbers = #tpu.dot_dimension_numbers<[1], [0], [0], [1], [0, 0, 1, 1], [], []>} : vector<16x256xbf16>, vector<256x512xbf16>, vector<16x512xf32> -> vector<16x512xf32>
    %c0_82 = arith.constant 0 : index
    %c0_83 = arith.constant 0 : index
    %287 = vector.load %arg5[%c0_82, %c0_83] : memref<1x512xf32, #tpu.memory_space<vmem>>, vector<1x512xf32>
    %288 = vector.broadcast %287 : vector<1x512xf32> to vector<16x512xf32>
    %289 = arith.addf %286, %288 : vector<16x512xf32>
    %290 = vector.extract_strided_slice %289 {offsets = [0, 0], sizes = [16, 384], strides = [1, 1]} : vector<16x512xf32> to vector<16x384xf32>
    %291 = arith.negf %290 : vector<16x384xf32>
    %292 = math.exp %291 : vector<16x384xf32>
    %cst_84 = arith.constant 1.000000e+00 : f32
    %293 = vector.broadcast %cst_84 : f32 to vector<16x384xf32>
    %294 = arith.addf %293, %292 : vector<16x384xf32>
    %295 = arith.divf %293, %294 : vector<16x384xf32>
    %296 = vector.extract_strided_slice %289 {offsets = [0, 384], sizes = [16, 128], strides = [1, 1]} : vector<16x512xf32> to vector<16x128xf32>
    %297 = math.tanh %296 : vector<16x128xf32>
    %298 = vector.extract_strided_slice %295 {offsets = [0, 0], sizes = [16, 128], strides = [1, 1]} : vector<16x384xf32> to vector<16x128xf32>
    %299 = vector.extract_strided_slice %295 {offsets = [0, 128], sizes = [16, 128], strides = [1, 1]} : vector<16x384xf32> to vector<16x128xf32>
    %300 = vector.extract_strided_slice %295 {offsets = [0, 256], sizes = [16, 128], strides = [1, 1]} : vector<16x384xf32> to vector<16x128xf32>
    %301 = arith.mulf %299, %253 : vector<16x128xf32>
    %302 = arith.mulf %298, %297 : vector<16x128xf32>
    %303 = arith.addf %301, %302 : vector<16x128xf32>
    %304 = math.tanh %303 : vector<16x128xf32>
    %305 = arith.mulf %300, %304 : vector<16x128xf32>
    %c6_i32 = arith.constant 6 : i32
    %306 = arith.index_cast %c6_i32 : i32 to index
    %c0_85 = arith.constant 0 : index
    %c0_86 = arith.constant 0 : index
    %307 = vector.load %arg13[%306, %c0_85, %c0_86] : memref<8x16x512xf32, #tpu.memory_space<vmem>>, vector<1x16x512xf32>
    %308 = vector.shape_cast %307 : vector<1x16x512xf32> to vector<16x512xf32>
    %309 = arith.index_cast %c6_i32 : i32 to index
    %c0_87 = arith.constant 0 : index
    %310 = vector.load %arg1[%309, %c0_87] : memref<8x512xf32, #tpu.memory_space<vmem>>, vector<1x512xf32>
    %311 = vector.broadcast %310 : vector<1x512xf32> to vector<16x512xf32>
    %312 = arith.addf %308, %311 : vector<16x512xf32>
    %313 = arith.truncf %282 : vector<16x128xf32> to vector<16x128xbf16>
    %c0_88 = arith.constant 0 : index
    %c0_89 = arith.constant 0 : index
    %314 = vector.load %arg3[%c0_88, %c0_89] : memref<128x512xbf16, #tpu.memory_space<vmem>>, vector<128x512xbf16>
    %cst_90 = arith.constant dense<0.000000e+00> : vector<16x512xf32>
    %315 = tpu.matmul %313, %314, %cst_90 {dimension_numbers = #tpu.dot_dimension_numbers<[1], [0], [0], [1], [0, 0, 1, 1], [], []>} : vector<16x128xbf16>, vector<128x512xbf16>, vector<16x512xf32> -> vector<16x512xf32>
    %316 = arith.addf %312, %315 : vector<16x512xf32>
    %317 = vector.extract_strided_slice %316 {offsets = [0, 0], sizes = [16, 384], strides = [1, 1]} : vector<16x512xf32> to vector<16x384xf32>
    %318 = arith.negf %317 : vector<16x384xf32>
    %319 = math.exp %318 : vector<16x384xf32>
    %cst_91 = arith.constant 1.000000e+00 : f32
    %320 = vector.broadcast %cst_91 : f32 to vector<16x384xf32>
    %321 = arith.addf %320, %319 : vector<16x384xf32>
    %322 = arith.divf %320, %321 : vector<16x384xf32>
    %323 = vector.extract_strided_slice %316 {offsets = [0, 384], sizes = [16, 128], strides = [1, 1]} : vector<16x512xf32> to vector<16x128xf32>
    %324 = math.tanh %323 : vector<16x128xf32>
    %325 = vector.extract_strided_slice %322 {offsets = [0, 0], sizes = [16, 128], strides = [1, 1]} : vector<16x384xf32> to vector<16x128xf32>
    %326 = vector.extract_strided_slice %322 {offsets = [0, 128], sizes = [16, 128], strides = [1, 1]} : vector<16x384xf32> to vector<16x128xf32>
    %327 = vector.extract_strided_slice %322 {offsets = [0, 256], sizes = [16, 128], strides = [1, 1]} : vector<16x384xf32> to vector<16x128xf32>
    %328 = arith.mulf %326, %280 : vector<16x128xf32>
    %329 = arith.mulf %325, %324 : vector<16x128xf32>
    %330 = arith.addf %328, %329 : vector<16x128xf32>
    %331 = math.tanh %330 : vector<16x128xf32>
    %332 = arith.mulf %327, %331 : vector<16x128xf32>
    %333 = tpu.concatenate %332, %305 in 1 : vector<16x128xf32>, vector<16x128xf32> -> vector<16x256xf32>
    %334 = arith.truncf %333 : vector<16x256xf32> to vector<16x256xbf16>
    %c0_92 = arith.constant 0 : index
    %c0_93 = arith.constant 0 : index
    %335 = vector.load %arg4[%c0_92, %c0_93] : memref<256x512xbf16, #tpu.memory_space<vmem>>, vector<256x512xbf16>
    %cst_94 = arith.constant dense<0.000000e+00> : vector<16x512xf32>
    %336 = tpu.matmul %334, %335, %cst_94 {dimension_numbers = #tpu.dot_dimension_numbers<[1], [0], [0], [1], [0, 0, 1, 1], [], []>} : vector<16x256xbf16>, vector<256x512xbf16>, vector<16x512xf32> -> vector<16x512xf32>
    %c0_95 = arith.constant 0 : index
    %c0_96 = arith.constant 0 : index
    %337 = vector.load %arg5[%c0_95, %c0_96] : memref<1x512xf32, #tpu.memory_space<vmem>>, vector<1x512xf32>
    %338 = vector.broadcast %337 : vector<1x512xf32> to vector<16x512xf32>
    %339 = arith.addf %336, %338 : vector<16x512xf32>
    %340 = vector.extract_strided_slice %339 {offsets = [0, 0], sizes = [16, 384], strides = [1, 1]} : vector<16x512xf32> to vector<16x384xf32>
    %341 = arith.negf %340 : vector<16x384xf32>
    %342 = math.exp %341 : vector<16x384xf32>
    %cst_97 = arith.constant 1.000000e+00 : f32
    %343 = vector.broadcast %cst_97 : f32 to vector<16x384xf32>
    %344 = arith.addf %343, %342 : vector<16x384xf32>
    %345 = arith.divf %343, %344 : vector<16x384xf32>
    %346 = vector.extract_strided_slice %339 {offsets = [0, 384], sizes = [16, 128], strides = [1, 1]} : vector<16x512xf32> to vector<16x128xf32>
    %347 = math.tanh %346 : vector<16x128xf32>
    %348 = vector.extract_strided_slice %345 {offsets = [0, 0], sizes = [16, 128], strides = [1, 1]} : vector<16x384xf32> to vector<16x128xf32>
    %349 = vector.extract_strided_slice %345 {offsets = [0, 128], sizes = [16, 128], strides = [1, 1]} : vector<16x384xf32> to vector<16x128xf32>
    %350 = vector.extract_strided_slice %345 {offsets = [0, 256], sizes = [16, 128], strides = [1, 1]} : vector<16x384xf32> to vector<16x128xf32>
    %351 = arith.mulf %349, %303 : vector<16x128xf32>
    %352 = arith.mulf %348, %347 : vector<16x128xf32>
    %353 = arith.addf %351, %352 : vector<16x128xf32>
    %354 = math.tanh %353 : vector<16x128xf32>
    %355 = arith.mulf %350, %354 : vector<16x128xf32>
    %c7_i32 = arith.constant 7 : i32
    %356 = arith.index_cast %c7_i32 : i32 to index
    %c0_98 = arith.constant 0 : index
    %c0_99 = arith.constant 0 : index
    %357 = vector.load %arg13[%356, %c0_98, %c0_99] : memref<8x16x512xf32, #tpu.memory_space<vmem>>, vector<1x16x512xf32>
    %358 = vector.shape_cast %357 : vector<1x16x512xf32> to vector<16x512xf32>
    %359 = arith.index_cast %c7_i32 : i32 to index
    %c0_100 = arith.constant 0 : index
    %360 = vector.load %arg1[%359, %c0_100] : memref<8x512xf32, #tpu.memory_space<vmem>>, vector<1x512xf32>
    %361 = vector.broadcast %360 : vector<1x512xf32> to vector<16x512xf32>
    %362 = arith.addf %358, %361 : vector<16x512xf32>
    %363 = arith.truncf %332 : vector<16x128xf32> to vector<16x128xbf16>
    %c0_101 = arith.constant 0 : index
    %c0_102 = arith.constant 0 : index
    %364 = vector.load %arg3[%c0_101, %c0_102] : memref<128x512xbf16, #tpu.memory_space<vmem>>, vector<128x512xbf16>
    %cst_103 = arith.constant dense<0.000000e+00> : vector<16x512xf32>
    %365 = tpu.matmul %363, %364, %cst_103 {dimension_numbers = #tpu.dot_dimension_numbers<[1], [0], [0], [1], [0, 0, 1, 1], [], []>} : vector<16x128xbf16>, vector<128x512xbf16>, vector<16x512xf32> -> vector<16x512xf32>
    %366 = arith.addf %362, %365 : vector<16x512xf32>
    %367 = vector.extract_strided_slice %366 {offsets = [0, 0], sizes = [16, 384], strides = [1, 1]} : vector<16x512xf32> to vector<16x384xf32>
    %368 = arith.negf %367 : vector<16x384xf32>
    %369 = math.exp %368 : vector<16x384xf32>
    %cst_104 = arith.constant 1.000000e+00 : f32
    %370 = vector.broadcast %cst_104 : f32 to vector<16x384xf32>
    %371 = arith.addf %370, %369 : vector<16x384xf32>
    %372 = arith.divf %370, %371 : vector<16x384xf32>
    %373 = vector.extract_strided_slice %366 {offsets = [0, 384], sizes = [16, 128], strides = [1, 1]} : vector<16x512xf32> to vector<16x128xf32>
    %374 = math.tanh %373 : vector<16x128xf32>
    %375 = vector.extract_strided_slice %372 {offsets = [0, 0], sizes = [16, 128], strides = [1, 1]} : vector<16x384xf32> to vector<16x128xf32>
    %376 = vector.extract_strided_slice %372 {offsets = [0, 128], sizes = [16, 128], strides = [1, 1]} : vector<16x384xf32> to vector<16x128xf32>
    %377 = vector.extract_strided_slice %372 {offsets = [0, 256], sizes = [16, 128], strides = [1, 1]} : vector<16x384xf32> to vector<16x128xf32>
    %378 = arith.mulf %376, %330 : vector<16x128xf32>
    %379 = arith.mulf %375, %374 : vector<16x128xf32>
    %380 = arith.addf %378, %379 : vector<16x128xf32>
    %381 = math.tanh %380 : vector<16x128xf32>
    %382 = arith.mulf %377, %381 : vector<16x128xf32>
    %383 = tpu.concatenate %382, %355 in 1 : vector<16x128xf32>, vector<16x128xf32> -> vector<16x256xf32>
    %384 = arith.truncf %383 : vector<16x256xf32> to vector<16x256xbf16>
    %c0_105 = arith.constant 0 : index
    %c0_106 = arith.constant 0 : index
    %385 = vector.load %arg4[%c0_105, %c0_106] : memref<256x512xbf16, #tpu.memory_space<vmem>>, vector<256x512xbf16>
    %cst_107 = arith.constant dense<0.000000e+00> : vector<16x512xf32>
    %386 = tpu.matmul %384, %385, %cst_107 {dimension_numbers = #tpu.dot_dimension_numbers<[1], [0], [0], [1], [0, 0, 1, 1], [], []>} : vector<16x256xbf16>, vector<256x512xbf16>, vector<16x512xf32> -> vector<16x512xf32>
    %c0_108 = arith.constant 0 : index
    %c0_109 = arith.constant 0 : index
    %387 = vector.load %arg5[%c0_108, %c0_109] : memref<1x512xf32, #tpu.memory_space<vmem>>, vector<1x512xf32>
    %388 = vector.broadcast %387 : vector<1x512xf32> to vector<16x512xf32>
    %389 = arith.addf %386, %388 : vector<16x512xf32>
    %390 = vector.extract_strided_slice %389 {offsets = [0, 0], sizes = [16, 384], strides = [1, 1]} : vector<16x512xf32> to vector<16x384xf32>
    %391 = arith.negf %390 : vector<16x384xf32>
    %392 = math.exp %391 : vector<16x384xf32>
    %cst_110 = arith.constant 1.000000e+00 : f32
    %393 = vector.broadcast %cst_110 : f32 to vector<16x384xf32>
    %394 = arith.addf %393, %392 : vector<16x384xf32>
    %395 = arith.divf %393, %394 : vector<16x384xf32>
    %396 = vector.extract_strided_slice %389 {offsets = [0, 384], sizes = [16, 128], strides = [1, 1]} : vector<16x512xf32> to vector<16x128xf32>
    %397 = math.tanh %396 : vector<16x128xf32>
    %398 = vector.extract_strided_slice %395 {offsets = [0, 0], sizes = [16, 128], strides = [1, 1]} : vector<16x384xf32> to vector<16x128xf32>
    %399 = vector.extract_strided_slice %395 {offsets = [0, 128], sizes = [16, 128], strides = [1, 1]} : vector<16x384xf32> to vector<16x128xf32>
    %400 = vector.extract_strided_slice %395 {offsets = [0, 256], sizes = [16, 128], strides = [1, 1]} : vector<16x384xf32> to vector<16x128xf32>
    %401 = arith.mulf %399, %353 : vector<16x128xf32>
    %402 = arith.mulf %398, %397 : vector<16x128xf32>
    %403 = arith.addf %401, %402 : vector<16x128xf32>
    %404 = math.tanh %403 : vector<16x128xf32>
    %405 = arith.mulf %400, %404 : vector<16x128xf32>
    %c8_i32 = arith.constant 8 : i32
    %406 = arith.truncf %405 : vector<16x128xf32> to vector<16x128xbf16>
    %c0_111 = arith.constant 0 : index
    %c0_112 = arith.constant 0 : index
    %407 = vector.load %arg6[%c0_111, %c0_112] : memref<128x128xbf16, #tpu.memory_space<vmem>>, vector<128x128xbf16>
    %cst_113 = arith.constant dense<0.000000e+00> : vector<16x128xf32>
    %408 = tpu.matmul %406, %407, %cst_113 {dimension_numbers = #tpu.dot_dimension_numbers<[1], [0], [0], [1], [0, 0, 1, 1], [], []>} : vector<16x128xbf16>, vector<128x128xbf16>, vector<16x128xf32> -> vector<16x128xf32>
    %c0_114 = arith.constant 0 : index
    %c0_115 = arith.constant 0 : index
    %409 = vector.load %arg7[%c0_114, %c0_115] : memref<1x128xf32, #tpu.memory_space<vmem>>, vector<1x128xf32>
    %410 = vector.broadcast %409 : vector<1x128xf32> to vector<16x128xf32>
    %411 = arith.addf %408, %410 : vector<16x128xf32>
    %cst_116 = arith.constant 0.000000e+00 : f32
    %412 = vector.broadcast %cst_116 : f32 to vector<16x128xf32>
    %413 = arith.maximumf %411, %412 : vector<16x128xf32>
    %414 = arith.truncf %413 : vector<16x128xf32> to vector<16x128xbf16>
    %c0_117 = arith.constant 0 : index
    %c0_118 = arith.constant 0 : index
    %415 = vector.load %arg8[%c0_117, %c0_118] : memref<128x128xbf16, #tpu.memory_space<vmem>>, vector<128x128xbf16>
    %cst_119 = arith.constant dense<0.000000e+00> : vector<16x128xf32>
    %416 = tpu.matmul %414, %415, %cst_119 {dimension_numbers = #tpu.dot_dimension_numbers<[1], [0], [0], [1], [0, 0, 1, 1], [], []>} : vector<16x128xbf16>, vector<128x128xbf16>, vector<16x128xf32> -> vector<16x128xf32>
    %c0_120 = arith.constant 0 : index
    %c0_121 = arith.constant 0 : index
    %417 = vector.load %arg9[%c0_120, %c0_121] : memref<1x128xf32, #tpu.memory_space<vmem>>, vector<1x128xf32>
    %418 = vector.broadcast %417 : vector<1x128xf32> to vector<16x128xf32>
    %419 = arith.addf %416, %418 : vector<16x128xf32>
    %cst_122 = arith.constant 0.000000e+00 : f32
    %420 = vector.broadcast %cst_122 : f32 to vector<16x128xf32>
    %421 = arith.maximumf %419, %420 : vector<16x128xf32>
    %422 = arith.truncf %421 : vector<16x128xf32> to vector<16x128xbf16>
    %c0_123 = arith.constant 0 : index
    %c0_124 = arith.constant 0 : index
    %423 = vector.load %arg10[%c0_123, %c0_124] : memref<128x128xbf16, #tpu.memory_space<vmem>>, vector<128x128xbf16>
    %cst_125 = arith.constant dense<0.000000e+00> : vector<16x128xf32>
    %424 = tpu.matmul %422, %423, %cst_125 {dimension_numbers = #tpu.dot_dimension_numbers<[1], [0], [0], [1], [0, 0, 1, 1], [], []>} : vector<16x128xbf16>, vector<128x128xbf16>, vector<16x128xf32> -> vector<16x128xf32>
    %c0_126 = arith.constant 0 : index
    %c0_127 = arith.constant 0 : index
    %425 = vector.load %arg11[%c0_126, %c0_127] : memref<1x128xf32, #tpu.memory_space<vmem>>, vector<1x128xf32>
    %426 = vector.broadcast %425 : vector<1x128xf32> to vector<16x128xf32>
    %427 = arith.addf %424, %426 : vector<16x128xf32>
    %c0_128 = arith.constant 0 : index
    %c0_129 = arith.constant 0 : index
    %428 = vector.load %arg12[%c0_128, %c0_129] : memref<16x128xf32, #tpu.memory_space<vmem>>, vector<16x128xf32>
    tpu.vector_store %arg12[%c0_128, %c0_129], %427 {strides = array<i32>} : memref<16x128xf32, #tpu.memory_space<vmem>>, vector<16x128xf32>,
    return
  }
}

</mosaic_0001>

<bundles_post_ra>
// kernel: dual_stream_gnn_forward.1
= control target key start
LH: loop header
LB: loop body
LE: loop exit
PB: predicated region body
PF: predicated region fallthrough
CT: control target
= control target key end

     0   :  { %v8370_v1 = vmov 0   ;;  %vm5389_vm0 = vmmov 0   ;;  %s8357_s2 = inlined_call_operand.vmem [shape: bf16[128,512], index: 2, kind: input, shape index: {}]   ;;  %s8358_s0 = inlined_call_operand.vmem [shape: bf16[128,128], index: 0, kind: input, shape index: {}]   ;;  %s8359_s3 = inlined_call_operand.vmem [shape: bf16[128,512], index: 3, kind: input, shape index: {}]   ;;  %s8360_s4 = inlined_call_operand.vmem [shape: bf16[256,512], index: 4, kind: input, shape index: {}]   ;;  %s8361_s1 = inlined_call_operand.vmem [shape: f32[8,512], index: 1, kind: input, shape index: {}]   ;;  %s8362_s5 = inlined_call_operand.vmem [shape: f32[1,512], index: 5, kind: input, shape index: {}]   ;;  %s8363_s6 = inlined_call_operand.vmem [shape: bf16[128,128], index: 6, kind: input, shape index: {}]   ;;  %s8364_s8 = inlined_call_operand.vmem [shape: bf16[128,128], index: 8, kind: input, shape index: {}]   ;;  %s8365_s10 = inlined_call_operand.vmem [shape: bf16[128,128], index: 10, kind: input, shape index: {}]   ;;  %s8366_s7 = inlined_call_operand.vmem [shape: f32[1,128], index: 7, kind: input, shape index: {}]   ;;  %s8367_s9 = inlined_call_operand.vmem [shape: f32[1,128], index: 9, kind: input, shape index: {}]   ;;  %s8368_s11 = inlined_call_operand.vmem [shape: f32[1,128], index: 11, kind: input, shape index: {}]   ;;  %s8369_s12 = inlined_call_operand.vmem [shape: f32[16,128], index: 12, kind: output, shape index: {}]  }
   0x1   :  { %v4434_v0 = vld [vmem:[%s8357_s2 + $0xe4] ss:$16 sps:$4 sm:$0xff]   ;;  %330 = vmatprep.mubr.bf16.mxu0 %v8370_v1  ;;  %443 = vmatprep.mubr.bf16.mxu1 %v8370_v1  ;;  %v4436_v2 = vld [vmem:[%s8357_s2 + $0xec] ss:$16 sps:$4 sm:$0xff]   ;;  %v4438_v3 = vld [vmem:[%s8357_s2 + $0xe0] ss:$16 sps:$4 sm:$0xff]  }
   0x2   :  { %298 = vmatprep.subr.bf16.mxu0 %v4434_v0  ;;  %v4439_v4 = vld [vmem:[%s8357_s2 + $0xe8] ss:$16 sps:$4 sm:$0xff]   ;;  %411 = vmatprep.subr.bf16.mxu1 %v4436_v2  ;;  %v4440_v5 = vld [vmem:[%s8357_s2 + $0xc4] ss:$16 sps:$4 sm:$0xff]   ;;  %v4442_v6 = vld [vmem:[%s8357_s2 + $0xcc] ss:$16 sps:$4 sm:$0xff]  }
   0x3   :  { %299 = vmatpush1.bf16.msra.mxu0 %v4438_v3  ;;  %412 = vmatpush1.bf16.msra.mxu1 %v4439_v4  ;;  %v4444_v7 = vld [vmem:[%s8357_s2 + $0xc0] ss:$16 sps:$4 sm:$0xff]   ;;  %v4445_v8 = vld [vmem:[%s8357_s2 + $0xc8] ss:$16 sps:$4 sm:$0xff]   ;;  %v4446_v9 = vld [vmem:[%s8357_s2 + $0xa4] ss:$16 sps:$4 sm:$0xff]  }
   0x4   :  { %300 = vmatprep.subr.bf16.mxu0 %v4440_v5  ;;  %413 = vmatprep.subr.bf16.mxu1 %v4442_v6  ;;  %v4448_v10 = vld [vmem:[%s8357_s2 + $0xac] ss:$16 sps:$4 sm:$0xff]   ;;  %v4450_v11 = vld [vmem:[%s8357_s2 + $0xa0] ss:$16 sps:$4 sm:$0xff]   ;;  %v4451_v12 = vld [vmem:[%s8357_s2 + $0xa8] ss:$16 sps:$4 sm:$0xff]  }
   0x5   :  { %v4452_v13 = vld [vmem:[%s8357_s2 + $0x84] ss:$16 sps:$4 sm:$0xff]   ;;  %v4454_v14 = vld [vmem:[%s8357_s2 + $0x8c] ss:$16 sps:$4 sm:$0xff]   ;;  %v4456_v15 = vld [vmem:[%s8357_s2 + $0x80] ss:$16 sps:$4 sm:$0xff]  }
   0x6   :  { %v4457_v16 = vld [vmem:[%s8357_s2 + $0x88] ss:$16 sps:$4 sm:$0xff]   ;;  %v4458_v17 = vld [vmem:[%s8357_s2 + $0x64] ss:$16 sps:$4 sm:$0xff]   ;;  %v4460_v18 = vld [vmem:[%s8357_s2 + $0x6c] ss:$16 sps:$4 sm:$0xff]  }
   0x7   :  { %301 = vmatpush1.bf16.msra.mxu0 %v4444_v7  ;;  %414 = vmatpush1.bf16.msra.mxu1 %v4445_v8  ;;  %v4462_v19 = vld [vmem:[%s8357_s2 + $0x60] ss:$16 sps:$4 sm:$0xff]   ;;  %v4463_v20 = vld [vmem:[%s8357_s2 + $0x68] ss:$16 sps:$4 sm:$0xff]   ;;  %v4464_v21 = vld [vmem:[%s8357_s2 + $0x44] ss:$16 sps:$4 sm:$0xff]  }
   0x8   :  { %302 = vmatprep.subr.bf16.mxu0 %v4446_v9  ;;  %415 = vmatprep.subr.bf16.mxu1 %v4448_v10  ;;  %v4466_v22 = vld [vmem:[%s8357_s2 + $0x4c] ss:$16 sps:$4 sm:$0xff]   ;;  %v4468_v23 = vld [vmem:[%s8357_s2 + $0x40] ss:$16 sps:$4 sm:$0xff]   ;;  %v4469_v24 = vld [vmem:[%s8357_s2 + $0x48] ss:$16 sps:$4 sm:$0xff]  }
   0x9   :  { %v4470_v25 = vld [vmem:[%s8357_s2 + $0x24] ss:$16 sps:$4 sm:$0xff]   ;;  %v4472_v26 = vld [vmem:[%s8357_s2 + $0x2c] ss:$16 sps:$4 sm:$0xff]   ;;  %v4474_v27 = vld [vmem:[%s8357_s2 + $0x20] ss:$16 sps:$4 sm:$0xff]  }
   0xa   :  { %v4475_v28 = vld [vmem:[%s8357_s2 + $0x28] ss:$16 sps:$4 sm:$0xff]   ;;  %v4476_v29 = vld [vmem:[%s8357_s2 + $0x4] ss:$16 sps:$4 sm:$0xff]   ;;  %v4478_v30 = vld [vmem:[%s8357_s2 + $0xc] ss:$16 sps:$4 sm:$0xff]  }
   0xb   :  { %303 = vmatpush1.bf16.msra.mxu0 %v4450_v11  ;;  %416 = vmatpush1.bf16.msra.mxu1 %v4451_v12  ;;  %v4480_v31 = vld [vmem:[%s8357_s2] ss:$16 sps:$4 sm:$0xff]   ;;  %v4481_v32 = vld [vmem:[%s8357_s2 + $0x8] ss:$16 sps:$4 sm:$0xff]   ;;  %v5556_v33 = vld [vmem:[%s8359_s3 + $0xe4] ss:$16 sps:$4 sm:$0xff]  }
   0xc   :  { %304 = vmatprep.subr.bf16.mxu0 %v4452_v13  ;;  %417 = vmatprep.subr.bf16.mxu1 %v4454_v14  ;;  %v5561_v34 = vld [vmem:[%s8359_s3 + $0xec] ss:$16 sps:$4 sm:$0xff]   ;;  %v4482_v35 = vld [vmem:[%s8358_s0] sm:$0xff]   ;;  %v4496_v38 = vld [vmem:[%s8359_s3 + $0xe8] ss:$16 sps:$4 sm:$0xff]  }
   0xd   :  { %v4485_v36 = vld [vmem:[%s8359_s3 + $0xe0] ss:$16 sps:$4 sm:$0xff]   ;;  %v4487_v37 = vld [vmem:[%s8359_s3 + $0xc4] ss:$16 sps:$4 sm:$0xff]   ;;  %v4501_v39 = vld [vmem:[%s8359_s3 + $0xcc] ss:$16 sps:$4 sm:$0xff]  }
   0xe   :  { %v4489_v40 = vld [vmem:[%s8359_s3 + $0xc0] ss:$16 sps:$4 sm:$0xff]   ;;  %v4491_v41 = vld [vmem:[%s8359_s3 + $0xa4] ss:$16 sps:$4 sm:$0xff]   ;;  %v4503_v42 = vld [vmem:[%s8359_s3 + $0xc8] ss:$16 sps:$4 sm:$0xff]  }
   0xf   :  { %305 = vmatpush1.bf16.msra.mxu0 %v4456_v15  ;;  %418 = vmatpush1.bf16.msra.mxu1 %v4457_v16  ;;  %v4486_v43 = vld [vmem:[%s8358_s0 + $0x8] sm:$0xff]   ;;  %v4493_v44 = vld [vmem:[%s8359_s3 + $0xa0] ss:$16 sps:$4 sm:$0xff]   ;;  %v4498_v45 = vld [vmem:[%s8359_s3 + $0x84] ss:$16 sps:$4 sm:$0xff]  }
  0x10   :  { %306 = vmatprep.subr.bf16.mxu0 %v4458_v17  ;;  %419 = vmatprep.subr.bf16.mxu1 %v4460_v18  ;;  %v4508_v46 = vld [vmem:[%s8359_s3 + $0xac] ss:$16 sps:$4 sm:$0xff]   ;;  %v4510_v47 = vld [vmem:[%s8359_s3 + $0xa8] ss:$16 sps:$4 sm:$0xff]   ;;  %v4500_v49 = vld [vmem:[%s8359_s3 + $0x80] ss:$16 sps:$4 sm:$0xff]  }
  0x11   :  { %v4515_v48 = vld [vmem:[%s8359_s3 + $0x8c] ss:$16 sps:$4 sm:$0xff]   ;;  %v4505_v50 = vld [vmem:[%s8359_s3 + $0x64] ss:$16 sps:$4 sm:$0xff]   ;;  %v4517_v51 = vld [vmem:[%s8359_s3 + $0x88] ss:$16 sps:$4 sm:$0xff]  }
  0x12   :  { %v4490_v52 = vld [vmem:[%s8358_s0 + $0x10] sm:$0xff]   ;;  %v4521_v54 = vld [vmem:[%s8359_s3 + $0x6c] ss:$16 sps:$4 sm:$0xff]   ;;  %v4524_v56 = vld [vmem:[%s8359_s3 + $0x68] ss:$16 sps:$4 sm:$0xff]  }
  0x13   :  { %307 = vmatpush1.bf16.msra.mxu0 %v4462_v19  ;;  %420 = vmatpush1.bf16.msra.mxu1 %v4463_v20  ;;  %v4507_v53 = vld [vmem:[%s8359_s3 + $0x60] ss:$16 sps:$4 sm:$0xff]   ;;  %v4512_v55 = vld [vmem:[%s8359_s3 + $0x44] ss:$16 sps:$4 sm:$0xff]   ;;  %v4525_v57 = vld [vmem:[%s8359_s3 + $0x4c] ss:$16 sps:$4 sm:$0xff]  }
  0x14   :  { %308 = vmatprep.subr.bf16.mxu0 %v4464_v21  ;;  %421 = vmatprep.subr.bf16.mxu1 %v4466_v22  ;;  %v4514_v58 = vld [vmem:[%s8359_s3 + $0x40] ss:$16 sps:$4 sm:$0xff]   ;;  %v4519_v59 = vld [vmem:[%s8359_s3 + $0x24] ss:$16 sps:$4 sm:$0xff]   ;;  %v4527_v60 = vld [vmem:[%s8359_s3 + $0x48] ss:$16 sps:$4 sm:$0xff]  }
  0x15   :  { %v4497_v61 = vld [vmem:[%s8358_s0 + $0x18] sm:$0xff]   ;;  %v4523_v62 = vld [vmem:[%s8359_s3 + $0x20] ss:$16 sps:$4 sm:$0xff]   ;;  %v5663_v0 = vld [vmem:[%s8359_s3 + $0x4] ss:$16 sps:$4 sm:$0xff]  }
  0x16   :  { %v5658_v63 = vld [vmem:[%s8359_s3 + $0x2c] ss:$16 sps:$4 sm:$0xff]   ;;  %v5668_v2 = vld [vmem:[%s8359_s3 + $0x28] ss:$16 sps:$4 sm:$0xff]   ;;  %v5681_v4 = vld [vmem:[%s8359_s3] ss:$16 sps:$4 sm:$0xff]  }
  0x17   :  { %309 = vmatpush1.bf16.msra.mxu0 %v4468_v23  ;;  %422 = vmatpush1.bf16.msra.mxu1 %v4469_v24  ;;  %v5673_v3 = vld [vmem:[%s8359_s3 + $0xc] ss:$16 sps:$4 sm:$0xff]   ;;  %v5688_v5 = vld [vmem:[%s8359_s3 + $0x8] ss:$16 sps:$4 sm:$0xff]   ;;  %v4504_v6 = vld [vmem:[%s8358_s0 + $0x20] sm:$0xff]  }
  0x18   :  { %310 = vmatprep.subr.bf16.mxu0 %v4470_v25  ;;  %423 = vmatprep.subr.bf16.mxu1 %v4472_v26  ;;  %v4511_v7 = vld [vmem:[%s8358_s0 + $0x28] sm:$0xff]   ;;  %v4518_v8 = vld [vmem:[%s8358_s0 + $0x30] sm:$0xff]   ;;  %v4528_v9 = vld [vmem:[%s8358_s0 + $0x38] sm:$0xff]  }
  0x19   :  { %v5718_v10 = vld [vmem:[%s8360_s4 + $0xe4] ss:$16 sps:$4 sm:$0xff]   ;;  %v5723_v11 = vld [vmem:[%s8360_s4 + $0xec] ss:$16 sps:$4 sm:$0xff]   ;;  %v5729_v12 = vld [vmem:[%s8360_s4 + $0xe0] ss:$16 sps:$4 sm:$0xff]  }
  0x1a   :  { %v5734_v13 = vld [vmem:[%s8360_s4 + $0xe8] ss:$16 sps:$4 sm:$0xff]   ;;  %v5742_v14 = vld [vmem:[%s8360_s4 + $0xc4] ss:$16 sps:$4 sm:$0xff]   ;;  %v5747_v15 = vld [vmem:[%s8360_s4 + $0xcc] ss:$16 sps:$4 sm:$0xff]  }
  0x1b   :  { %311 = vmatpush1.bf16.msra.mxu0 %v4474_v27  ;;  %424 = vmatpush1.bf16.msra.mxu1 %v4475_v28  ;;  %v5752_v16 = vld [vmem:[%s8360_s4 + $0xc0] ss:$16 sps:$4 sm:$0xff]   ;;  %v5757_v17 = vld [vmem:[%s8360_s4 + $0xc8] ss:$16 sps:$4 sm:$0xff]   ;;  %v5766_v18 = vld [vmem:[%s8360_s4 + $0xa4] ss:$16 sps:$4 sm:$0xff]  }
  0x1c   :  { %312 = vmatprep.subr.bf16.mxu0 %v4476_v29  ;;  %425 = vmatprep.subr.bf16.mxu1 %v4478_v30  ;;  %v5771_v19 = vld [vmem:[%s8360_s4 + $0xac] ss:$16 sps:$4 sm:$0xff]   ;;  %v5776_v20 = vld [vmem:[%s8360_s4 + $0xa0] ss:$16 sps:$4 sm:$0xff]   ;;  %v5781_v21 = vld [vmem:[%s8360_s4 + $0xa8] ss:$16 sps:$4 sm:$0xff]  }
  0x1d   :  { %v5790_v22 = vld [vmem:[%s8360_s4 + $0x84] ss:$16 sps:$4 sm:$0xff]   ;;  %v5795_v23 = vld [vmem:[%s8360_s4 + $0x8c] ss:$16 sps:$4 sm:$0xff]   ;;  %v5800_v24 = vld [vmem:[%s8360_s4 + $0x80] ss:$16 sps:$4 sm:$0xff]  }
  0x1e   :  { %v5805_v25 = vld [vmem:[%s8360_s4 + $0x88] ss:$16 sps:$4 sm:$0xff]   ;;  %v5814_v26 = vld [vmem:[%s8360_s4 + $0x64] ss:$16 sps:$4 sm:$0xff]   ;;  %v5819_v27 = vld [vmem:[%s8360_s4 + $0x6c] ss:$16 sps:$4 sm:$0xff]  }
  0x1f   :  { %313 = vmatpush1.bf16.msra.mxu0 %v4480_v31  ;;  %426 = vmatpush1.bf16.msra.mxu1 %v4481_v32  ;;  %v5824_v28 = vld [vmem:[%s8360_s4 + $0x60] ss:$16 sps:$4 sm:$0xff]   ;;  %v5829_v29 = vld [vmem:[%s8360_s4 + $0x68] ss:$16 sps:$4 sm:$0xff]   ;;  %v5838_v30 = vld [vmem:[%s8360_s4 + $0x44] ss:$16 sps:$4 sm:$0xff]  }
  0x20   :  { %818 = vmatprep.subr.bf16.mxu0 %v5556_v33  ;;  %861 = vmatprep.subr.bf16.mxu1 %v5561_v34  ;;  %v5843_v31 = vld [vmem:[%s8360_s4 + $0x4c] ss:$16 sps:$4 sm:$0xff]   ;;  %v5848_v32 = vld [vmem:[%s8360_s4 + $0x40] ss:$16 sps:$4 sm:$0xff]  }
  0x22   :  { %331 = vmatmul.mubr.bf16.vlgmr.msra.gmra.mxu0 %v4482_v35  ;;  %444 = vmatmul.mubr.bf16.vlgmr.msra.gmra.mxu1 %v4482_v35  ;;  %v5853_v35 = vld [vmem:[%s8360_s4 + $0x48] ss:$16 sps:$4 sm:$0xff]  }
  0x23   :  { %819 = vmatpush1.bf16.msra.mxu0 %v4485_v36  ;;  %340 = vmatprep.mubr.bf16.mxu0 %v8370_v1  ;;  %v5862_v36 = vld [vmem:[%s8360_s4 + $0x24] ss:$16 sps:$4 sm:$0xff]  }
  0x24   :  { %453 = vmatprep.mubr.bf16.mxu1 %v8370_v1  ;;  %820 = vmatprep.subr.bf16.mxu0 %v4487_v37  ;;  %v5867_v37 = vld [vmem:[%s8360_s4 + $0x2c] ss:$16 sps:$4 sm:$0xff]  }
  0x25   :  { %862 = vmatpush1.bf16.msra.mxu1 %v4496_v38  ;;  %v5872_v38 = vld [vmem:[%s8360_s4 + $0x20] ss:$16 sps:$4 sm:$0xff]  }
  0x26   :  { %863 = vmatprep.subr.bf16.mxu1 %v4501_v39  ;;  %8672 = vst [vmem:[#allocation3_spill] sm:$0xff] %v5872_v38  ;;  %v5877_v39 = vld [vmem:[%s8360_s4 + $0x28] ss:$16 sps:$4 sm:$0xff]  }
  0x27   :  { %821 = vmatpush1.bf16.msra.mxu0 %v4489_v40  ;;  %8673 = vst [vmem:[#allocation4_spill] sm:$0xff] %v5877_v39  ;;  %v5886_v40 = vld [vmem:[%s8360_s4 + $0x4] ss:$16 sps:$4 sm:$0xff]  }
  0x28   :  { %822 = vmatprep.subr.bf16.mxu0 %v4491_v41  ;;  %8674 = vst [vmem:[#allocation5_spill] sm:$0xff] %v5886_v40  ;;  %v5891_v41 = vld [vmem:[%s8360_s4 + $0xc] ss:$16 sps:$4 sm:$0xff]  }
  0x29   :  { %864 = vmatpush1.bf16.msra.mxu1 %v4503_v42  ;;  %8675 = vst [vmem:[#allocation6_spill] sm:$0xff] %v5891_v41  ;;  %v5896_v42 = vld [vmem:[%s8360_s4] ss:$16 sps:$4 sm:$0xff]  }
  0x2a   :  { %341 = vmatmul.mubr.bf16.gmra.mxu0 %v4486_v43  ;;  %454 = vmatmul.mubr.bf16.gmra.mxu1 %v4486_v43  ;;  %8676 = vst [vmem:[#allocation7_spill] sm:$0xff] %v5896_v42  ;;  %v5901_v43 = vld [vmem:[%s8360_s4 + $0x8] ss:$16 sps:$4 sm:$0xff]  }
  0x2b   :  { %350 = vmatprep.mubr.bf16.mxu0 %v8370_v1  ;;  %463 = vmatprep.mubr.bf16.mxu1 %v8370_v1  ;;  %8677 = vst [vmem:[#allocation8_spill] sm:$0xff] %v5901_v43 }
  0x2c   :  { %823 = vmatpush1.bf16.msra.mxu0 %v4493_v44  ;;  %865 = vmatprep.subr.bf16.mxu1 %v4508_v46  ;;  %v5910_v44 = vld [vmem:[%s8360_s4 + $0x1e4] ss:$16 sps:$4 sm:$0xff]   ;;  %v5920_v46 = vld [vmem:[%s8360_s4 + $0x1e0] ss:$16 sps:$4 sm:$0xff]  }
  0x2d   :  { %824 = vmatprep.subr.bf16.mxu0 %v4498_v45  ;;  %866 = vmatpush1.bf16.msra.mxu1 %v4510_v47  ;;  %8678 = vst [vmem:[#allocation9_spill] sm:$0xff] %v5910_v44  ;;  %v5915_v45 = vld [vmem:[%s8360_s4 + $0x1ec] ss:$16 sps:$4 sm:$0xff]   ;;  %8680 = vst [vmem:[#allocation11_spill] sm:$0xff] %v5920_v46  ;;  %v5925_v47 = vld [vmem:[%s8360_s4 + $0x1e8] ss:$16 sps:$4 sm:$0xff]  }
  0x2e   :  { %867 = vmatprep.subr.bf16.mxu1 %v4515_v48  ;;  %8679 = vst [vmem:[#allocation10_spill] sm:$0xff] %v5915_v45  ;;  %8681 = vst [vmem:[#allocation12_spill] sm:$0xff] %v5925_v47  ;;  %v5934_v48 = vld [vmem:[%s8360_s4 + $0x1c4] ss:$16 sps:$4 sm:$0xff]  }
  0x2f   :  { %8682 = vst [vmem:[#allocation13_spill] sm:$0xff] %v5934_v48 }
  0x30   :  { %825 = vmatpush1.bf16.msra.mxu0 %v4500_v49  ;;  %v5939_v49 = vld [vmem:[%s8360_s4 + $0x1cc] ss:$16 sps:$4 sm:$0xff]  }
  0x31   :  { %826 = vmatprep.subr.bf16.mxu0 %v4505_v50  ;;  %868 = vmatpush1.bf16.msra.mxu1 %v4517_v51  ;;  %8683 = vst [vmem:[#allocation14_spill] sm:$0xff] %v5939_v49  ;;  %v5944_v50 = vld [vmem:[%s8360_s4 + $0x1c0] ss:$16 sps:$4 sm:$0xff]   ;;  %v5949_v51 = vld [vmem:[%s8360_s4 + $0x1c8] ss:$16 sps:$4 sm:$0xff]  }
  0x32   :  { %351 = vmatmul.mubr.bf16.gmra.mxu0 %v4490_v52  ;;  %464 = vmatmul.mubr.bf16.gmra.mxu1 %v4490_v52  ;;  %8684 = vst [vmem:[#allocation15_spill] sm:$0xff] %v5944_v50  ;;  %8685 = vst [vmem:[#allocation16_spill] sm:$0xff] %v5949_v51  ;;  %v5958_v52 = vld [vmem:[%s8360_s4 + $0x1a4] ss:$16 sps:$4 sm:$0xff]  }
  0x33   :  { %360 = vmatprep.mubr.bf16.mxu0 %v8370_v1  ;;  %473 = vmatprep.mubr.bf16.mxu1 %v8370_v1  ;;  %8686 = vst [vmem:[#allocation17_spill] sm:$0xff] %v5958_v52 }
  0x34   :  { %827 = vmatpush1.bf16.msra.mxu0 %v4507_v53  ;;  %869 = vmatprep.subr.bf16.mxu1 %v4521_v54  ;;  %v5963_v53 = vld [vmem:[%s8360_s4 + $0x1ac] ss:$16 sps:$4 sm:$0xff]   ;;  %v5968_v54 = vld [vmem:[%s8360_s4 + $0x1a0] ss:$16 sps:$4 sm:$0xff]  }
  0x35   :  { %828 = vmatprep.subr.bf16.mxu0 %v4512_v55  ;;  %870 = vmatpush1.bf16.msra.mxu1 %v4524_v56  ;;  %8687 = vst [vmem:[#allocation18_spill] sm:$0xff] %v5963_v53  ;;  %8688 = vst [vmem:[#allocation19_spill] sm:$0xff] %v5968_v54  ;;  %v5973_v55 = vld [vmem:[%s8360_s4 + $0x1a8] ss:$16 sps:$4 sm:$0xff]   ;;  %v5982_v56 = vld [vmem:[%s8360_s4 + $0x184] ss:$16 sps:$4 sm:$0xff]  }
  0x36   :  { %871 = vmatprep.subr.bf16.mxu1 %v4525_v57  ;;  %8689 = vst [vmem:[#allocation20_spill] sm:$0xff] %v5973_v55  ;;  %8690 = vst [vmem:[#allocation21_spill] sm:$0xff] %v5982_v56  ;;  %v5987_v57 = vld [vmem:[%s8360_s4 + $0x18c] ss:$16 sps:$4 sm:$0xff]  }
  0x37   :  { %8691 = vst [vmem:[#allocation22_spill] sm:$0xff] %v5987_v57 }
  0x38   :  { %829 = vmatpush1.bf16.msra.mxu0 %v4514_v58  ;;  %v5992_v58 = vld [vmem:[%s8360_s4 + $0x180] ss:$16 sps:$4 sm:$0xff]  }
  0x39   :  { %830 = vmatprep.subr.bf16.mxu0 %v4519_v59  ;;  %872 = vmatpush1.bf16.msra.mxu1 %v4527_v60  ;;  %8692 = vst [vmem:[#allocation23_spill] sm:$0xff] %v5992_v58  ;;  %v5997_v59 = vld [vmem:[%s8360_s4 + $0x188] ss:$16 sps:$4 sm:$0xff]   ;;  %v6004_v60 = vld [vmem:[%s8360_s4 + $0x164] ss:$16 sps:$4 sm:$0xff]  }
  0x3a   :  { %361 = vmatmul.mubr.bf16.gmra.mxu0 %v4497_v61  ;;  %474 = vmatmul.mubr.bf16.gmra.mxu1 %v4497_v61  ;;  %8693 = vst [vmem:[#allocation24_spill] sm:$0xff] %v5997_v59  ;;  %8694 = vst [vmem:[#allocation25_spill] sm:$0xff] %v6004_v60  ;;  %v6009_v61 = vld [vmem:[%s8360_s4 + $0x16c] ss:$16 sps:$4 sm:$0xff]  }
  0x3b   :  { %370 = vmatprep.mubr.bf16.mxu0 %v8370_v1  ;;  %483 = vmatprep.mubr.bf16.mxu1 %v8370_v1  ;;  %8695 = vst [vmem:[#allocation26_spill] sm:$0xff] %v6009_v61 }
  0x3c   :  { %831 = vmatpush1.bf16.msra.mxu0 %v4523_v62  ;;  %873 = vmatprep.subr.bf16.mxu1 %v5658_v63  ;;  %v6016_v62 = vld [vmem:[%s8360_s4 + $0x160] ss:$16 sps:$4 sm:$0xff]  }
  0x3d   :  { %832 = vmatprep.subr.bf16.mxu0 %v5663_v0  ;;  %874 = vmatpush1.bf16.msra.mxu1 %v5668_v2  ;;  %8696 = vst [vmem:[#allocation27_spill] sm:$0xff] %v6016_v62 }
  0x3e   :  { %875 = vmatprep.subr.bf16.mxu1 %v5673_v3 }
  0x40   :  { %833 = vmatpush1.bf16.msra.mxu0 %v5681_v4 }
  0x41   :  { %876 = vmatpush1.bf16.msra.mxu1 %v5688_v5  ;;  %1368 = vmatprep.subr.bf16.mxu0 %v5718_v10 }
  0x42   :  { %371 = vmatmul.mubr.bf16.gmra.mxu0 %v4504_v6  ;;  %484 = vmatmul.mubr.bf16.gmra.mxu1 %v4504_v6  ;;  %v6021_v6 = vld [vmem:[%s8360_s4 + $0x168] ss:$16 sps:$4 sm:$0xff]  }
  0x43   :  { %380 = vmatprep.mubr.bf16.mxu0 %v8370_v1  ;;  %493 = vmatprep.mubr.bf16.mxu1 %v8370_v1  ;;  %8697 = vst [vmem:[#allocation28_spill] sm:$0xff] %v6021_v6 }
  0x44   :  { %1411 = vmatprep.subr.bf16.mxu1 %v5723_v11 }
  0x4a   :  { %381 = vmatmul.mubr.bf16.gmra.mxu0 %v4511_v7  ;;  %494 = vmatmul.mubr.bf16.gmra.mxu1 %v4511_v7  ;;  %v6028_v7 = vld [vmem:[%s8360_s4 + $0x144] ss:$16 sps:$4 sm:$0xff]  }
  0x4b   :  { %390 = vmatprep.mubr.bf16.mxu0 %v8370_v1  ;;  %503 = vmatprep.mubr.bf16.mxu1 %v8370_v1  ;;  %8698 = vst [vmem:[#allocation29_spill] sm:$0xff] %v6028_v7 }
  0x52   :  { %391 = vmatmul.mubr.bf16.gmra.mxu0 %v4518_v8  ;;  %504 = vmatmul.mubr.bf16.gmra.mxu1 %v4518_v8  ;;  %v6033_v8 = vld [vmem:[%s8360_s4 + $0x14c] ss:$16 sps:$4 sm:$0xff]  }
  0x53   :  { %400 = vmatprep.mubr.bf16.mxu0 %v8370_v1  ;;  %513 = vmatprep.mubr.bf16.mxu1 %v8370_v1  ;;  %8699 = vst [vmem:[#allocation30_spill] sm:$0xff] %v6033_v8 }
  0x5a   :  { %401 = vmatmul.mubr.bf16.gmra.mxu0 %v4528_v9  ;;  %514 = vmatmul.mubr.bf16.gmra.mxu1 %v4528_v9  ;;  %v6040_v9 = vld [vmem:[%s8360_s4 + $0x140] ss:$16 sps:$4 sm:$0xff]  }
  0x5b   :  { %850 = vmatprep.mubr.bf16.mxu0 %v8370_v1  ;;  %893 = vmatprep.mubr.bf16.mxu1 %v8370_v1  ;;  %8700 = vst [vmem:[#allocation31_spill] sm:$0xff] %v6040_v9 }
  0x62   :  { %851 = vmatmul.mubr.bf16.vlgmr.msra.gmra.mxu0 %v8370_v1  ;;  %894 = vmatmul.mubr.bf16.vlgmr.msra.gmra.mxu1 %v8370_v1  ;;  %v6045_v1 = vld [vmem:[%s8360_s4 + $0x148] ss:$16 sps:$4 sm:$0xff]  }
  0x63   :  { %1369 = vmatpush1.bf16.msra.mxu0 %v5729_v12  ;;  %1412 = vmatpush1.bf16.msra.mxu1 %v5734_v13  ;;  %8701 = vst [vmem:[#allocation32_spill] sm:$0xff] %v6045_v1 }
  0x64   :  { %1370 = vmatprep.subr.bf16.mxu0 %v5742_v14  ;;  %1413 = vmatprep.subr.bf16.mxu1 %v5747_v15 }
  0x67   :  { %1371 = vmatpush1.bf16.msra.mxu0 %v5752_v16  ;;  %1414 = vmatpush1.bf16.msra.mxu1 %v5757_v17 }
  0x68   :  { %1372 = vmatprep.subr.bf16.mxu0 %v5766_v18  ;;  %1415 = vmatprep.subr.bf16.mxu1 %v5771_v19 }
  0x6b   :  { %1373 = vmatpush1.bf16.msra.mxu0 %v5776_v20  ;;  %1416 = vmatpush1.bf16.msra.mxu1 %v5781_v21 }
  0x6c   :  { %1374 = vmatprep.subr.bf16.mxu0 %v5790_v22  ;;  %1417 = vmatprep.subr.bf16.mxu1 %v5795_v23 }
  0x6f   :  { %1375 = vmatpush1.bf16.msra.mxu0 %v5800_v24  ;;  %1418 = vmatpush1.bf16.msra.mxu1 %v5805_v25 }
  0x70   :  { %1376 = vmatprep.subr.bf16.mxu0 %v5814_v26  ;;  %1419 = vmatprep.subr.bf16.mxu1 %v5819_v27 }
  0x73   :  { %1377 = vmatpush1.bf16.msra.mxu0 %v5824_v28  ;;  %1420 = vmatpush1.bf16.msra.mxu1 %v5829_v29 }
  0x74   :  { %1378 = vmatprep.subr.bf16.mxu0 %v5838_v30  ;;  %1421 = vmatprep.subr.bf16.mxu1 %v5843_v31 }
  0x77   :  { %1379 = vmatpush1.bf16.msra.mxu0 %v5848_v32  ;;  %1422 = vmatpush1.bf16.msra.mxu1 %v5853_v35 }
  0x78   :  { %1380 = vmatprep.subr.bf16.mxu0 %v5862_v36  ;;  %1423 = vmatprep.subr.bf16.mxu1 %v5867_v37 }
  0x7b   :  { %1381 = vmatpush1.bf16.msra.mxu0 %v5872_v38  ;;  %1424 = vmatpush1.bf16.msra.mxu1 %v5877_v39 }
  0x7c   :  { %1382 = vmatprep.subr.bf16.mxu0 %v5886_v40  ;;  %1425 = vmatprep.subr.bf16.mxu1 %v5891_v41 }
  0x7f   :  { %1383 = vmatpush1.bf16.msra.mxu0 %v5896_v42  ;;  %1426 = vmatpush1.bf16.msra.mxu1 %v5901_v43 }
  0x80   :  { %1384 = vmatprep.subr.bf16.mxu0 %v5910_v44  ;;  %1427 = vmatprep.subr.bf16.mxu1 %v5915_v45 }
  0x83   :  { %1385 = vmatpush2.bf16.msra.mxu0 %v5920_v46  ;;  %1428 = vmatpush2.bf16.msra.mxu1 %v5925_v47  ;;  %v4238_v46 = vld [vmem:[%s8361_s1 + $0x2] ss:$8 sm:$0xf] }
  0x84   :  { %1386 = vmatprep.subr.bf16.mxu0 %v5934_v48  ;;  %1429 = vmatprep.subr.bf16.mxu1 %v5939_v49 }
  0x87   :  { %1387 = vmatpush2.bf16.msra.mxu0 %v5944_v50  ;;  %1430 = vmatpush2.bf16.msra.mxu1 %v5949_v51 }
  0x88   :  { %1388 = vmatprep.subr.bf16.mxu0 %v5958_v52  ;;  %1431 = vmatprep.subr.bf16.mxu1 %v5963_v53 }
  0x8b   :  { %1389 = vmatpush2.bf16.msra.mxu0 %v5968_v54  ;;  %1432 = vmatpush2.bf16.msra.mxu1 %v5973_v55 }
  0x8c   :  { %1390 = vmatprep.subr.bf16.mxu0 %v5982_v56  ;;  %1433 = vmatprep.subr.bf16.mxu1 %v5987_v57 }
  0x8f   :  { %1391 = vmatpush2.bf16.msra.mxu0 %v5992_v58  ;;  %1434 = vmatpush2.bf16.msra.mxu1 %v5997_v59 }
  0x90   :  { %1392 = vmatprep.subr.bf16.mxu0 %v6004_v60  ;;  %1435 = vmatprep.subr.bf16.mxu1 %v6009_v61  ;;  %v5387_v61 = vmov 0.0|0.0  }
  0x91   :  { %1400 = vmatprep.mubr.bf16.mxu0 %v5387_v61  ;;  %1443 = vmatprep.mubr.bf16.mxu1 %v5387_v61  ;;  %v6076_v61 = vld [vmem:[%s8360_s4 + $0x104] ss:$16 sps:$4 sm:$0xff]  }
  0x92   :  { %8706 = vst [vmem:[#allocation37_spill] sm:$0xff] %v6076_v61 }
  0x93   :  { %1393 = vmatpush2.bf16.msra.mxu0 %v6016_v62  ;;  %1436 = vmatpush2.bf16.msra.mxu1 %v6021_v6  ;;  %v6052_v62 = vld [vmem:[%s8360_s4 + $0x124] ss:$16 sps:$4 sm:$0xff]   ;;  %v6057_v6 = vld [vmem:[%s8360_s4 + $0x12c] ss:$16 sps:$4 sm:$0xff]  }
  0x94   :  { %1394 = vmatprep.subr.bf16.mxu0 %v6028_v7  ;;  %1437 = vmatprep.subr.bf16.mxu1 %v6033_v8  ;;  %8702 = vst [vmem:[#allocation33_spill] sm:$0xff] %v6052_v62  ;;  %8703 = vst [vmem:[#allocation34_spill] sm:$0xff] %v6057_v6  ;;  %v6064_v8 = vld [vmem:[%s8360_s4 + $0x120] ss:$16 sps:$4 sm:$0xff]   ;;  %v6069_v7 = vld [vmem:[%s8360_s4 + $0x128] ss:$16 sps:$4 sm:$0xff]  }
  0x95   :  { %8704 = vst [vmem:[#allocation35_spill] sm:$0xff] %v6064_v8  ;;  %8705 = vst [vmem:[#allocation36_spill] sm:$0xff] %v6069_v7 }
  0x97   :  { %1395 = vmatpush2.bf16.msra.mxu0 %v6040_v9  ;;  %1438 = vmatpush2.bf16.msra.mxu1 %v6045_v1  ;;  %v6081_v1 = vld [vmem:[%s8360_s4 + $0x10c] ss:$16 sps:$4 sm:$0xff]   ;;  %v598_v9 = vlaneseq }
  0x98   :  { %1396 = vmatprep.subr.bf16.mxu0 %v6052_v62  ;;  %1439 = vmatprep.subr.bf16.mxu1 %v6057_v6  ;;  %8707 = vst [vmem:[#allocation38_spill] sm:$0xff] %v6081_v1  ;;  %v6088_v62 = vld [vmem:[%s8360_s4 + $0x100] ss:$16 sps:$4 sm:$0xff]   ;;  %v6093_v6 = vld [vmem:[%s8360_s4 + $0x108] ss:$16 sps:$4 sm:$0xff]  }
  0x99   :  { %8708 = vst [vmem:[#allocation39_spill] sm:$0xff] %v6088_v62  ;;  %8709 = vst [vmem:[#allocation40_spill] sm:$0xff] %v6093_v6 }
  0x9b   :  { %1397 = vmatpush2.bf16.msra.mxu0 %v6064_v8  ;;  %1440 = vmatpush2.bf16.msra.mxu1 %v6069_v7  ;;  %v599_v7 = vshrl.u32 %v598_v9, 7 }
  0x9c   :  { %1398 = vmatprep.subr.bf16.mxu0 %v6076_v61  ;;  %1441 = vmatprep.subr.bf16.mxu1 %v6081_v1  ;;  %v4225_v1 = vld [vmem:[%s8361_s1 + $0x1] ss:$8 sm:$0xf] }
  0x9d   :  { %v6122_v61 = vsub.s32 3, %v599_v7 }
  0x9f   :  { %1399 = vmatpush2.bf16.msra.mxu0 %v6088_v62  ;;  %1442 = vmatpush2.bf16.msra.mxu1 %v6093_v6  ;;  %v6112_v62 = vsub.s32 0, %v599_v7  ;;  %v6114_v6 = vsub.s32 2, %v599_v7  ;;  %v1529_v52 = vrot.slane %v4225_v1, %v6122_v61 }
  0xa0   :  { %1542 = vmatprep.subr.bf16.mxu0 %v5556_v33  ;;  %1585 = vmatprep.subr.bf16.mxu1 %v5561_v34  ;;  %v6120_v34 = vsub.s32 1, %v599_v7 }
  0xa1   :  { %8710 = vst [vmem:[#allocation41_spill] sm:$0xff] %v6112_v62  ;;  %v1517_v57 = vrot.slane %v4225_v1, %v6112_v62  ;;  %v1525_v56 = vrot.slane %v4225_v1, %v6114_v6 }
  0xa2   :  { %8711 = vst [vmem:[#allocation42_spill] sm:$0xff] %v6120_v34  ;;  %v1521_v53 = vrot.slane %v4225_v1, %v6120_v34 }
  0xe2   :  { %v6101_v8 = vpop.f32.mrf.mxu0  ;;  %v6103_v60 = vpop.f32.mrf.mxu1 }
  0xe4   :  { %v6105_v59 = vpop.f32.mrf.mxu0  ;;  %v6107_v58 = vpop.f32.mrf.mxu1 }
  0xe6   :  { %v6116_v9 = vpop.f32.mrf.mxu0  ;;  %v6118_v33 = vpop.f32.mrf.mxu1 }
  0xe8   :  { %v6126_v55 = vpop.f32.mrf.mxu0  ;;  %v6128_v54 = vpop.f32.mrf.mxu1 }
  0xea   :  { %v342_v51 = vpop.f32.mrf.mxu0  ;;  %v455_v50 = vpop.f32.mrf.mxu1 }
  0xeb   :  { %v6132_v49 = vadd.f32 %v1517_v57, %v342_v51  ;;  %v6134_v48 = vadd.f32 %v1525_v56, %v455_v50  ;;  %v1835_v51 = vrot.slane %v4238_v46, %v6112_v62  ;;  %v1843_v50 = vrot.slane %v4238_v46, %v6114_v6 }
  0xec   :  { %v344_v7 = vpop.f32.mrf.mxu0  ;;  %v457_v47 = vpop.f32.mrf.mxu1 }
  0xed   :  { %8712 = vst [vmem:[#allocation43_spill] sm:$0xff] %v6132_v49  ;;  %8713 = vst [vmem:[#allocation44_spill] sm:$0xff] %v6134_v48  ;;  %v6139_v45 = vadd.f32 %v1521_v53, %v344_v7  ;;  %v6141_v44 = vadd.f32 %v1529_v52, %v457_v47  ;;  %v1839_v7 = vrot.slane %v4238_v46, %v6120_v34 }
  0xee   :  { %v346_v43 = vpop.f32.mrf.mxu0  ;;  %v459_v42 = vpop.f32.mrf.mxu1  ;;  %v1847_v47 = vrot.slane %v4238_v46, %v6122_v61 }
  0xef   :  { %8714 = vst [vmem:[#allocation45_spill] sm:$0xff] %v6139_v45  ;;  %8715 = vst [vmem:[#allocation46_spill] sm:$0xff] %v6141_v44  ;;  %v6143_v41 = vadd.f32 %v1517_v57, %v346_v43  ;;  %v6145_v1 = vadd.f32 %v1525_v56, %v459_v42 }
  0xf0   :  { %v348_v48 = vpop.f32.mrf.mxu0  ;;  %v461_v49 = vpop.f32.mrf.mxu1 }
  0xf1   :  { %8716 = vst [vmem:[#allocation47_spill] sm:$0xff] %v6143_v41  ;;  %8717 = vst [vmem:[#allocation48_spill] sm:$0xff] %v6145_v1  ;;  %v6149_v40 = vadd.f32 %v1521_v53, %v348_v48  ;;  %v6151_v39 = vadd.f32 %v1529_v52, %v461_v49  ;;  %v4251_v1 = vld [vmem:[%s8361_s1 + $0x3] ss:$8 sm:$0xf] }
  0xf2   :  { %v352_v44 = vpop.f32.mrf.mxu0  ;;  %v465_v45 = vpop.f32.mrf.mxu1 }
  0xf3   :  { %8718 = vst [vmem:[#allocation49_spill] sm:$0xff] %v6149_v40  ;;  %8719 = vst [vmem:[#allocation50_spill] sm:$0xff] %v6151_v39  ;;  %v6155_v43 = vadd.f32 %v1835_v51, %v352_v44  ;;  %v6157_v42 = vadd.f32 %v1843_v50, %v465_v45  ;;  %v2153_v44 = vrot.slane %v4251_v1, %v6112_v62 }
  0xf4   :  { %v354_v56 = vpop.f32.mrf.mxu0  ;;  %v467_v57 = vpop.f32.mrf.mxu1  ;;  %v2161_v45 = vrot.slane %v4251_v1, %v6114_v6 }
  0xf5   :  { %8720 = vst [vmem:[#allocation51_spill] sm:$0xff] %v6155_v43  ;;  %8721 = vst [vmem:[#allocation52_spill] sm:$0xff] %v6157_v42  ;;  %v6162_v48 = vadd.f32 %v1839_v7, %v354_v56  ;;  %v6164_v49 = vadd.f32 %v1847_v47, %v467_v57  ;;  %v2157_v56 = vrot.slane %v4251_v1, %v6120_v34 }
  0xf6   :  { %v356_v52 = vpop.f32.mrf.mxu0  ;;  %v469_v53 = vpop.f32.mrf.mxu1  ;;  %v2165_v57 = vrot.slane %v4251_v1, %v6122_v61 }
  0xf7   :  { %8722 = vst [vmem:[#allocation53_spill] sm:$0xff] %v6162_v48  ;;  %8723 = vst [vmem:[#allocation54_spill] sm:$0xff] %v6164_v49  ;;  %v6166_v39 = vadd.f32 %v1835_v51, %v356_v52  ;;  %v6168_v46 = vadd.f32 %v1843_v50, %v469_v53 }
  0xf8   :  { %v358_v42 = vpop.f32.mrf.mxu0  ;;  %v471_v43 = vpop.f32.mrf.mxu1 }
  0xf9   :  { %8724 = vst [vmem:[#allocation55_spill] sm:$0xff] %v6166_v39  ;;  %8725 = vst [vmem:[#allocation56_spill] sm:$0xff] %v6168_v46  ;;  %v6172_v40 = vadd.f32 %v1839_v7, %v358_v42  ;;  %v6174_v41 = vadd.f32 %v1847_v47, %v471_v43  ;;  %v4264_v46 = vld [vmem:[%s8361_s1 + $0x4] ss:$8 sm:$0xf] }
  0xfa   :  { %v362_v49 = vpop.f32.mrf.mxu0  ;;  %v475_v48 = vpop.f32.mrf.mxu1 }
  0xfb   :  { %8726 = vst [vmem:[#allocation57_spill] sm:$0xff] %v6172_v40  ;;  %8727 = vst [vmem:[#allocation58_spill] sm:$0xff] %v6174_v41  ;;  %v6178_v51 = vadd.f32 %v2153_v44, %v362_v49  ;;  %v6180_v50 = vadd.f32 %v2161_v45, %v475_v48  ;;  %v2471_v49 = vrot.slane %v4264_v46, %v6112_v62 }
  0xfc   :  { %v364_v52 = vpop.f32.mrf.mxu0  ;;  %v477_v53 = vpop.f32.mrf.mxu1  ;;  %v2479_v48 = vrot.slane %v4264_v46, %v6114_v6 }
  0xfd   :  { %8728 = vst [vmem:[#allocation59_spill] sm:$0xff] %v6178_v51  ;;  %8729 = vst [vmem:[#allocation60_spill] sm:$0xff] %v6180_v50  ;;  %v6185_v7 = vadd.f32 %v2157_v56, %v364_v52  ;;  %v6187_v47 = vadd.f32 %v2165_v57, %v477_v53  ;;  %v2475_v52 = vrot.slane %v4264_v46, %v6120_v34 }
  0xfe   :  { %v366_v43 = vpop.f32.mrf.mxu0  ;;  %v479_v42 = vpop.f32.mrf.mxu1  ;;  %v2483_v53 = vrot.slane %v4264_v46, %v6122_v61 }
  0xff   :  { %8730 = vst [vmem:[#allocation61_spill] sm:$0xff] %v6185_v7  ;;  %8731 = vst [vmem:[#allocation62_spill] sm:$0xff] %v6187_v47  ;;  %v6189_v41 = vadd.f32 %v2153_v44, %v366_v43  ;;  %v6191_v1 = vadd.f32 %v2161_v45, %v479_v42 }
 0x100   :  { %v368_v50 = vpop.f32.mrf.mxu0  ;;  %v481_v51 = vpop.f32.mrf.mxu1 }
 0x101   :  { %8732 = vst [vmem:[#allocation63_spill] sm:$0xff] %v6189_v41  ;;  %8733 = vst [vmem:[#allocation64_spill] sm:$0xff] %v6191_v1  ;;  %v6195_v40 = vadd.f32 %v2157_v56, %v368_v50  ;;  %v6197_v39 = vadd.f32 %v2165_v57, %v481_v51  ;;  %v4277_v1 = vld [vmem:[%s8361_s1 + $0x5] ss:$8 sm:$0xf] }
 0x102   :  { %v372_v47 = vpop.f32.mrf.mxu0  ;;  %v485_v7 = vpop.f32.mrf.mxu1 }
 0x103   :  { %8734 = vst [vmem:[#allocation65_spill] sm:$0xff] %v6195_v40  ;;  %8735 = vst [vmem:[#allocation66_spill] sm:$0xff] %v6197_v39  ;;  %v6201_v44 = vadd.f32 %v2471_v49, %v372_v47  ;;  %v6203_v45 = vadd.f32 %v2479_v48, %v485_v7  ;;  %v2789_v47 = vrot.slane %v4277_v1, %v6112_v62 }
 0x104   :  { %v374_v43 = vpop.f32.mrf.mxu0  ;;  %v487_v42 = vpop.f32.mrf.mxu1  ;;  %v2797_v7 = vrot.slane %v4277_v1, %v6114_v6 }
 0x105   :  { %8736 = vst [vmem:[#allocation67_spill] sm:$0xff] %v6201_v44  ;;  %8737 = vst [vmem:[#allocation68_spill] sm:$0xff] %v6203_v45  ;;  %v6208_v56 = vadd.f32 %v2475_v52, %v374_v43  ;;  %v6210_v57 = vadd.f32 %v2483_v53, %v487_v42  ;;  %v2793_v43 = vrot.slane %v4277_v1, %v6120_v34 }
 0x106   :  { %v376_v51 = vpop.f32.mrf.mxu0  ;;  %v489_v50 = vpop.f32.mrf.mxu1  ;;  %v2801_v42 = vrot.slane %v4277_v1, %v6122_v61 }
 0x107   :  { %8738 = vst [vmem:[#allocation69_spill] sm:$0xff] %v6208_v56  ;;  %8739 = vst [vmem:[#allocation70_spill] sm:$0xff] %v6210_v57  ;;  %v6212_v39 = vadd.f32 %v2471_v49, %v376_v51  ;;  %v6214_v46 = vadd.f32 %v2479_v48, %v489_v50 }
 0x108   :  { %v378_v45 = vpop.f32.mrf.mxu0  ;;  %v491_v44 = vpop.f32.mrf.mxu1 }
 0x109   :  { %8740 = vst [vmem:[#allocation71_spill] sm:$0xff] %v6212_v39  ;;  %8741 = vst [vmem:[#allocation72_spill] sm:$0xff] %v6214_v46  ;;  %v6218_v40 = vadd.f32 %v2475_v52, %v378_v45  ;;  %v6220_v41 = vadd.f32 %v2483_v53, %v491_v44  ;;  %v4290_v46 = vld [vmem:[%s8361_s1 + $0x6] ss:$8 sm:$0xf] }
 0x10a   :  { %v382_v57 = vpop.f32.mrf.mxu0  ;;  %v495_v56 = vpop.f32.mrf.mxu1 }
 0x10b   :  { %8742 = vst [vmem:[#allocation73_spill] sm:$0xff] %v6218_v40  ;;  %8743 = vst [vmem:[#allocation74_spill] sm:$0xff] %v6220_v41  ;;  %v6224_v49 = vadd.f32 %v2789_v47, %v382_v57  ;;  %v6226_v48 = vadd.f32 %v2797_v7, %v495_v56  ;;  %v3107_v57 = vrot.slane %v4290_v46, %v6112_v62 }
 0x10c   :  { %v384_v51 = vpop.f32.mrf.mxu0  ;;  %v497_v50 = vpop.f32.mrf.mxu1  ;;  %v3115_v56 = vrot.slane %v4290_v46, %v6114_v6 }
 0x10d   :  { %8744 = vst [vmem:[#allocation75_spill] sm:$0xff] %v6224_v49  ;;  %8745 = vst [vmem:[#allocation76_spill] sm:$0xff] %v6226_v48  ;;  %v6231_v52 = vadd.f32 %v2793_v43, %v384_v51  ;;  %v6233_v53 = vadd.f32 %v2801_v42, %v497_v50  ;;  %v3111_v51 = vrot.slane %v4290_v46, %v6120_v34 }
 0x10e   :  { %v386_v44 = vpop.f32.mrf.mxu0  ;;  %v499_v45 = vpop.f32.mrf.mxu1  ;;  %v3119_v50 = vrot.slane %v4290_v46, %v6122_v61 }
 0x10f   :  { %8746 = vst [vmem:[#allocation77_spill] sm:$0xff] %v6231_v52  ;;  %8747 = vst [vmem:[#allocation78_spill] sm:$0xff] %v6233_v53  ;;  %v6235_v41 = vadd.f32 %v2789_v47, %v386_v44  ;;  %v6237_v1 = vadd.f32 %v2797_v7, %v499_v45 }
 0x110   :  { %v388_v48 = vpop.f32.mrf.mxu0  ;;  %v501_v49 = vpop.f32.mrf.mxu1 }
 0x111   :  { %8748 = vst [vmem:[#allocation79_spill] sm:$0xff] %v6235_v41  ;;  %8749 = vst [vmem:[#allocation80_spill] sm:$0xff] %v6237_v1  ;;  %v6241_v40 = vadd.f32 %v2793_v43, %v388_v48  ;;  %v6243_v39 = vadd.f32 %v2801_v42, %v501_v49  ;;  %v4303_v1 = vld [vmem:[%s8361_s1 + $0x7] ss:$8 sm:$0xf] }
 0x112   :  { %v392_v53 = vpop.f32.mrf.mxu0  ;;  %v505_v52 = vpop.f32.mrf.mxu1 }
 0x113   :  { %8750 = vst [vmem:[#allocation81_spill] sm:$0xff] %v6241_v40  ;;  %8751 = vst [vmem:[#allocation82_spill] sm:$0xff] %v6243_v39  ;;  %v6247_v47 = vadd.f32 %v3107_v57, %v392_v53  ;;  %v6249_v7 = vadd.f32 %v3115_v56, %v505_v52  ;;  %v3425_v53 = vrot.slane %v4303_v1, %v6112_v62 }
 0x114   :  { %v394_v44 = vpop.f32.mrf.mxu0  ;;  %v507_v45 = vpop.f32.mrf.mxu1  ;;  %v3433_v52 = vrot.slane %v4303_v1, %v6114_v6 }
 0x115   :  { %8752 = vst [vmem:[#allocation83_spill] sm:$0xff] %v6247_v47  ;;  %8753 = vst [vmem:[#allocation84_spill] sm:$0xff] %v6249_v7  ;;  %v6254_v43 = vadd.f32 %v3111_v51, %v394_v44  ;;  %v6256_v42 = vadd.f32 %v3119_v50, %v507_v45  ;;  %v3429_v44 = vrot.slane %v4303_v1, %v6120_v34 }
 0x116   :  { %v396_v49 = vpop.f32.mrf.mxu0  ;;  %v509_v48 = vpop.f32.mrf.mxu1  ;;  %v3437_v45 = vrot.slane %v4303_v1, %v6122_v61 }
 0x117   :  { %8754 = vst [vmem:[#allocation85_spill] sm:$0xff] %v6254_v43  ;;  %8755 = vst [vmem:[#allocation86_spill] sm:$0xff] %v6256_v42  ;;  %v6258_v39 = vadd.f32 %v3107_v57, %v396_v49  ;;  %v6260_v46 = vadd.f32 %v3115_v56, %v509_v48  ;;  %v596_v57 = vld [vmem:[%s8361_s1] ss:$8 sm:$0xf] }
 0x118   :  { %v398_v7 = vpop.f32.mrf.mxu0  ;;  %v511_v47 = vpop.f32.mrf.mxu1 }
 0x119   :  { %8756 = vst [vmem:[#allocation87_spill] sm:$0xff] %v6258_v39  ;;  %8757 = vst [vmem:[#allocation88_spill] sm:$0xff] %v6260_v46  ;;  %v6264_v40 = vadd.f32 %v3111_v51, %v398_v7  ;;  %v6266_v41 = vadd.f32 %v3119_v50, %v511_v47  ;;  %v601_v51 = vrot.slane %v596_v57, %v6112_v62 }
 0x11a   :  { %v402_v56 = vpop.f32.mrf.mxu0  ;;  %v515_v49 = vpop.f32.mrf.mxu1 }
 0x11b   :  { %8758 = vst [vmem:[#allocation89_spill] sm:$0xff] %v6264_v40  ;;  %8759 = vst [vmem:[#allocation90_spill] sm:$0xff] %v6266_v41  ;;  %v6273_v48 = vadd.f32 %v3425_v53, %v402_v56  ;;  %v6275_v46 = vadd.f32 %v3433_v52, %v515_v49  ;;  %v605_v41 = vrot.slane %v596_v57, %v6120_v34 }
 0x11c   :  { %v404_v42 = vpop.f32.mrf.mxu0  ;;  %v517_v39 = vpop.f32.mrf.mxu1  ;;  %v618_v49 = vadd.f32 %v601_v51, %v6101_v8  ;;  %v622_v62 = vadd.f32 %v601_v51, %v6116_v9  ;;  %v613_v9 = vrot.slane %v596_v57, %v6122_v61 }
 0x11d   :  { %8760 = vst [vmem:[#allocation91_spill] sm:$0xff] %v6273_v48  ;;  %8761 = vst [vmem:[#allocation92_spill] sm:$0xff] %v6275_v46  ;;  %v6278_v50 = vadd.f32 %v3429_v44, %v404_v42  ;;  %v6280_v47 = vadd.f32 %v3437_v45, %v517_v39  ;;  %v619_v39 = vadd.f32 %v605_v41, %v6105_v59 }
 0x11e   :  { %v406_v7 = vpop.f32.mrf.mxu0  ;;  %v519_v1 = vpop.f32.mrf.mxu1 }
 0x11f   :  { %8762 = vst [vmem:[#allocation93_spill] sm:$0xff] %v6278_v50  ;;  %8763 = vst [vmem:[#allocation94_spill] sm:$0xff] %v6280_v47  ;;  %v6283_v40 = vadd.f32 %v3425_v53, %v406_v7  ;;  %v6285_v43 = vadd.f32 %v3433_v52, %v519_v1  ;;  %v623_v52 = vadd.f32 %v605_v41, %v6126_v55 }
 0x120   :  { %v408_v56 = vpop.f32.mrf.mxu0  ;;  %v521_v48 = vpop.f32.mrf.mxu1  ;;  %v621_v41 = vadd.f32 %v613_v9, %v6107_v58 }
 0x121   :  { %8764 = vst [vmem:[#allocation95_spill] sm:$0xff] %v6283_v40  ;;  %8765 = vst [vmem:[#allocation96_spill] sm:$0xff] %v6285_v43  ;;  %v6288_v46 = vadd.f32 %v3429_v44, %v408_v56  ;;  %v6290_v38 = vadd.f32 %v3437_v45, %v521_v48  ;;  %v609_v56 = vrot.slane %v596_v57, %v6114_v6  ;;  %v6777_v40 = vld [vmem:[%s8360_s4 + $0x40] ss:$16 sps:$4 sm:$0xff]  }
 0x122   :  { %v852_v42 = vpop.f32.mrf.mxu0  ;;  %v895_v1 = vpop.f32.mrf.mxu1 }
 0x123   :  { %8766 = vst [vmem:[#allocation97_spill] sm:$0xff] %v6288_v46  ;;  %8767 = vst [vmem:[#allocation98_spill] sm:$0xff] %v6290_v38  ;;  %v904_v47 = vadd.f32 %v852_v42, %v618_v49  ;;  %v620_v51 = vadd.f32 %v609_v56, %v6103_v60  ;;  %v624_v55 = vadd.f32 %v609_v56, %v6118_v33  ;;  %v6451_v38 = vld [vmem:[%s8359_s3 + $0x20] ss:$16 sps:$4 sm:$0xff]   ;;  %v6771_v46 = vld [vmem:[%s8360_s4 + $0x4c] ss:$16 sps:$4 sm:$0xff]  }
 0x124   :  { %v854_v50 = vpop.f32.mrf.mxu0  ;;  %v897_v59 = vpop.f32.mrf.mxu1 }
 0x125   :  { %v4149_v34 = vmul.f32 -1.442695, %v904_v47  ;;  %v905_v53 = vadd.f32 %v854_v50, %v619_v39 }
 0x126   :  { %v856_v7 = vpop.f32.mrf.mxu0  ;;  %v899_v50 = vpop.f32.mrf.mxu1 }
 0x127   :  { %4658 = vpow2.f32 %v4149_v34  ;;  %v4150_v43 = vmul.f32 -1.442695, %v905_v53  ;;  %v908_v8 = vadd.f32 %v856_v7, %v622_v62  ;;  %v906_v62 = vadd.f32 %v895_v1, %v620_v51 }
 0x128   :  { %v858_v44 = vpop.f32.mrf.mxu0  ;;  %v907_v34 = vadd.f32 %v897_v59, %v621_v41  ;;  %v901_v53 = vpop.f32.mrf.mxu1 }
 0x129   :  { %4660 = vpow2.f32 %v4150_v43  ;;  %v4152_v45 = vmul.f32 -1.442695, %v908_v8  ;;  %v909_v48 = vadd.f32 %v858_v44, %v623_v52  ;;  %v910_v43 = vadd.f32 %v899_v50, %v624_v55 }
 0x12a   :  { %v4151_v42 = vmul.f32 -1.442695, %v906_v62  ;;  %v625_v52 = vadd.f32 %v613_v9, %v6128_v54 }
 0x12b   :  { %4662 = vpow2.f32 %v4152_v45  ;;  %v4153_v49 = vmul.f32 -1.442695, %v909_v48  ;;  %v4154_v57 = vmul.f32 -1.442695, %v910_v43 }
 0x12c   :  { %v911_v44 = vadd.f32 %v901_v53, %v625_v52 }
 0x12d   :  { %4664 = vpow2.f32 %v4153_v49 }
 0x12e   :  { %4666 = vtanh.f32 %v907_v34 }
 0x134   :  { %v4659_v47 = vpop.eup %4658 }
 0x135   :  { %v930_v39 = vadd.f32 1.0, %v4659_v47 }
 0x136   :  { %v4661_v7 = vpop.eup %4660 }
 0x137   :  { %4668 = vrcp.f32 %v930_v39  ;;  %v931_v8 = vadd.f32 1.0, %v4661_v7 }
 0x138   :  { %v4663_v60 = vpop.eup %4662  ;;  %4670 = vpow2.f32 %v4151_v42 }
 0x139   :  { %4672 = vrcp.f32 %v931_v8  ;;  %v933_v58 = vadd.f32 1.0, %v4663_v60 }
 0x13a   :  { %v4665_v33 = vpop.eup %4664  ;;  %4674 = vpow2.f32 %v4154_v57 }
 0x13b   :  { %4676 = vrcp.f32 %v933_v58  ;;  %v934_v1 = vadd.f32 1.0, %v4665_v33  ;;  %v4667_v45 = vpop.eup %4666  ;;  %v6316_v58 = vld [vmem:[%s8359_s3 + $0xe8] ss:$16 sps:$4 sm:$0xff]   ;;  %v6322_v33 = vld [vmem:[%s8359_s3 + $0xc4] ss:$16 sps:$4 sm:$0xff]  }
 0x13c   :  { %4678 = vtanh.f32 %v911_v44  ;;  %v6310_v44 = vld [vmem:[%s8359_s3 + $0xe0] ss:$16 sps:$4 sm:$0xff]  }
 0x13d   :  { %4680 = vrcp.f32 %v934_v1  ;;  %v6328_v1 = vld [vmem:[%s8359_s3 + $0xcc] ss:$16 sps:$4 sm:$0xff]  }
 0x144   :  { %v4669_v48 = vpop.eup %4668 }
 0x145   :  { %v4671_v56 = vpop.eup %4670  ;;  %v952_v59 = vmul.f32 %v4669_v48, %v4667_v45  ;;  %v8768_v45 = vmov 0   ;;  %v6336_v48 = vld [vmem:[%s8359_s3 + $0xc0] ss:$16 sps:$4 sm:$0xff]  }
 0x146   :  { %v4673_v54 = vpop.eup %4672  ;;  %v932_v50 = vadd.f32 1.0, %v4671_v56  ;;  %v6342_v56 = vld [vmem:[%s8359_s3 + $0xc8] ss:$16 sps:$4 sm:$0xff]  }
 0x147   :  { %v4675_v49 = vpop.eup %4674  ;;  %v950_v9 = vmul.f32 0.0, %v4673_v54  ;;  %v6354_v54 = vld [vmem:[%s8359_s3 + $0xac] ss:$16 sps:$4 sm:$0xff]  }
 0x148   :  { %v4677_v51 = vpop.eup %4676  ;;  %v935_v34 = vadd.f32 1.0, %v4675_v49  ;;  %4682 = vrcp.f32 %v932_v50  ;;  %v6360_v49 = vld [vmem:[%s8359_s3 + $0xa0] ss:$16 sps:$4 sm:$0xff]   ;;  %v6378_v50 = vld [vmem:[%s8359_s3 + $0x8c] ss:$16 sps:$4 sm:$0xff]  }
 0x149   :  { %v4679_v41 = vpop.eup %4678  ;;  %v6301_v55 = vadd.f32 %v952_v59, %v950_v9  ;;  %v6348_v59 = vld [vmem:[%s8359_s3 + $0xa4] ss:$16 sps:$4 sm:$0xff]   ;;  %v6366_v9 = vld [vmem:[%s8359_s3 + $0xa8] ss:$16 sps:$4 sm:$0xff]  }
 0x14a   :  { %v4681_v62 = vpop.eup %4680  ;;  %v953_v47 = vmul.f32 %v4679_v41, %v4677_v51  ;;  %v6372_v51 = vld [vmem:[%s8359_s3 + $0x84] ss:$16 sps:$4 sm:$0xff]   ;;  %v6384_v41 = vld [vmem:[%s8359_s3 + $0x80] ss:$16 sps:$4 sm:$0xff]  }
 0x14b   :  { %v951_v43 = vmul.f32 0.0, %v4681_v62  ;;  %4684 = vtanh.f32 %v6301_v55  ;;  %v6390_v62 = vld [vmem:[%s8359_s3 + $0x88] ss:$16 sps:$4 sm:$0xff]  }
 0x14c   :  { %4686 = vrcp.f32 %v935_v34  ;;  %v6396_v34 = vld [vmem:[%s8359_s3 + $0x64] ss:$16 sps:$4 sm:$0xff]  }
 0x14d   :  { %v6304_v42 = vadd.f32 %v953_v47, %v951_v43  ;;  %v6402_v43 = vld [vmem:[%s8359_s3 + $0x6c] ss:$16 sps:$4 sm:$0xff]   ;;  %v6408_v47 = vld [vmem:[%s8359_s3 + $0x60] ss:$16 sps:$4 sm:$0xff]  }
 0x14f   :  { %4688 = vtanh.f32 %v6304_v42 }
 0x155   :  { %v4683_v39 = vpop.eup %4682 }
 0x158   :  { %v4685_v53 = vpop.eup %4684 }
 0x159   :  { %v4687_v7 = vpop.eup %4686  ;;  %v958_v57 = vmul.f32 %v4685_v53, %v4683_v39  ;;  %v6414_v39 = vld [vmem:[%s8359_s3 + $0x68] ss:$16 sps:$4 sm:$0xff]   ;;  %v6420_v53 = vld [vmem:[%s8359_s3 + $0x44] ss:$16 sps:$4 sm:$0xff]  }
 0x15c   :  { %v4689_v52 = vpop.eup %4688 }
 0x15d   :  { %v959_v8 = vmul.f32 %v4689_v52, %v4687_v7  ;;  %v6426_v7 = vld [vmem:[%s8359_s3 + $0x4c] ss:$16 sps:$4 sm:$0xff]   ;;  %v6432_v52 = vld [vmem:[%s8359_s3 + $0x40] ss:$16 sps:$4 sm:$0xff]  }
 0x15f   :  { %v960_v60 = vpack.c.bf16 %v959_v8, %v958_v57  ;;  %v6438_v57 = vld [vmem:[%s8359_s3 + $0x48] ss:$16 sps:$4 sm:$0xff]   ;;  %v6444_v8 = vld [vmem:[%s8359_s3 + $0x24] ss:$16 sps:$4 sm:$0xff]  }
 0x161   :  { %1401 = vmatmul.mubr.bf16.vlgmr.msra.gmra.mxu0 %v960_v60  ;;  %1444 = vmatmul.mubr.bf16.vlgmr.msra.gmra.mxu1 %v960_v60 }
 0x162   :  { %1543 = vmatpush1.bf16.msra.mxu0 %v6310_v44  ;;  %1586 = vmatpush1.bf16.msra.mxu1 %v6316_v58 }
 0x163   :  { %1544 = vmatprep.subr.bf16.mxu0 %v6322_v33  ;;  %1587 = vmatprep.subr.bf16.mxu1 %v6328_v1 }
 0x164   :  { %1574 = vmatprep.mubr.bf16.mxu0 %v8768_v45  ;;  %1617 = vmatprep.mubr.bf16.mxu1 %v8768_v45 }
 0x166   :  { %1545 = vmatpush1.bf16.msra.mxu0 %v6336_v48  ;;  %1588 = vmatpush1.bf16.msra.mxu1 %v6342_v56 }
 0x167   :  { %1546 = vmatprep.subr.bf16.mxu0 %v6348_v59  ;;  %1589 = vmatprep.subr.bf16.mxu1 %v6354_v54 }
 0x16a   :  { %1547 = vmatpush1.bf16.msra.mxu0 %v6360_v49  ;;  %1590 = vmatpush1.bf16.msra.mxu1 %v6366_v9 }
 0x16b   :  { %1548 = vmatprep.subr.bf16.mxu0 %v6372_v51  ;;  %1591 = vmatprep.subr.bf16.mxu1 %v6378_v50 }
 0x16e   :  { %1549 = vmatpush1.bf16.msra.mxu0 %v6384_v41  ;;  %1592 = vmatpush1.bf16.msra.mxu1 %v6390_v62 }
 0x16f   :  { %1550 = vmatprep.subr.bf16.mxu0 %v6396_v34  ;;  %1593 = vmatprep.subr.bf16.mxu1 %v6402_v43 }
 0x172   :  { %1551 = vmatpush1.bf16.msra.mxu0 %v6408_v47  ;;  %1594 = vmatpush1.bf16.msra.mxu1 %v6414_v39 }
 0x173   :  { %1552 = vmatprep.subr.bf16.mxu0 %v6420_v53  ;;  %1595 = vmatprep.subr.bf16.mxu1 %v6426_v7 }
 0x176   :  { %1553 = vmatpush1.bf16.msra.mxu0 %v6432_v52  ;;  %1596 = vmatpush1.bf16.msra.mxu1 %v6438_v57 }
 0x177   :  { %1554 = vmatprep.subr.bf16.mxu0 %v6444_v8  ;;  %1597 = vmatprep.subr.bf16.mxu1 %v5658_v63  ;;  %v8769_v63 = vld [vmem:[#allocation3_spill] sm:$0xff] }
 0x17a   :  { %1555 = vmatpush1.bf16.msra.mxu0 %v6451_v38  ;;  %1598 = vmatpush1.bf16.msra.mxu1 %v5668_v2  ;;  %v8771_v2 = vld [vmem:[#allocation5_spill] sm:$0xff] }
 0x17b   :  { %1556 = vmatprep.subr.bf16.mxu0 %v5663_v0  ;;  %1599 = vmatprep.subr.bf16.mxu1 %v5673_v3  ;;  %v8770_v0 = vld [vmem:[#allocation4_spill] sm:$0xff]  ;;  %v8772_v3 = vld [vmem:[#allocation6_spill] sm:$0xff] }
 0x17e   :  { %1557 = vmatpush1.bf16.msra.mxu0 %v5681_v4  ;;  %1600 = vmatpush1.bf16.msra.mxu1 %v5688_v5  ;;  %v8773_v4 = vld [vmem:[#allocation7_spill] sm:$0xff]  ;;  %v8774_v5 = vld [vmem:[#allocation8_spill] sm:$0xff] }
 0x17f   :  { %1686 = vmatprep.subr.bf16.mxu0 %v5718_v10  ;;  %1729 = vmatprep.subr.bf16.mxu1 %v5723_v11  ;;  %v8775_v10 = vld [vmem:[#allocation9_spill] sm:$0xff]  ;;  %v8776_v11 = vld [vmem:[#allocation10_spill] sm:$0xff] }
 0x181   :  { %1575 = vmatmul.mubr.bf16.vlgmr.msra.gmra.mxu0 %v960_v60  ;;  %1618 = vmatmul.mubr.bf16.vlgmr.msra.gmra.mxu1 %v960_v60  ;;  %v8801_v60 = vld [vmem:[#allocation35_spill] sm:$0xff] }
 0x182   :  { %1687 = vmatpush1.bf16.msra.mxu0 %v5729_v12  ;;  %1730 = vmatpush1.bf16.msra.mxu1 %v5734_v13  ;;  %v8777_v12 = vld [vmem:[#allocation11_spill] sm:$0xff]  ;;  %v8778_v13 = vld [vmem:[#allocation12_spill] sm:$0xff] }
 0x183   :  { %1688 = vmatprep.subr.bf16.mxu0 %v5742_v14  ;;  %1731 = vmatprep.subr.bf16.mxu1 %v5747_v15  ;;  %v8779_v14 = vld [vmem:[#allocation13_spill] sm:$0xff]  ;;  %v8780_v15 = vld [vmem:[#allocation14_spill] sm:$0xff] }
 0x186   :  { %1689 = vmatpush1.bf16.msra.mxu0 %v5752_v16  ;;  %1732 = vmatpush1.bf16.msra.mxu1 %v5757_v17  ;;  %v8781_v16 = vld [vmem:[#allocation15_spill] sm:$0xff]  ;;  %v8782_v17 = vld [vmem:[#allocation16_spill] sm:$0xff] }
 0x187   :  { %1690 = vmatprep.subr.bf16.mxu0 %v5766_v18  ;;  %1733 = vmatprep.subr.bf16.mxu1 %v5771_v19  ;;  %v8783_v18 = vld [vmem:[#allocation17_spill] sm:$0xff]  ;;  %v8784_v19 = vld [vmem:[#allocation18_spill] sm:$0xff] }
 0x18a   :  { %1691 = vmatpush1.bf16.msra.mxu0 %v5776_v20  ;;  %1734 = vmatpush1.bf16.msra.mxu1 %v5781_v21  ;;  %v8785_v20 = vld [vmem:[#allocation19_spill] sm:$0xff]  ;;  %v8786_v21 = vld [vmem:[#allocation20_spill] sm:$0xff] }
 0x18b   :  { %1692 = vmatprep.subr.bf16.mxu0 %v5790_v22  ;;  %1735 = vmatprep.subr.bf16.mxu1 %v5795_v23  ;;  %v8787_v22 = vld [vmem:[#allocation21_spill] sm:$0xff]  ;;  %v8788_v23 = vld [vmem:[#allocation22_spill] sm:$0xff] }
 0x18e   :  { %1693 = vmatpush1.bf16.msra.mxu0 %v5800_v24  ;;  %1736 = vmatpush1.bf16.msra.mxu1 %v5805_v25  ;;  %v8789_v24 = vld [vmem:[#allocation23_spill] sm:$0xff]  ;;  %v8790_v25 = vld [vmem:[#allocation24_spill] sm:$0xff] }
 0x18f   :  { %1694 = vmatprep.subr.bf16.mxu0 %v5814_v26  ;;  %1737 = vmatprep.subr.bf16.mxu1 %v5819_v27  ;;  %v8791_v26 = vld [vmem:[#allocation25_spill] sm:$0xff]  ;;  %v8792_v27 = vld [vmem:[#allocation26_spill] sm:$0xff]  ;;  %8838 = vst [vmem:[#allocation24_spill] sm:$0xff] %v6771_v46 }
 0x190   :  { %8839 = vst [vmem:[#allocation25_spill] sm:$0xff] %v6777_v40 }
 0x192   :  { %1695 = vmatpush1.bf16.msra.mxu0 %v5824_v28  ;;  %1738 = vmatpush1.bf16.msra.mxu1 %v5829_v29  ;;  %v8793_v28 = vld [vmem:[#allocation27_spill] sm:$0xff]  ;;  %v8794_v29 = vld [vmem:[#allocation28_spill] sm:$0xff] }
 0x193   :  { %1696 = vmatprep.subr.bf16.mxu0 %v5838_v30  ;;  %1739 = vmatprep.subr.bf16.mxu1 %v5843_v31  ;;  %v8795_v30 = vld [vmem:[#allocation29_spill] sm:$0xff]  ;;  %v8796_v31 = vld [vmem:[#allocation30_spill] sm:$0xff] }
 0x196   :  { %1697 = vmatpush1.bf16.msra.mxu0 %v5848_v32  ;;  %1740 = vmatpush1.bf16.msra.mxu1 %v5853_v35  ;;  %v8797_v32 = vld [vmem:[#allocation31_spill] sm:$0xff]  ;;  %v8798_v35 = vld [vmem:[#allocation32_spill] sm:$0xff] }
 0x197   :  { %1698 = vmatprep.subr.bf16.mxu0 %v5862_v36  ;;  %1741 = vmatprep.subr.bf16.mxu1 %v5867_v37  ;;  %v8799_v36 = vld [vmem:[#allocation33_spill] sm:$0xff]  ;;  %v8800_v37 = vld [vmem:[#allocation34_spill] sm:$0xff] }
 0x19a   :  { %1699 = vmatpush1.bf16.msra.mxu0 %v8769_v63  ;;  %1742 = vmatpush1.bf16.msra.mxu1 %v8770_v0  ;;  %v8802_v63 = vld [vmem:[#allocation36_spill] sm:$0xff]  ;;  %v8803_v0 = vld [vmem:[#allocation37_spill] sm:$0xff] }
 0x19b   :  { %1700 = vmatprep.subr.bf16.mxu0 %v8771_v2  ;;  %1743 = vmatprep.subr.bf16.mxu1 %v8772_v3  ;;  %v8804_v2 = vld [vmem:[#allocation38_spill] sm:$0xff]  ;;  %v8805_v3 = vld [vmem:[#allocation39_spill] sm:$0xff] }
 0x19e   :  { %1701 = vmatpush1.bf16.msra.mxu0 %v8773_v4  ;;  %1744 = vmatpush1.bf16.msra.mxu1 %v8774_v5  ;;  %v8806_v4 = vld [vmem:[#allocation40_spill] sm:$0xff]  ;;  %v6526_v5 = vld [vmem:[%s8359_s3 + $0xe4] ss:$16 sps:$4 sm:$0xff]  }
 0x19f   :  { %1702 = vmatprep.subr.bf16.mxu0 %v8775_v10  ;;  %1745 = vmatprep.subr.bf16.mxu1 %v8776_v11  ;;  %8807 = vst [vmem:[#allocation3_spill] sm:$0xff] %v6526_v5  ;;  %v6532_v10 = vld [vmem:[%s8359_s3 + $0xec] ss:$16 sps:$4 sm:$0xff]   ;;  %v1026_v11 = vld [vmem:[%s8362_s5] sm:$0xf] }
 0x1a0   :  { %8808 = vst [vmem:[#allocation4_spill] sm:$0xff] %v6532_v10 }
 0x1a2   :  { %1703 = vmatpush2.bf16.msra.mxu0 %v8777_v12  ;;  %1746 = vmatpush2.bf16.msra.mxu1 %v8778_v13  ;;  %v8809_v12 = vld [vmem:[#allocation41_spill] sm:$0xff] }
 0x1a3   :  { %1704 = vmatprep.subr.bf16.mxu0 %v8779_v14  ;;  %1747 = vmatprep.subr.bf16.mxu1 %v8780_v15  ;;  %v6539_v13 = vrot.slane %v1026_v11, %v8809_v12  ;;  %v8811_v14 = vld [vmem:[#allocation42_spill] sm:$0xff] }
 0x1a4   :  { %v6542_v15 = vrot.slane %v1026_v11, %v8811_v14 }
 0x1a5   :  { %8810 = vst [vmem:[#allocation5_spill] sm:$0xff] %v6539_v13 }
 0x1a6   :  { %1705 = vmatpush2.bf16.msra.mxu0 %v8781_v16  ;;  %1748 = vmatpush2.bf16.msra.mxu1 %v8782_v17  ;;  %8812 = vst [vmem:[#allocation6_spill] sm:$0xff] %v6542_v15 }
 0x1a7   :  { %1706 = vmatprep.subr.bf16.mxu0 %v8783_v18  ;;  %1749 = vmatprep.subr.bf16.mxu1 %v8784_v19 }
 0x1aa   :  { %1707 = vmatpush2.bf16.msra.mxu0 %v8785_v20  ;;  %1750 = vmatpush2.bf16.msra.mxu1 %v8786_v21 }
 0x1ab   :  { %1708 = vmatprep.subr.bf16.mxu0 %v8787_v22  ;;  %1751 = vmatprep.subr.bf16.mxu1 %v8788_v23 }
 0x1ae   :  { %1709 = vmatpush2.bf16.msra.mxu0 %v8789_v24  ;;  %1752 = vmatpush2.bf16.msra.mxu1 %v8790_v25 }
 0x1af   :  { %1710 = vmatprep.subr.bf16.mxu0 %v8791_v26  ;;  %1753 = vmatprep.subr.bf16.mxu1 %v8792_v27  ;;  %v6548_v27 = vrot.slane %v1026_v11, %v6114_v6 }
 0x1b1   :  { %8813 = vst [vmem:[#allocation7_spill] sm:$0xff] %v6548_v27 }
 0x1b2   :  { %1711 = vmatpush2.bf16.msra.mxu0 %v8793_v28  ;;  %1754 = vmatpush2.bf16.msra.mxu1 %v8794_v29 }
 0x1b3   :  { %1712 = vmatprep.subr.bf16.mxu0 %v8795_v30  ;;  %1755 = vmatprep.subr.bf16.mxu1 %v8796_v31 }
 0x1b6   :  { %1713 = vmatpush2.bf16.msra.mxu0 %v8797_v32  ;;  %1756 = vmatpush2.bf16.msra.mxu1 %v8798_v35 }
 0x1b7   :  { %1714 = vmatprep.subr.bf16.mxu0 %v8799_v36  ;;  %1757 = vmatprep.subr.bf16.mxu1 %v8800_v37  ;;  %v6554_v36 = vrot.slane %v1026_v11, %v6122_v61 }
 0x1b9   :  { %8814 = vst [vmem:[#allocation8_spill] sm:$0xff] %v6554_v36 }
 0x1ba   :  { %1715 = vmatpush2.bf16.msra.mxu0 %v8801_v60  ;;  %1758 = vmatpush2.bf16.msra.mxu1 %v8802_v63 }
 0x1bb   :  { %1716 = vmatprep.subr.bf16.mxu0 %v8803_v0  ;;  %1759 = vmatprep.subr.bf16.mxu1 %v8804_v2 }
 0x1be   :  { %1717 = vmatpush2.bf16.msra.mxu0 %v8805_v3  ;;  %1760 = vmatpush2.bf16.msra.mxu1 %v8806_v4 }
 0x1bf   :  { %1860 = vmatprep.subr.bf16.mxu0 %v6526_v5  ;;  %1903 = vmatprep.subr.bf16.mxu1 %v6532_v10 }
 0x221   :  { %v1402_v16 = vpop.f32.mrf.mxu0  ;;  %v1445_v18 = vpop.f32.mrf.mxu1 }
 0x222   :  { %v1403_v17 = vadd.f32 %v1402_v16, %v6539_v13  ;;  %v1446_v32 = vadd.f32 %v1445_v18, %v6548_v27 }
 0x223   :  { %v1404_v19 = vpop.f32.mrf.mxu0  ;;  %v1447_v24 = vpop.f32.mrf.mxu1 }
 0x224   :  { %v4219_v20 = vmul.f32 -1.442695, %v1403_v17  ;;  %v1405_v21 = vadd.f32 %v1404_v19, %v6542_v15  ;;  %v4221_v37 = vmul.f32 -1.442695, %v1446_v32  ;;  %v1448_v6 = vadd.f32 %v1447_v24, %v6554_v36 }
 0x225   :  { %v1406_v22 = vpop.f32.mrf.mxu0  ;;  %v1449_v30 = vpop.f32.mrf.mxu1 }
 0x226   :  { %4690 = vpow2.f32 %v4219_v20  ;;  %v4220_v23 = vmul.f32 -1.442695, %v1405_v21  ;;  %v1407_v25 = vadd.f32 %v1406_v22, %v6539_v13  ;;  %v1450_v35 = vadd.f32 %v1449_v30, %v6548_v27  ;;  %v8815_v20 = vld [vmem:[#allocation43_spill] sm:$0xff] }
 0x227   :  { %v1408_v26 = vpop.f32.mrf.mxu0  ;;  %v1451_v2 = vpop.f32.mrf.mxu1 }
 0x228   :  { %4692 = vpow2.f32 %v4220_v23  ;;  %v4222_v28 = vmul.f32 -1.442695, %v1407_v25  ;;  %v1409_v29 = vadd.f32 %v1408_v26, %v6542_v15  ;;  %v4224_v60 = vmul.f32 -1.442695, %v1450_v35  ;;  %v8816_v26 = vld [vmem:[#allocation45_spill] sm:$0xff] }
 0x229   :  { %v1452_v14 = vadd.f32 %v1451_v2, %v6554_v36 }
 0x22a   :  { %4694 = vpow2.f32 %v4222_v28  ;;  %v4223_v31 = vmul.f32 -1.442695, %v1409_v29 }
 0x22c   :  { %4696 = vpow2.f32 %v4223_v31 }
 0x22d   :  { %4698 = vpow2.f32 %v4221_v37 }
 0x22e   :  { %4700 = vpow2.f32 %v4224_v60 }
 0x233   :  { %v4691_v63 = vpop.eup %4690 }
 0x234   :  { %v1472_v0 = vadd.f32 1.0, %v4691_v63 }
 0x235   :  { %v4693_v3 = vpop.eup %4692 }
 0x236   :  { %4702 = vrcp.f32 %v1472_v0  ;;  %v1473_v4 = vadd.f32 1.0, %v4693_v3 }
 0x237   :  { %v4695_v12 = vpop.eup %4694  ;;  %4704 = vtanh.f32 %v1448_v6  ;;  %v8817_v6 = vld [vmem:[#allocation47_spill] sm:$0xff] }
 0x238   :  { %4706 = vrcp.f32 %v1473_v4  ;;  %v1475_v16 = vadd.f32 1.0, %v4695_v12 }
 0x239   :  { %v4697_v61 = vpop.eup %4696 }
 0x23a   :  { %4708 = vrcp.f32 %v1475_v16  ;;  %v1476_v11 = vadd.f32 1.0, %v4697_v61  ;;  %v4699_v17 = vpop.eup %4698  ;;  %v8818_v61 = vld [vmem:[#allocation49_spill] sm:$0xff] }
 0x23b   :  { %4710 = vtanh.f32 %v1452_v14  ;;  %v4701_v19 = vpop.eup %4700  ;;  %v1474_v30 = vadd.f32 1.0, %v4699_v17 }
 0x23c   :  { %4712 = vrcp.f32 %v1476_v11  ;;  %v1477_v32 = vadd.f32 1.0, %v4701_v19 }
 0x241   :  { %v1576_v18 = vpop.f32.mrf.mxu0  ;;  %v1619_v60 = vpop.f32.mrf.mxu1 }
 0x242   :  { %v1628_v21 = vadd.f32 %v1576_v18, %v8815_v20 }
 0x243   :  { %v4703_v22 = vpop.eup %4702  ;;  %v1578_v23 = vpop.f32.mrf.mxu0 }
 0x244   :  { %v4705_v24 = vpop.eup %4704  ;;  %v4226_v25 = vmul.f32 -1.442695, %v1628_v21  ;;  %v1629_v28 = vadd.f32 %v1578_v23, %v8816_v26  ;;  %v1621_v19 = vpop.f32.mrf.mxu1  ;;  %v8819_v23 = vld [vmem:[#allocation44_spill] sm:$0xff] }
 0x245   :  { %v4707_v29 = vpop.eup %4706  ;;  %v1494_v31 = vmul.f32 %v4705_v24, %v4703_v22  ;;  %v1580_v35 = vpop.f32.mrf.mxu0  ;;  %v1630_v24 = vadd.f32 %v1619_v60, %v8819_v23 }
 0x246   :  { %v1492_v37 = vmul.f32 0.0, %v4707_v29  ;;  %4714 = vpow2.f32 %v4226_v25  ;;  %v4227_v63 = vmul.f32 -1.442695, %v1629_v28  ;;  %v1632_v0 = vadd.f32 %v1580_v35, %v8817_v6  ;;  %v1623_v22 = vpop.f32.mrf.mxu1  ;;  %v8820_v25 = vld [vmem:[#allocation46_spill] sm:$0xff]  ;;  %v8821_v28 = vld [vmem:[#allocation48_spill] sm:$0xff] }
 0x247   :  { %v4709_v2 = vpop.eup %4708  ;;  %v1582_v3 = vpop.f32.mrf.mxu0  ;;  %v1631_v26 = vadd.f32 %v1621_v19, %v8820_v25  ;;  %v1634_v29 = vadd.f32 %v1623_v22, %v8821_v28 }
 0x248   :  { %v4711_v4 = vpop.eup %4710  ;;  %v6561_v12 = vadd.f32 %v1494_v31, %v1492_v37  ;;  %4716 = vpow2.f32 %v4227_v63  ;;  %v4229_v14 = vmul.f32 -1.442695, %v1632_v0  ;;  %v1633_v11 = vadd.f32 %v1582_v3, %v8818_v61 }
 0x249   :  { %v4713_v16 = vpop.eup %4712  ;;  %4718 = vrcp.f32 %v1474_v30  ;;  %v1495_v18 = vmul.f32 %v4711_v4, %v4709_v2  ;;  %v4228_v31 = vmul.f32 -1.442695, %v1630_v24  ;;  %v4231_v63 = vmul.f32 -1.442695, %v1634_v29  ;;  %v8822_v2 = vld [vmem:[#allocation50_spill] sm:$0xff] }
 0x24a   :  { %4720 = vrcp.f32 %v1477_v32  ;;  %v1493_v17 = vmul.f32 0.0, %v4713_v16  ;;  %v4230_v20 = vmul.f32 -1.442695, %v1633_v11  ;;  %v1625_v32 = vpop.f32.mrf.mxu1 }
 0x24b   :  { %4722 = vpow2.f32 %v4229_v14  ;;  %v1635_v3 = vadd.f32 %v1625_v32, %v8822_v2 }
 0x24c   :  { %4724 = vtanh.f32 %v6561_v12  ;;  %v6565_v21 = vadd.f32 %v1495_v18, %v1493_v17 }
 0x24d   :  { %4726 = vpow2.f32 %v4230_v20 }
 0x24e   :  { %4728 = vtanh.f32 %v6565_v21 }
 0x24f   :  { %4730 = vtanh.f32 %v1631_v26 }
 0x253   :  { %v4715_v30 = vpop.eup %4714 }
 0x254   :  { %v1654_v35 = vadd.f32 1.0, %v4715_v30 }
 0x255   :  { %v4717_v37 = vpop.eup %4716 }
 0x256   :  { %v4719_v6 = vpop.eup %4718  ;;  %4732 = vrcp.f32 %v1654_v35  ;;  %v1655_v0 = vadd.f32 1.0, %v4717_v37 }
 0x257   :  { %v4721_v4 = vpop.eup %4720  ;;  %4734 = vpow2.f32 %v4228_v31 }
 0x258   :  { %v4723_v14 = vpop.eup %4722  ;;  %4736 = vrcp.f32 %v1655_v0 }
 0x259   :  { %v4725_v60 = vpop.eup %4724  ;;  %v1657_v16 = vadd.f32 1.0, %v4723_v14  ;;  %4738 = vpow2.f32 %v4231_v63 }
 0x25a   :  { %v4727_v61 = vpop.eup %4726  ;;  %4740 = vtanh.f32 %v1635_v3  ;;  %v1500_v18 = vmul.f32 %v4725_v60, %v4719_v6 }
 0x25b   :  { %v4729_v11 = vpop.eup %4728  ;;  %4742 = vrcp.f32 %v1657_v16  ;;  %v1658_v17 = vadd.f32 1.0, %v4727_v61 }
 0x25c   :  { %v1501_v19 = vmul.f32 %v4729_v11, %v4721_v4  ;;  %v4731_v22 = vpop.eup %4730  ;;  %v6615_v11 = vld [vmem:[%s8359_s3 + $0x28] ss:$16 sps:$4 sm:$0xff]  }
 0x25d   :  { %4744 = vrcp.f32 %v1658_v17  ;;  %v6621_v17 = vld [vmem:[%s8359_s3 + $0x4] ss:$16 sps:$4 sm:$0xff]  }
 0x25e   :  { %v1685_v20 = vpack.c.bf16 %v1501_v19, %v1500_v18  ;;  %v6627_v18 = vld [vmem:[%s8359_s3 + $0xc] ss:$16 sps:$4 sm:$0xff]   ;;  %v6633_v19 = vld [vmem:[%s8359_s3] ss:$16 sps:$4 sm:$0xff]  }
 0x260   :  { %1718 = vmatprep.mubr.bf16.mxu0 %v1685_v20  ;;  %1761 = vmatprep.mubr.bf16.mxu1 %v1685_v20  ;;  %v6639_v20 = vld [vmem:[%s8359_s3 + $0x8] ss:$16 sps:$4 sm:$0xff]  }
 0x263   :  { %v4733_v23 = vpop.eup %4732 }
 0x264   :  { %v4735_v24 = vpop.eup %4734  ;;  %v1676_v25 = vmul.f32 %v4733_v23, %v4731_v22  ;;  %v6645_v22 = vld [vmem:[%s8360_s4 + $0xe4] ss:$16 sps:$4 sm:$0xff]   ;;  %v6651_v23 = vld [vmem:[%s8360_s4 + $0xec] ss:$16 sps:$4 sm:$0xff]  }
 0x265   :  { %v4737_v26 = vpop.eup %4736  ;;  %v1656_v32 = vadd.f32 1.0, %v4735_v24  ;;  %v6657_v24 = vld [vmem:[%s8360_s4 + $0xe0] ss:$16 sps:$4 sm:$0xff]  }
 0x266   :  { %v4739_v28 = vpop.eup %4738  ;;  %v1674_v29 = vmul.f32 %v4737_v26, %v6301_v55  ;;  %v6669_v26 = vld [vmem:[%s8360_s4 + $0xc4] ss:$16 sps:$4 sm:$0xff]  }
 0x267   :  { %v4741_v30 = vpop.eup %4740  ;;  %v1659_v6 = vadd.f32 1.0, %v4739_v28  ;;  %4746 = vrcp.f32 %v1656_v32  ;;  %v6675_v28 = vld [vmem:[%s8360_s4 + $0xcc] ss:$16 sps:$4 sm:$0xff]  }
 0x268   :  { %v4743_v31 = vpop.eup %4742  ;;  %v6573_v35 = vadd.f32 %v1676_v25, %v1674_v29  ;;  %v6663_v25 = vld [vmem:[%s8360_s4 + $0xe8] ss:$16 sps:$4 sm:$0xff]   ;;  %v6681_v29 = vld [vmem:[%s8360_s4 + $0xc0] ss:$16 sps:$4 sm:$0xff]   ;;  %v6699_v32 = vld [vmem:[%s8360_s4 + $0xac] ss:$16 sps:$4 sm:$0xff]  }
 0x269   :  { %v1677_v37 = vmul.f32 %v4743_v31, %v4741_v30  ;;  %8823 = vst [vmem:[#allocation9_spill] sm:$0xff] %v6681_v29  ;;  %v6687_v30 = vld [vmem:[%s8360_s4 + $0xc8] ss:$16 sps:$4 sm:$0xff]   ;;  %v6693_v31 = vld [vmem:[%s8360_s4 + $0xa4] ss:$16 sps:$4 sm:$0xff]   ;;  %8826 = vst [vmem:[#allocation12_spill] sm:$0xff] %v6699_v32 }
 0x26a   :  { %v4745_v63 = vpop.eup %4744  ;;  %4748 = vtanh.f32 %v6573_v35  ;;  %8824 = vst [vmem:[#allocation10_spill] sm:$0xff] %v6687_v30  ;;  %8825 = vst [vmem:[#allocation11_spill] sm:$0xff] %v6693_v31 }
 0x26b   :  { %v1675_v0 = vmul.f32 %v4745_v63, %v6304_v42  ;;  %4750 = vrcp.f32 %v1659_v6  ;;  %v6608_v42 = vld [vmem:[%s8359_s3 + $0x2c] ss:$16 sps:$4 sm:$0xff]   ;;  %v6711_v63 = vld [vmem:[%s8360_s4 + $0xa8] ss:$16 sps:$4 sm:$0xff]   ;;  %v6717_v6 = vld [vmem:[%s8360_s4 + $0x84] ss:$16 sps:$4 sm:$0xff]  }
 0x26c   :  { %8828 = vst [vmem:[#allocation14_spill] sm:$0xff] %v6711_v63  ;;  %8829 = vst [vmem:[#allocation15_spill] sm:$0xff] %v6717_v6 }
 0x26d   :  { %v6577_v2 = vadd.f32 %v1677_v37, %v1675_v0  ;;  %v6705_v37 = vld [vmem:[%s8360_s4 + $0xa0] ss:$16 sps:$4 sm:$0xff]   ;;  %v6723_v0 = vld [vmem:[%s8360_s4 + $0x8c] ss:$16 sps:$4 sm:$0xff]  }
 0x26e   :  { %8827 = vst [vmem:[#allocation13_spill] sm:$0xff] %v6705_v37  ;;  %8830 = vst [vmem:[#allocation16_spill] sm:$0xff] %v6723_v0 }
 0x26f   :  { %4752 = vtanh.f32 %v6577_v2 }
 0x274   :  { %v4747_v3 = vpop.eup %4746 }
 0x277   :  { %v4749_v55 = vpop.eup %4748 }
 0x278   :  { %v4751_v4 = vpop.eup %4750  ;;  %v1682_v60 = vmul.f32 %v4749_v55, %v4747_v3  ;;  %v6729_v3 = vld [vmem:[%s8360_s4 + $0x80] ss:$16 sps:$4 sm:$0xff]   ;;  %v6735_v55 = vld [vmem:[%s8360_s4 + $0x88] ss:$16 sps:$4 sm:$0xff]  }
 0x279   :  { %8831 = vst [vmem:[#allocation17_spill] sm:$0xff] %v6729_v3  ;;  %8832 = vst [vmem:[#allocation18_spill] sm:$0xff] %v6735_v55 }
 0x27c   :  { %v4753_v14 = vpop.eup %4752 }
 0x27d   :  { %v1683_v16 = vmul.f32 %v4753_v14, %v4751_v4  ;;  %v6741_v4 = vld [vmem:[%s8360_s4 + $0x64] ss:$16 sps:$4 sm:$0xff]   ;;  %v6747_v14 = vld [vmem:[%s8360_s4 + $0x6c] ss:$16 sps:$4 sm:$0xff]  }
 0x27e   :  { %8833 = vst [vmem:[#allocation19_spill] sm:$0xff] %v6741_v4  ;;  %8834 = vst [vmem:[#allocation20_spill] sm:$0xff] %v6747_v14 }
 0x27f   :  { %v1684_v61 = vpack.c.bf16 %v1683_v16, %v1682_v60  ;;  %v6753_v60 = vld [vmem:[%s8360_s4 + $0x60] ss:$16 sps:$4 sm:$0xff]   ;;  %v6759_v16 = vld [vmem:[%s8360_s4 + $0x68] ss:$16 sps:$4 sm:$0xff]  }
 0x280   :  { %8835 = vst [vmem:[#allocation21_spill] sm:$0xff] %v6753_v60  ;;  %8836 = vst [vmem:[#allocation22_spill] sm:$0xff] %v6759_v16 }
 0x281   :  { %1719 = vmatmul.mubr.bf16.vlgmr.msra.gmra.mxu0 %v1684_v61  ;;  %1762 = vmatmul.mubr.bf16.vlgmr.msra.gmra.mxu1 %v1684_v61 }
 0x282   :  { %1861 = vmatpush1.bf16.msra.mxu0 %v6310_v44  ;;  %1904 = vmatpush1.bf16.msra.mxu1 %v6316_v58 }
 0x283   :  { %1862 = vmatprep.subr.bf16.mxu0 %v6322_v33  ;;  %1905 = vmatprep.subr.bf16.mxu1 %v6328_v1 }
 0x284   :  { %1892 = vmatprep.mubr.bf16.mxu0 %v8768_v45  ;;  %1935 = vmatprep.mubr.bf16.mxu1 %v8768_v45 }
 0x286   :  { %1863 = vmatpush1.bf16.msra.mxu0 %v6336_v48  ;;  %1906 = vmatpush1.bf16.msra.mxu1 %v6342_v56 }
 0x287   :  { %1864 = vmatprep.subr.bf16.mxu0 %v6348_v59  ;;  %1907 = vmatprep.subr.bf16.mxu1 %v6354_v54 }
 0x28a   :  { %1865 = vmatpush1.bf16.msra.mxu0 %v6360_v49  ;;  %1908 = vmatpush1.bf16.msra.mxu1 %v6366_v9 }
 0x28b   :  { %1866 = vmatprep.subr.bf16.mxu0 %v6372_v51  ;;  %1909 = vmatprep.subr.bf16.mxu1 %v6378_v50 }
 0x28e   :  { %1867 = vmatpush1.bf16.msra.mxu0 %v6384_v41  ;;  %1910 = vmatpush1.bf16.msra.mxu1 %v6390_v62 }
 0x28f   :  { %1868 = vmatprep.subr.bf16.mxu0 %v6396_v34  ;;  %1911 = vmatprep.subr.bf16.mxu1 %v6402_v43 }
 0x292   :  { %1869 = vmatpush1.bf16.msra.mxu0 %v6408_v47  ;;  %1912 = vmatpush1.bf16.msra.mxu1 %v6414_v39 }
 0x293   :  { %1870 = vmatprep.subr.bf16.mxu0 %v6420_v53  ;;  %1913 = vmatprep.subr.bf16.mxu1 %v6426_v7 }
 0x296   :  { %1871 = vmatpush1.bf16.msra.mxu0 %v6432_v52  ;;  %1914 = vmatpush1.bf16.msra.mxu1 %v6438_v57 }
 0x297   :  { %1872 = vmatprep.subr.bf16.mxu0 %v6444_v8  ;;  %1915 = vmatprep.subr.bf16.mxu1 %v6608_v42 }
 0x29a   :  { %1873 = vmatpush1.bf16.msra.mxu0 %v6451_v38  ;;  %1916 = vmatpush1.bf16.msra.mxu1 %v6615_v11 }
 0x29b   :  { %1874 = vmatprep.subr.bf16.mxu0 %v6621_v17  ;;  %1917 = vmatprep.subr.bf16.mxu1 %v6627_v18 }
 0x29e   :  { %1875 = vmatpush1.bf16.msra.mxu0 %v6633_v19  ;;  %1918 = vmatpush1.bf16.msra.mxu1 %v6639_v20 }
 0x29f   :  { %2004 = vmatprep.subr.bf16.mxu0 %v6645_v22  ;;  %2047 = vmatprep.subr.bf16.mxu1 %v6651_v23 }
 0x2a1   :  { %1893 = vmatmul.mubr.bf16.vlgmr.msra.gmra.mxu0 %v1684_v61  ;;  %1936 = vmatmul.mubr.bf16.vlgmr.msra.gmra.mxu1 %v1684_v61  ;;  %v6765_v61 = vld [vmem:[%s8360_s4 + $0x44] ss:$16 sps:$4 sm:$0xff]  }
 0x2a2   :  { %2005 = vmatpush1.bf16.msra.mxu0 %v6657_v24  ;;  %2048 = vmatpush1.bf16.msra.mxu1 %v6663_v25  ;;  %8837 = vst [vmem:[#allocation23_spill] sm:$0xff] %v6765_v61 }
 0x2a3   :  { %2006 = vmatprep.subr.bf16.mxu0 %v6669_v26  ;;  %2049 = vmatprep.subr.bf16.mxu1 %v6675_v28 }
 0x2a6   :  { %2007 = vmatpush1.bf16.msra.mxu0 %v6681_v29  ;;  %2050 = vmatpush1.bf16.msra.mxu1 %v6687_v30 }
 0x2a7   :  { %2008 = vmatprep.subr.bf16.mxu0 %v6693_v31  ;;  %2051 = vmatprep.subr.bf16.mxu1 %v6699_v32 }
 0x2aa   :  { %2009 = vmatpush1.bf16.msra.mxu0 %v6705_v37  ;;  %2052 = vmatpush1.bf16.msra.mxu1 %v6711_v63 }
 0x2ab   :  { %2010 = vmatprep.subr.bf16.mxu0 %v6717_v6  ;;  %2053 = vmatprep.subr.bf16.mxu1 %v6723_v0 }
 0x2ae   :  { %2011 = vmatpush1.bf16.msra.mxu0 %v6729_v3  ;;  %2054 = vmatpush1.bf16.msra.mxu1 %v6735_v55 }
 0x2af   :  { %2012 = vmatprep.subr.bf16.mxu0 %v6741_v4  ;;  %2055 = vmatprep.subr.bf16.mxu1 %v6747_v14 }
 0x2b2   :  { %2013 = vmatpush1.bf16.msra.mxu0 %v6753_v60  ;;  %2056 = vmatpush1.bf16.msra.mxu1 %v6759_v16  ;;  %v6783_v16 = vld [vmem:[%s8360_s4 + $0x48] ss:$16 sps:$4 sm:$0xff]  }
 0x2b3   :  { %2014 = vmatprep.subr.bf16.mxu0 %v6765_v61  ;;  %2057 = vmatprep.subr.bf16.mxu1 %v6771_v46  ;;  %8840 = vst [vmem:[#allocation26_spill] sm:$0xff] %v6783_v16  ;;  %v6789_v61 = vld [vmem:[%s8360_s4 + $0x24] ss:$16 sps:$4 sm:$0xff]   ;;  %v6795_v46 = vld [vmem:[%s8360_s4 + $0x2c] ss:$16 sps:$4 sm:$0xff]  }
 0x2b4   :  { %8841 = vst [vmem:[#allocation27_spill] sm:$0xff] %v6789_v61  ;;  %8842 = vst [vmem:[#allocation28_spill] sm:$0xff] %v6795_v46 }
 0x2b6   :  { %2015 = vmatpush1.bf16.msra.mxu0 %v6777_v40  ;;  %2058 = vmatpush1.bf16.msra.mxu1 %v6783_v16  ;;  %v6801_v40 = vld [vmem:[%s8360_s4 + $0x20] ss:$16 sps:$4 sm:$0xff]   ;;  %v6807_v16 = vld [vmem:[%s8360_s4 + $0x28] ss:$16 sps:$4 sm:$0xff]  }
 0x2b7   :  { %2016 = vmatprep.subr.bf16.mxu0 %v6789_v61  ;;  %2059 = vmatprep.subr.bf16.mxu1 %v6795_v46  ;;  %8843 = vst [vmem:[#allocation29_spill] sm:$0xff] %v6801_v40  ;;  %8844 = vst [vmem:[#allocation30_spill] sm:$0xff] %v6807_v16  ;;  %v6813_v61 = vld [vmem:[%s8360_s4 + $0x4] ss:$16 sps:$4 sm:$0xff]   ;;  %v6819_v46 = vld [vmem:[%s8360_s4 + $0xc] ss:$16 sps:$4 sm:$0xff]  }
 0x2b8   :  { %8845 = vst [vmem:[#allocation31_spill] sm:$0xff] %v6813_v61  ;;  %8846 = vst [vmem:[#allocation32_spill] sm:$0xff] %v6819_v46 }
 0x2ba   :  { %2017 = vmatpush1.bf16.msra.mxu0 %v6801_v40  ;;  %2060 = vmatpush1.bf16.msra.mxu1 %v6807_v16  ;;  %v6825_v40 = vld [vmem:[%s8360_s4] ss:$16 sps:$4 sm:$0xff]   ;;  %v6831_v16 = vld [vmem:[%s8360_s4 + $0x8] ss:$16 sps:$4 sm:$0xff]  }
 0x2bb   :  { %2018 = vmatprep.subr.bf16.mxu0 %v6813_v61  ;;  %2061 = vmatprep.subr.bf16.mxu1 %v6819_v46  ;;  %8847 = vst [vmem:[#allocation33_spill] sm:$0xff] %v6825_v40  ;;  %8848 = vst [vmem:[#allocation34_spill] sm:$0xff] %v6831_v16  ;;  %v6837_v61 = vld [vmem:[%s8360_s4 + $0x1e4] ss:$16 sps:$4 sm:$0xff]   ;;  %v6843_v46 = vld [vmem:[%s8360_s4 + $0x1ec] ss:$16 sps:$4 sm:$0xff]  }
 0x2bc   :  { %8849 = vst [vmem:[#allocation35_spill] sm:$0xff] %v6837_v61  ;;  %8850 = vst [vmem:[#allocation36_spill] sm:$0xff] %v6843_v46 }
 0x2be   :  { %2019 = vmatpush1.bf16.msra.mxu0 %v6825_v40  ;;  %2062 = vmatpush1.bf16.msra.mxu1 %v6831_v16  ;;  %v6849_v40 = vld [vmem:[%s8360_s4 + $0x1e0] ss:$16 sps:$4 sm:$0xff]   ;;  %v6855_v16 = vld [vmem:[%s8360_s4 + $0x1e8] ss:$16 sps:$4 sm:$0xff]  }
 0x2bf   :  { %2020 = vmatprep.subr.bf16.mxu0 %v6837_v61  ;;  %2063 = vmatprep.subr.bf16.mxu1 %v6843_v46  ;;  %8851 = vst [vmem:[#allocation37_spill] sm:$0xff] %v6849_v40  ;;  %8852 = vst [vmem:[#allocation38_spill] sm:$0xff] %v6855_v16  ;;  %v6861_v61 = vld [vmem:[%s8360_s4 + $0x1c4] ss:$16 sps:$4 sm:$0xff]   ;;  %v6867_v46 = vld [vmem:[%s8360_s4 + $0x1cc] ss:$16 sps:$4 sm:$0xff]  }
 0x2c0   :  { %8853 = vst [vmem:[#allocation39_spill] sm:$0xff] %v6861_v61  ;;  %8854 = vst [vmem:[#allocation40_spill] sm:$0xff] %v6867_v46 }
 0x2c2   :  { %2021 = vmatpush2.bf16.msra.mxu0 %v6849_v40  ;;  %2064 = vmatpush2.bf16.msra.mxu1 %v6855_v16  ;;  %v6873_v40 = vld [vmem:[%s8360_s4 + $0x1c0] ss:$16 sps:$4 sm:$0xff]   ;;  %v6879_v16 = vld [vmem:[%s8360_s4 + $0x1c8] ss:$16 sps:$4 sm:$0xff]  }
 0x2c3   :  { %2022 = vmatprep.subr.bf16.mxu0 %v6861_v61  ;;  %2065 = vmatprep.subr.bf16.mxu1 %v6867_v46  ;;  %8855 = vst [vmem:[#allocation41_spill] sm:$0xff] %v6873_v40  ;;  %8856 = vst [vmem:[#allocation42_spill] sm:$0xff] %v6879_v16  ;;  %v6885_v61 = vld [vmem:[%s8360_s4 + $0x1a4] ss:$16 sps:$4 sm:$0xff]   ;;  %v6891_v46 = vld [vmem:[%s8360_s4 + $0x1ac] ss:$16 sps:$4 sm:$0xff]  }
 0x2c4   :  { %8857 = vst [vmem:[#allocation43_spill] sm:$0xff] %v6885_v61  ;;  %8858 = vst [vmem:[#allocation45_spill] sm:$0xff] %v6891_v46 }
 0x2c6   :  { %2023 = vmatpush2.bf16.msra.mxu0 %v6873_v40  ;;  %2066 = vmatpush2.bf16.msra.mxu1 %v6879_v16  ;;  %v6897_v40 = vld [vmem:[%s8360_s4 + $0x1a0] ss:$16 sps:$4 sm:$0xff]   ;;  %v6903_v16 = vld [vmem:[%s8360_s4 + $0x1a8] ss:$16 sps:$4 sm:$0xff]  }
 0x2c7   :  { %2024 = vmatprep.subr.bf16.mxu0 %v6885_v61  ;;  %2067 = vmatprep.subr.bf16.mxu1 %v6891_v46  ;;  %8859 = vst [vmem:[#allocation47_spill] sm:$0xff] %v6897_v40  ;;  %8860 = vst [vmem:[#allocation49_spill] sm:$0xff] %v6903_v16  ;;  %v6909_v61 = vld [vmem:[%s8360_s4 + $0x184] ss:$16 sps:$4 sm:$0xff]   ;;  %v6915_v46 = vld [vmem:[%s8360_s4 + $0x18c] ss:$16 sps:$4 sm:$0xff]  }
 0x2c8   :  { %8861 = vst [vmem:[#allocation44_spill] sm:$0xff] %v6909_v61  ;;  %8862 = vst [vmem:[#allocation46_spill] sm:$0xff] %v6915_v46 }
 0x2ca   :  { %2025 = vmatpush2.bf16.msra.mxu0 %v6897_v40  ;;  %2068 = vmatpush2.bf16.msra.mxu1 %v6903_v16  ;;  %v6921_v40 = vld [vmem:[%s8360_s4 + $0x180] ss:$16 sps:$4 sm:$0xff]   ;;  %v6927_v16 = vld [vmem:[%s8360_s4 + $0x188] ss:$16 sps:$4 sm:$0xff]  }
 0x2cb   :  { %2026 = vmatprep.subr.bf16.mxu0 %v6909_v61  ;;  %2069 = vmatprep.subr.bf16.mxu1 %v6915_v46  ;;  %8863 = vst [vmem:[#allocation48_spill] sm:$0xff] %v6921_v40  ;;  %8864 = vst [vmem:[#allocation50_spill] sm:$0xff] %v6927_v16  ;;  %v6933_v61 = vld [vmem:[%s8360_s4 + $0x164] ss:$16 sps:$4 sm:$0xff]   ;;  %v6939_v46 = vld [vmem:[%s8360_s4 + $0x16c] ss:$16 sps:$4 sm:$0xff]  }
 0x2cc   :  { %8865 = vst [vmem:[#allocation99_spill] sm:$0xff] %v6933_v61  ;;  %8866 = vst [vmem:[#allocation100_spill] sm:$0xff] %v6939_v46 }
 0x2ce   :  { %2027 = vmatpush2.bf16.msra.mxu0 %v6921_v40  ;;  %2070 = vmatpush2.bf16.msra.mxu1 %v6927_v16  ;;  %v6945_v40 = vld [vmem:[%s8360_s4 + $0x160] ss:$16 sps:$4 sm:$0xff]   ;;  %v6951_v16 = vld [vmem:[%s8360_s4 + $0x168] ss:$16 sps:$4 sm:$0xff]  }
 0x2cf   :  { %2028 = vmatprep.subr.bf16.mxu0 %v6933_v61  ;;  %2071 = vmatprep.subr.bf16.mxu1 %v6939_v46  ;;  %8867 = vst [vmem:[#allocation101_spill] sm:$0xff] %v6945_v40  ;;  %8868 = vst [vmem:[#allocation102_spill] sm:$0xff] %v6951_v16  ;;  %v6957_v61 = vld [vmem:[%s8360_s4 + $0x144] ss:$16 sps:$4 sm:$0xff]   ;;  %v6963_v46 = vld [vmem:[%s8360_s4 + $0x14c] ss:$16 sps:$4 sm:$0xff]  }
 0x2d0   :  { %8869 = vst [vmem:[#allocation103_spill] sm:$0xff] %v6957_v61  ;;  %8870 = vst [vmem:[#allocation104_spill] sm:$0xff] %v6963_v46 }
 0x2d2   :  { %2029 = vmatpush2.bf16.msra.mxu0 %v6945_v40  ;;  %2072 = vmatpush2.bf16.msra.mxu1 %v6951_v16  ;;  %v6969_v40 = vld [vmem:[%s8360_s4 + $0x140] ss:$16 sps:$4 sm:$0xff]   ;;  %v6975_v16 = vld [vmem:[%s8360_s4 + $0x148] ss:$16 sps:$4 sm:$0xff]  }
 0x2d3   :  { %2030 = vmatprep.subr.bf16.mxu0 %v6957_v61  ;;  %2073 = vmatprep.subr.bf16.mxu1 %v6963_v46  ;;  %8871 = vst [vmem:[#allocation105_spill] sm:$0xff] %v6969_v40  ;;  %8872 = vst [vmem:[#allocation106_spill] sm:$0xff] %v6975_v16  ;;  %v6981_v61 = vld [vmem:[%s8360_s4 + $0x124] ss:$16 sps:$4 sm:$0xff]   ;;  %v6987_v46 = vld [vmem:[%s8360_s4 + $0x12c] ss:$16 sps:$4 sm:$0xff]  }
 0x2d4   :  { %8873 = vst [vmem:[#allocation107_spill] sm:$0xff] %v6981_v61  ;;  %8874 = vst [vmem:[#allocation108_spill] sm:$0xff] %v6987_v46 }
 0x2d6   :  { %2031 = vmatpush2.bf16.msra.mxu0 %v6969_v40  ;;  %2074 = vmatpush2.bf16.msra.mxu1 %v6975_v16  ;;  %v6993_v40 = vld [vmem:[%s8360_s4 + $0x120] ss:$16 sps:$4 sm:$0xff]   ;;  %v6999_v16 = vld [vmem:[%s8360_s4 + $0x128] ss:$16 sps:$4 sm:$0xff]  }
 0x2d7   :  { %2032 = vmatprep.subr.bf16.mxu0 %v6981_v61  ;;  %2075 = vmatprep.subr.bf16.mxu1 %v6987_v46  ;;  %8875 = vst [vmem:[#allocation109_spill] sm:$0xff] %v6993_v40  ;;  %8876 = vst [vmem:[#allocation110_spill] sm:$0xff] %v6999_v16  ;;  %v7005_v61 = vld [vmem:[%s8360_s4 + $0x104] ss:$16 sps:$4 sm:$0xff]   ;;  %v7011_v46 = vld [vmem:[%s8360_s4 + $0x10c] ss:$16 sps:$4 sm:$0xff]  }
 0x2d8   :  { %8877 = vst [vmem:[#allocation111_spill] sm:$0xff] %v7005_v61  ;;  %8878 = vst [vmem:[#allocation112_spill] sm:$0xff] %v7011_v46 }
 0x2da   :  { %2033 = vmatpush2.bf16.msra.mxu0 %v6993_v40  ;;  %2076 = vmatpush2.bf16.msra.mxu1 %v6999_v16  ;;  %v7017_v40 = vld [vmem:[%s8360_s4 + $0x100] ss:$16 sps:$4 sm:$0xff]   ;;  %v7023_v16 = vld [vmem:[%s8360_s4 + $0x108] ss:$16 sps:$4 sm:$0xff]  }
 0x2db   :  { %2034 = vmatprep.subr.bf16.mxu0 %v7005_v61  ;;  %2077 = vmatprep.subr.bf16.mxu1 %v7011_v46  ;;  %8879 = vst [vmem:[#allocation113_spill] sm:$0xff] %v7017_v40  ;;  %8880 = vst [vmem:[#allocation114_spill] sm:$0xff] %v7023_v16 }
 0x2de   :  { %2035 = vmatpush2.bf16.msra.mxu0 %v7017_v40  ;;  %2078 = vmatpush2.bf16.msra.mxu1 %v7023_v16 }
 0x2df   :  { %2178 = vmatprep.subr.bf16.mxu0 %v6526_v5  ;;  %2221 = vmatprep.subr.bf16.mxu1 %v6532_v10 }
 0x341   :  { %v1720_v61 = vpop.f32.mrf.mxu0  ;;  %v1763_v60 = vpop.f32.mrf.mxu1 }
 0x342   :  { %v1721_v46 = vadd.f32 %v1720_v61, %v6539_v13  ;;  %v1764_v61 = vadd.f32 %v1763_v60, %v6548_v27 }
 0x343   :  { %v1722_v14 = vpop.f32.mrf.mxu0  ;;  %v1765_v0 = vpop.f32.mrf.mxu1 }
 0x344   :  { %v4232_v4 = vmul.f32 -1.442695, %v1721_v46  ;;  %v1723_v55 = vadd.f32 %v1722_v14, %v6542_v15  ;;  %v4234_v14 = vmul.f32 -1.442695, %v1764_v61 }
 0x345   :  { %v1724_v40 = vpop.f32.mrf.mxu0  ;;  %v1767_v10 = vpop.f32.mrf.mxu1 }
 0x346   :  { %4754 = vpow2.f32 %v4232_v4  ;;  %v4233_v3 = vmul.f32 -1.442695, %v1723_v55  ;;  %v1725_v6 = vadd.f32 %v1724_v40, %v6539_v13  ;;  %v1768_v46 = vadd.f32 %v1767_v10, %v6548_v27  ;;  %v8882_v27 = vld [vmem:[#allocation53_spill] sm:$0xff] }
 0x347   :  { %v1726_v63 = vpop.f32.mrf.mxu0  ;;  %v1766_v55 = vadd.f32 %v1765_v0, %v6554_v36  ;;  %v1769_v40 = vpop.f32.mrf.mxu1 }
 0x348   :  { %4756 = vpow2.f32 %v4233_v3  ;;  %v4235_v16 = vmul.f32 -1.442695, %v1725_v6  ;;  %v1727_v5 = vadd.f32 %v1726_v63, %v6542_v15  ;;  %v4237_v32 = vmul.f32 -1.442695, %v1768_v46  ;;  %v8881_v46 = vld [vmem:[#allocation51_spill] sm:$0xff] }
 0x34a   :  { %4758 = vpow2.f32 %v4235_v16  ;;  %v4236_v37 = vmul.f32 -1.442695, %v1727_v5  ;;  %v1770_v5 = vadd.f32 %v1769_v40, %v6554_v36 }
 0x34c   :  { %4760 = vpow2.f32 %v4236_v37 }
 0x34d   :  { %4762 = vpow2.f32 %v4234_v14 }
 0x34e   :  { %4764 = vpow2.f32 %v4237_v32 }
 0x353   :  { %v4755_v4 = vpop.eup %4754 }
 0x354   :  { %v1790_v31 = vadd.f32 1.0, %v4755_v4 }
 0x355   :  { %v4757_v3 = vpop.eup %4756 }
 0x356   :  { %4766 = vrcp.f32 %v1790_v31  ;;  %v1791_v63 = vadd.f32 1.0, %v4757_v3 }
 0x357   :  { %v4759_v6 = vpop.eup %4758  ;;  %4768 = vtanh.f32 %v1766_v55 }
 0x358   :  { %4770 = vrcp.f32 %v1791_v63  ;;  %v1793_v37 = vadd.f32 1.0, %v4759_v6 }
 0x359   :  { %v4761_v60 = vpop.eup %4760 }
 0x35a   :  { %4772 = vrcp.f32 %v1793_v37  ;;  %v1794_v10 = vadd.f32 1.0, %v4761_v60  ;;  %v4763_v16 = vpop.eup %4762 }
 0x35b   :  { %4774 = vtanh.f32 %v1770_v5  ;;  %v4765_v61 = vpop.eup %4764  ;;  %v1792_v40 = vadd.f32 1.0, %v4763_v16  ;;  %v8884_v16 = vld [vmem:[#allocation57_spill] sm:$0xff] }
 0x35c   :  { %4776 = vrcp.f32 %v1794_v10  ;;  %v1795_v6 = vadd.f32 1.0, %v4765_v61  ;;  %v8883_v10 = vld [vmem:[#allocation55_spill] sm:$0xff] }
 0x361   :  { %v1894_v0 = vpop.f32.mrf.mxu0  ;;  %v1937_v5 = vpop.f32.mrf.mxu1 }
 0x362   :  { %v1946_v14 = vadd.f32 %v1894_v0, %v8881_v46 }
 0x363   :  { %v4767_v4 = vpop.eup %4766  ;;  %v1896_v32 = vpop.f32.mrf.mxu0 }
 0x364   :  { %v4769_v31 = vpop.eup %4768  ;;  %v4239_v3 = vmul.f32 -1.442695, %v1946_v14  ;;  %v1947_v55 = vadd.f32 %v1896_v32, %v8882_v27 }
 0x365   :  { %v4771_v15 = vpop.eup %4770  ;;  %v1812_v63 = vmul.f32 %v4769_v31, %v4767_v4  ;;  %v1898_v36 = vpop.f32.mrf.mxu0 }
 0x366   :  { %v1810_v37 = vmul.f32 %v4771_v15, %v6561_v12  ;;  %4778 = vpow2.f32 %v4239_v3  ;;  %v4240_v60 = vmul.f32 -1.442695, %v1947_v55  ;;  %v1950_v13 = vadd.f32 %v1898_v36, %v8883_v10  ;;  %v1939_v12 = vpop.f32.mrf.mxu1  ;;  %v8886_v55 = vld [vmem:[#allocation54_spill] sm:$0xff] }
 0x367   :  { %v4773_v30 = vpop.eup %4772  ;;  %v1900_v0 = vpop.f32.mrf.mxu0 }
 0x368   :  { %v4775_v46 = vpop.eup %4774  ;;  %v7040_v29 = vadd.f32 %v1812_v63, %v1810_v37  ;;  %4780 = vpow2.f32 %v4240_v60  ;;  %v4242_v14 = vmul.f32 -1.442695, %v1950_v13  ;;  %v1951_v4 = vadd.f32 %v1900_v0, %v8884_v16  ;;  %v1941_v31 = vpop.f32.mrf.mxu1  ;;  %v8885_v13 = vld [vmem:[#allocation52_spill] sm:$0xff] }
 0x369   :  { %v4777_v27 = vpop.eup %4776  ;;  %4782 = vrcp.f32 %v1792_v40  ;;  %v1813_v15 = vmul.f32 %v4775_v46, %v4773_v30  ;;  %v1948_v3 = vadd.f32 %v1937_v5, %v8885_v13  ;;  %v1949_v40 = vadd.f32 %v1939_v12, %v8886_v55  ;;  %v8887_v63 = vld [vmem:[#allocation56_spill] sm:$0xff] }
 0x36a   :  { %4784 = vrcp.f32 %v1795_v6  ;;  %v1811_v61 = vmul.f32 %v4777_v27, %v6565_v21  ;;  %v4243_v32 = vmul.f32 -1.442695, %v1951_v4  ;;  %v1952_v6 = vadd.f32 %v1941_v31, %v8887_v63  ;;  %v1943_v30 = vpop.f32.mrf.mxu1  ;;  %v8888_v27 = vld [vmem:[#allocation58_spill] sm:$0xff] }
 0x36b   :  { %4786 = vpow2.f32 %v4242_v14  ;;  %v4241_v21 = vmul.f32 -1.442695, %v1948_v3  ;;  %v1953_v16 = vadd.f32 %v1943_v30, %v8888_v27 }
 0x36c   :  { %4788 = vtanh.f32 %v7040_v29  ;;  %v7045_v36 = vadd.f32 %v1813_v15, %v1811_v61  ;;  %v4244_v0 = vmul.f32 -1.442695, %v1952_v6 }
 0x36d   :  { %4790 = vpow2.f32 %v4243_v32 }
 0x36e   :  { %4792 = vtanh.f32 %v7045_v36 }
 0x36f   :  { %4794 = vtanh.f32 %v1949_v40 }
 0x373   :  { %v4779_v37 = vpop.eup %4778 }
 0x374   :  { %v1972_v60 = vadd.f32 1.0, %v4779_v37 }
 0x375   :  { %v4781_v10 = vpop.eup %4780 }
 0x376   :  { %v4783_v46 = vpop.eup %4782  ;;  %4796 = vrcp.f32 %v1972_v60  ;;  %v1973_v14 = vadd.f32 1.0, %v4781_v10 }
 0x377   :  { %v4785_v4 = vpop.eup %4784  ;;  %4798 = vpow2.f32 %v4241_v21 }
 0x378   :  { %v4787_v61 = vpop.eup %4786  ;;  %4800 = vrcp.f32 %v1973_v14 }
 0x379   :  { %v4789_v5 = vpop.eup %4788  ;;  %v1975_v15 = vadd.f32 1.0, %v4787_v61  ;;  %4802 = vpow2.f32 %v4244_v0 }
 0x37a   :  { %v4791_v12 = vpop.eup %4790  ;;  %4804 = vtanh.f32 %v1953_v16  ;;  %v1818_v13 = vmul.f32 %v4789_v5, %v4783_v46 }
 0x37b   :  { %v4793_v32 = vpop.eup %4792  ;;  %4806 = vrcp.f32 %v1975_v15  ;;  %v1976_v31 = vadd.f32 1.0, %v4791_v12 }
 0x37c   :  { %v1819_v3 = vmul.f32 %v4793_v32, %v4785_v4  ;;  %v4795_v40 = vpop.eup %4794 }
 0x37d   :  { %4808 = vrcp.f32 %v1976_v31 }
 0x37e   :  { %v2003_v55 = vpack.c.bf16 %v1819_v3, %v1818_v13 }
 0x380   :  { %2036 = vmatprep.mubr.bf16.mxu0 %v2003_v55  ;;  %2079 = vmatprep.mubr.bf16.mxu1 %v2003_v55  ;;  %v8914_v55 = vld [vmem:[#allocation34_spill] sm:$0xff] }
 0x383   :  { %v4797_v63 = vpop.eup %4796 }
 0x384   :  { %v4799_v6 = vpop.eup %4798  ;;  %v1994_v37 = vmul.f32 %v4797_v63, %v4795_v40  ;;  %v8915_v40 = vld [vmem:[#allocation35_spill] sm:$0xff]  ;;  %v8916_v63 = vld [vmem:[#allocation36_spill] sm:$0xff] }
 0x385   :  { %v4801_v21 = vpop.eup %4800  ;;  %v1974_v14 = vadd.f32 1.0, %v4799_v6  ;;  %v8917_v6 = vld [vmem:[#allocation37_spill] sm:$0xff] }
 0x386   :  { %v4803_v30 = vpop.eup %4802  ;;  %v1992_v60 = vmul.f32 %v4801_v21, %v6573_v35  ;;  %v8919_v21 = vld [vmem:[#allocation39_spill] sm:$0xff] }
 0x387   :  { %v4805_v10 = vpop.eup %4804  ;;  %v1977_v4 = vadd.f32 1.0, %v4803_v30  ;;  %4810 = vrcp.f32 %v1974_v14  ;;  %v8920_v30 = vld [vmem:[#allocation40_spill] sm:$0xff]  ;;  %v8924_v14 = vld [vmem:[#allocation45_spill] sm:$0xff] }
 0x388   :  { %v4807_v0 = vpop.eup %4806  ;;  %v7053_v27 = vadd.f32 %v1994_v37, %v1992_v60  ;;  %v8918_v37 = vld [vmem:[#allocation38_spill] sm:$0xff]  ;;  %v8921_v60 = vld [vmem:[#allocation41_spill] sm:$0xff] }
 0x389   :  { %v1995_v16 = vmul.f32 %v4807_v0, %v4805_v10  ;;  %v8922_v10 = vld [vmem:[#allocation42_spill] sm:$0xff]  ;;  %v8923_v0 = vld [vmem:[#allocation43_spill] sm:$0xff] }
 0x38a   :  { %v4809_v46 = vpop.eup %4808  ;;  %4812 = vtanh.f32 %v7053_v27 }
 0x38b   :  { %v1993_v61 = vmul.f32 %v4809_v46, %v6577_v2  ;;  %4814 = vrcp.f32 %v1977_v4  ;;  %v8913_v2 = vld [vmem:[#allocation33_spill] sm:$0xff]  ;;  %v8927_v4 = vld [vmem:[#allocation44_spill] sm:$0xff] }
 0x38c   :  { %v8926_v46 = vld [vmem:[#allocation49_spill] sm:$0xff] }
 0x38d   :  { %v7057_v5 = vadd.f32 %v1995_v16, %v1993_v61  ;;  %v8925_v16 = vld [vmem:[#allocation47_spill] sm:$0xff]  ;;  %v8928_v61 = vld [vmem:[#allocation46_spill] sm:$0xff] }
 0x38f   :  { %4816 = vtanh.f32 %v7057_v5 }
 0x394   :  { %v4811_v15 = vpop.eup %4810 }
 0x397   :  { %v4813_v35 = vpop.eup %4812 }
 0x398   :  { %v4815_v12 = vpop.eup %4814  ;;  %v2000_v31 = vmul.f32 %v4813_v35, %v4811_v15  ;;  %v8929_v15 = vld [vmem:[#allocation48_spill] sm:$0xff]  ;;  %v8930_v35 = vld [vmem:[#allocation50_spill] sm:$0xff] }
 0x39c   :  { %v4817_v32 = vpop.eup %4816 }
 0x39d   :  { %v2001_v13 = vmul.f32 %v4817_v32, %v4815_v12  ;;  %v8931_v12 = vld [vmem:[#allocation99_spill] sm:$0xff]  ;;  %v8932_v32 = vld [vmem:[#allocation100_spill] sm:$0xff] }
 0x39f   :  { %v2002_v3 = vpack.c.bf16 %v2001_v13, %v2000_v31  ;;  %v8933_v31 = vld [vmem:[#allocation101_spill] sm:$0xff]  ;;  %v8934_v13 = vld [vmem:[#allocation102_spill] sm:$0xff] }
 0x3a1   :  { %2037 = vmatmul.mubr.bf16.vlgmr.msra.gmra.mxu0 %v2002_v3  ;;  %2080 = vmatmul.mubr.bf16.vlgmr.msra.gmra.mxu1 %v2002_v3 }
 0x3a2   :  { %2179 = vmatpush1.bf16.msra.mxu0 %v6310_v44  ;;  %2222 = vmatpush1.bf16.msra.mxu1 %v6316_v58  ;;  %v8890_v44 = vld [vmem:[#allocation10_spill] sm:$0xff]  ;;  %v8891_v58 = vld [vmem:[#allocation11_spill] sm:$0xff] }
 0x3a3   :  { %2180 = vmatprep.subr.bf16.mxu0 %v6322_v33  ;;  %2223 = vmatprep.subr.bf16.mxu1 %v6328_v1  ;;  %v8892_v33 = vld [vmem:[#allocation12_spill] sm:$0xff]  ;;  %v8893_v1 = vld [vmem:[#allocation13_spill] sm:$0xff] }
 0x3a4   :  { %2210 = vmatprep.mubr.bf16.mxu0 %v8768_v45  ;;  %2253 = vmatprep.mubr.bf16.mxu1 %v8768_v45 }
 0x3a6   :  { %2181 = vmatpush1.bf16.msra.mxu0 %v6336_v48  ;;  %2224 = vmatpush1.bf16.msra.mxu1 %v6342_v56  ;;  %v8894_v48 = vld [vmem:[#allocation14_spill] sm:$0xff]  ;;  %v8895_v56 = vld [vmem:[#allocation15_spill] sm:$0xff] }
 0x3a7   :  { %2182 = vmatprep.subr.bf16.mxu0 %v6348_v59  ;;  %2225 = vmatprep.subr.bf16.mxu1 %v6354_v54  ;;  %v8896_v59 = vld [vmem:[#allocation16_spill] sm:$0xff]  ;;  %v8897_v54 = vld [vmem:[#allocation17_spill] sm:$0xff] }
 0x3aa   :  { %2183 = vmatpush1.bf16.msra.mxu0 %v6360_v49  ;;  %2226 = vmatpush1.bf16.msra.mxu1 %v6366_v9  ;;  %v8898_v49 = vld [vmem:[#allocation18_spill] sm:$0xff]  ;;  %v8899_v9 = vld [vmem:[#allocation19_spill] sm:$0xff] }
 0x3ab   :  { %2184 = vmatprep.subr.bf16.mxu0 %v6372_v51  ;;  %2227 = vmatprep.subr.bf16.mxu1 %v6378_v50  ;;  %v8900_v51 = vld [vmem:[#allocation20_spill] sm:$0xff]  ;;  %v8901_v50 = vld [vmem:[#allocation21_spill] sm:$0xff] }
 0x3ae   :  { %2185 = vmatpush1.bf16.msra.mxu0 %v6384_v41  ;;  %2228 = vmatpush1.bf16.msra.mxu1 %v6390_v62  ;;  %v8902_v41 = vld [vmem:[#allocation22_spill] sm:$0xff]  ;;  %v8903_v62 = vld [vmem:[#allocation23_spill] sm:$0xff] }
 0x3af   :  { %2186 = vmatprep.subr.bf16.mxu0 %v6396_v34  ;;  %2229 = vmatprep.subr.bf16.mxu1 %v6402_v43  ;;  %v8904_v34 = vld [vmem:[#allocation24_spill] sm:$0xff]  ;;  %v8905_v43 = vld [vmem:[#allocation25_spill] sm:$0xff] }
 0x3b2   :  { %2187 = vmatpush1.bf16.msra.mxu0 %v6408_v47  ;;  %2230 = vmatpush1.bf16.msra.mxu1 %v6414_v39  ;;  %v8906_v47 = vld [vmem:[#allocation26_spill] sm:$0xff]  ;;  %v8907_v39 = vld [vmem:[#allocation27_spill] sm:$0xff] }
 0x3b3   :  { %2188 = vmatprep.subr.bf16.mxu0 %v6420_v53  ;;  %2231 = vmatprep.subr.bf16.mxu1 %v6426_v7  ;;  %v8908_v53 = vld [vmem:[#allocation28_spill] sm:$0xff]  ;;  %v8909_v7 = vld [vmem:[#allocation29_spill] sm:$0xff] }
 0x3b6   :  { %2189 = vmatpush1.bf16.msra.mxu0 %v6432_v52  ;;  %2232 = vmatpush1.bf16.msra.mxu1 %v6438_v57  ;;  %v8910_v52 = vld [vmem:[#allocation30_spill] sm:$0xff]  ;;  %v8911_v57 = vld [vmem:[#allocation31_spill] sm:$0xff] }
 0x3b7   :  { %2190 = vmatprep.subr.bf16.mxu0 %v6444_v8  ;;  %2233 = vmatprep.subr.bf16.mxu1 %v6608_v42  ;;  %v8912_v8 = vld [vmem:[#allocation32_spill] sm:$0xff] }
 0x3ba   :  { %2191 = vmatpush1.bf16.msra.mxu0 %v6451_v38  ;;  %2234 = vmatpush1.bf16.msra.mxu1 %v6615_v11  ;;  %v8889_v38 = vld [vmem:[#allocation9_spill] sm:$0xff] }
 0x3bb   :  { %2192 = vmatprep.subr.bf16.mxu0 %v6621_v17  ;;  %2235 = vmatprep.subr.bf16.mxu1 %v6627_v18 }
 0x3be   :  { %2193 = vmatpush1.bf16.msra.mxu0 %v6633_v19  ;;  %2236 = vmatpush1.bf16.msra.mxu1 %v6639_v20 }
 0x3bf   :  { %2322 = vmatprep.subr.bf16.mxu0 %v6645_v22  ;;  %2365 = vmatprep.subr.bf16.mxu1 %v6651_v23 }
 0x3c1   :  { %2211 = vmatmul.mubr.bf16.vlgmr.msra.gmra.mxu0 %v2002_v3  ;;  %2254 = vmatmul.mubr.bf16.vlgmr.msra.gmra.mxu1 %v2002_v3  ;;  %v8935_v3 = vld [vmem:[#allocation103_spill] sm:$0xff] }
 0x3c2   :  { %2323 = vmatpush1.bf16.msra.mxu0 %v6657_v24  ;;  %2366 = vmatpush1.bf16.msra.mxu1 %v6663_v25 }
 0x3c3   :  { %2324 = vmatprep.subr.bf16.mxu0 %v6669_v26  ;;  %2367 = vmatprep.subr.bf16.mxu1 %v6675_v28 }
 0x3c6   :  { %2325 = vmatpush1.bf16.msra.mxu0 %v8889_v38  ;;  %2368 = vmatpush1.bf16.msra.mxu1 %v8890_v44 }
 0x3c7   :  { %2326 = vmatprep.subr.bf16.mxu0 %v8891_v58  ;;  %2369 = vmatprep.subr.bf16.mxu1 %v8892_v33 }
 0x3ca   :  { %2327 = vmatpush1.bf16.msra.mxu0 %v8893_v1  ;;  %2370 = vmatpush1.bf16.msra.mxu1 %v8894_v48 }
 0x3cb   :  { %2328 = vmatprep.subr.bf16.mxu0 %v8895_v56  ;;  %2371 = vmatprep.subr.bf16.mxu1 %v8896_v59 }
 0x3ce   :  { %2329 = vmatpush1.bf16.msra.mxu0 %v8897_v54  ;;  %2372 = vmatpush1.bf16.msra.mxu1 %v8898_v49 }
 0x3cf   :  { %2330 = vmatprep.subr.bf16.mxu0 %v8899_v9  ;;  %2373 = vmatprep.subr.bf16.mxu1 %v8900_v51 }
 0x3d2   :  { %2331 = vmatpush1.bf16.msra.mxu0 %v8901_v50  ;;  %2374 = vmatpush1.bf16.msra.mxu1 %v8902_v41 }
 0x3d3   :  { %2332 = vmatprep.subr.bf16.mxu0 %v8903_v62  ;;  %2375 = vmatprep.subr.bf16.mxu1 %v8904_v34 }
 0x3d6   :  { %2333 = vmatpush1.bf16.msra.mxu0 %v8905_v43  ;;  %2376 = vmatpush1.bf16.msra.mxu1 %v8906_v47 }
 0x3d7   :  { %2334 = vmatprep.subr.bf16.mxu0 %v8907_v39  ;;  %2377 = vmatprep.subr.bf16.mxu1 %v8908_v53 }
 0x3da   :  { %2335 = vmatpush1.bf16.msra.mxu0 %v8909_v7  ;;  %2378 = vmatpush1.bf16.msra.mxu1 %v8910_v52 }
 0x3db   :  { %2336 = vmatprep.subr.bf16.mxu0 %v8911_v57  ;;  %2379 = vmatprep.subr.bf16.mxu1 %v8912_v8 }
 0x3de   :  { %2337 = vmatpush1.bf16.msra.mxu0 %v8913_v2  ;;  %2380 = vmatpush1.bf16.msra.mxu1 %v8914_v55 }
 0x3df   :  { %2338 = vmatprep.subr.bf16.mxu0 %v8915_v40  ;;  %2381 = vmatprep.subr.bf16.mxu1 %v8916_v63 }
 0x3e2   :  { %2339 = vmatpush2.bf16.msra.mxu0 %v8917_v6  ;;  %2382 = vmatpush2.bf16.msra.mxu1 %v8918_v37 }
 0x3e3   :  { %2340 = vmatprep.subr.bf16.mxu0 %v8919_v21  ;;  %2383 = vmatprep.subr.bf16.mxu1 %v8920_v30 }
 0x3e6   :  { %2341 = vmatpush2.bf16.msra.mxu0 %v8921_v60  ;;  %2384 = vmatpush2.bf16.msra.mxu1 %v8922_v10  ;;  %v8950_v10 = vld [vmem:[#allocation6_spill] sm:$0xff] }
 0x3e7   :  { %2342 = vmatprep.subr.bf16.mxu0 %v8923_v0  ;;  %2385 = vmatprep.subr.bf16.mxu1 %v8924_v14 }
 0x3ea   :  { %2343 = vmatpush2.bf16.msra.mxu0 %v8925_v16  ;;  %2386 = vmatpush2.bf16.msra.mxu1 %v8926_v46  ;;  %v8936_v16 = vld [vmem:[#allocation104_spill] sm:$0xff]  ;;  %v8937_v46 = vld [vmem:[#allocation105_spill] sm:$0xff] }
 0x3eb   :  { %2344 = vmatprep.subr.bf16.mxu0 %v8927_v4  ;;  %2387 = vmatprep.subr.bf16.mxu1 %v8928_v61  ;;  %v8938_v4 = vld [vmem:[#allocation106_spill] sm:$0xff]  ;;  %v8939_v61 = vld [vmem:[#allocation107_spill] sm:$0xff] }
 0x3ee   :  { %2345 = vmatpush2.bf16.msra.mxu0 %v8929_v15  ;;  %2388 = vmatpush2.bf16.msra.mxu1 %v8930_v35  ;;  %v8940_v15 = vld [vmem:[#allocation108_spill] sm:$0xff]  ;;  %v8941_v35 = vld [vmem:[#allocation109_spill] sm:$0xff] }
 0x3ef   :  { %2346 = vmatprep.subr.bf16.mxu0 %v8931_v12  ;;  %2389 = vmatprep.subr.bf16.mxu1 %v8932_v32  ;;  %v8942_v12 = vld [vmem:[#allocation110_spill] sm:$0xff]  ;;  %v8943_v32 = vld [vmem:[#allocation111_spill] sm:$0xff] }
 0x3f2   :  { %2347 = vmatpush2.bf16.msra.mxu0 %v8933_v31  ;;  %2390 = vmatpush2.bf16.msra.mxu1 %v8934_v13  ;;  %v8944_v31 = vld [vmem:[#allocation112_spill] sm:$0xff]  ;;  %v8945_v13 = vld [vmem:[#allocation113_spill] sm:$0xff] }
 0x3f3   :  { %2348 = vmatprep.subr.bf16.mxu0 %v8935_v3  ;;  %2391 = vmatprep.subr.bf16.mxu1 %v8936_v16  ;;  %v8946_v3 = vld [vmem:[#allocation114_spill] sm:$0xff]  ;;  %v8947_v16 = vld [vmem:[#allocation3_spill] sm:$0xff] }
 0x3f6   :  { %2349 = vmatpush2.bf16.msra.mxu0 %v8937_v46  ;;  %2392 = vmatpush2.bf16.msra.mxu1 %v8938_v4  ;;  %v8948_v46 = vld [vmem:[#allocation4_spill] sm:$0xff] }
 0x3f7   :  { %2350 = vmatprep.subr.bf16.mxu0 %v8939_v61  ;;  %2393 = vmatprep.subr.bf16.mxu1 %v8940_v15  ;;  %v8949_v61 = vld [vmem:[#allocation5_spill] sm:$0xff] }
 0x3fa   :  { %2351 = vmatpush2.bf16.msra.mxu0 %v8941_v35  ;;  %2394 = vmatpush2.bf16.msra.mxu1 %v8942_v12 }
 0x3fb   :  { %2352 = vmatprep.subr.bf16.mxu0 %v8943_v32  ;;  %2395 = vmatprep.subr.bf16.mxu1 %v8944_v31 }
 0x3fe   :  { %2353 = vmatpush2.bf16.msra.mxu0 %v8945_v13  ;;  %2396 = vmatpush2.bf16.msra.mxu1 %v8946_v3 }
 0x3ff   :  { %2496 = vmatprep.subr.bf16.mxu0 %v8947_v16  ;;  %2539 = vmatprep.subr.bf16.mxu1 %v8948_v46 }
 0x461   :  { %v2038_v4 = vpop.f32.mrf.mxu0  ;;  %v2081_v15 = vpop.f32.mrf.mxu1 }
 0x462   :  { %v2039_v14 = vadd.f32 %v2038_v4, %v8949_v61  ;;  %v8951_v4 = vld [vmem:[#allocation7_spill] sm:$0xff] }
 0x463   :  { %v2040_v0 = vpop.f32.mrf.mxu0  ;;  %v2083_v31 = vpop.f32.mrf.mxu1  ;;  %v2082_v37 = vadd.f32 %v2081_v15, %v8951_v4 }
 0x464   :  { %v4245_v35 = vmul.f32 -1.442695, %v2039_v14  ;;  %v2041_v12 = vadd.f32 %v2040_v0, %v8950_v10 }
 0x465   :  { %v2042_v60 = vpop.f32.mrf.mxu0  ;;  %v2085_v46 = vpop.f32.mrf.mxu1  ;;  %v4247_v0 = vmul.f32 -1.442695, %v2082_v37 }
 0x466   :  { %4818 = vpow2.f32 %v4245_v35  ;;  %v4246_v32 = vmul.f32 -1.442695, %v2041_v12  ;;  %v2043_v13 = vadd.f32 %v2042_v60, %v8949_v61  ;;  %v2086_v14 = vadd.f32 %v2085_v46, %v8951_v4  ;;  %v8952_v12 = vld [vmem:[#allocation8_spill] sm:$0xff]  ;;  %v8954_v4 = vld [vmem:[#allocation61_spill] sm:$0xff] }
 0x467   :  { %v2044_v30 = vpop.f32.mrf.mxu0  ;;  %v2084_v63 = vadd.f32 %v2083_v31, %v8952_v12  ;;  %v2087_v60 = vpop.f32.mrf.mxu1 }
 0x468   :  { %4820 = vpow2.f32 %v4246_v32  ;;  %v4248_v3 = vmul.f32 -1.442695, %v2043_v13  ;;  %v2045_v16 = vadd.f32 %v2044_v30, %v8950_v10  ;;  %v4250_v6 = vmul.f32 -1.442695, %v2086_v14  ;;  %v8953_v14 = vld [vmem:[#allocation59_spill] sm:$0xff] }
 0x46a   :  { %4822 = vpow2.f32 %v4248_v3  ;;  %v4249_v21 = vmul.f32 -1.442695, %v2045_v16  ;;  %v2088_v3 = vadd.f32 %v2087_v60, %v8952_v12 }
 0x46c   :  { %4824 = vpow2.f32 %v4249_v21 }
 0x46d   :  { %4826 = vpow2.f32 %v4247_v0 }
 0x46e   :  { %4828 = vpow2.f32 %v4250_v6 }
 0x473   :  { %v4819_v35 = vpop.eup %4818 }
 0x474   :  { %v2108_v40 = vadd.f32 1.0, %v4819_v35 }
 0x475   :  { %v4821_v32 = vpop.eup %4820 }
 0x476   :  { %4830 = vrcp.f32 %v2108_v40  ;;  %v2109_v30 = vadd.f32 1.0, %v4821_v32 }
 0x477   :  { %v4823_v13 = vpop.eup %4822  ;;  %4832 = vtanh.f32 %v2084_v63 }
 0x478   :  { %4834 = vrcp.f32 %v2109_v30  ;;  %v2111_v21 = vadd.f32 1.0, %v4823_v13 }
 0x479   :  { %v4825_v15 = vpop.eup %4824 }
 0x47a   :  { %4836 = vrcp.f32 %v2111_v21  ;;  %v2112_v37 = vadd.f32 1.0, %v4825_v15  ;;  %v4827_v16 = vpop.eup %4826 }
 0x47b   :  { %4838 = vtanh.f32 %v2088_v3  ;;  %v4829_v46 = vpop.eup %4828  ;;  %v2110_v60 = vadd.f32 1.0, %v4827_v16  ;;  %v8956_v16 = vld [vmem:[#allocation65_spill] sm:$0xff] }
 0x47c   :  { %4840 = vrcp.f32 %v2112_v37  ;;  %v2113_v13 = vadd.f32 1.0, %v4829_v46  ;;  %v8955_v37 = vld [vmem:[#allocation63_spill] sm:$0xff] }
 0x481   :  { %v2212_v31 = vpop.f32.mrf.mxu0  ;;  %v2255_v3 = vpop.f32.mrf.mxu1 }
 0x482   :  { %v2264_v0 = vadd.f32 %v2212_v31, %v8953_v14 }
 0x483   :  { %v4831_v35 = vpop.eup %4830  ;;  %v2214_v6 = vpop.f32.mrf.mxu0 }
 0x484   :  { %v4833_v40 = vpop.eup %4832  ;;  %v4252_v32 = vmul.f32 -1.442695, %v2264_v0  ;;  %v2265_v63 = vadd.f32 %v2214_v6, %v8954_v4 }
 0x485   :  { %v4835_v10 = vpop.eup %4834  ;;  %v2130_v30 = vmul.f32 %v4833_v40, %v4831_v35  ;;  %v2216_v12 = vpop.f32.mrf.mxu0 }
 0x486   :  { %v2128_v21 = vmul.f32 %v4835_v10, %v7040_v29  ;;  %4842 = vpow2.f32 %v4252_v32  ;;  %v4253_v15 = vmul.f32 -1.442695, %v2265_v63  ;;  %v2268_v61 = vadd.f32 %v2216_v12, %v8955_v37  ;;  %v2257_v10 = vpop.f32.mrf.mxu1  ;;  %v8958_v63 = vld [vmem:[#allocation62_spill] sm:$0xff] }
 0x487   :  { %v4837_v55 = vpop.eup %4836  ;;  %v2218_v31 = vpop.f32.mrf.mxu0 }
 0x488   :  { %v4839_v14 = vpop.eup %4838  ;;  %v7170_v2 = vadd.f32 %v2130_v30, %v2128_v21  ;;  %4844 = vpow2.f32 %v4253_v15  ;;  %v4255_v0 = vmul.f32 -1.442695, %v2268_v61  ;;  %v2269_v35 = vadd.f32 %v2218_v31, %v8956_v16  ;;  %v2259_v40 = vpop.f32.mrf.mxu1  ;;  %v8957_v61 = vld [vmem:[#allocation60_spill] sm:$0xff] }
 0x489   :  { %v4841_v4 = vpop.eup %4840  ;;  %4846 = vrcp.f32 %v2110_v60  ;;  %v2131_v29 = vmul.f32 %v4839_v14, %v4837_v55  ;;  %v2266_v32 = vadd.f32 %v2255_v3, %v8957_v61  ;;  %v2267_v60 = vadd.f32 %v2257_v10, %v8958_v63  ;;  %v8959_v30 = vld [vmem:[#allocation64_spill] sm:$0xff] }
 0x48a   :  { %4848 = vrcp.f32 %v2113_v13  ;;  %v2129_v46 = vmul.f32 %v4841_v4, %v7045_v36  ;;  %v4256_v6 = vmul.f32 -1.442695, %v2269_v35  ;;  %v2270_v13 = vadd.f32 %v2259_v40, %v8959_v30  ;;  %v2261_v55 = vpop.f32.mrf.mxu1  ;;  %v8960_v4 = vld [vmem:[#allocation66_spill] sm:$0xff] }
 0x48b   :  { %4850 = vpow2.f32 %v4255_v0  ;;  %v4254_v36 = vmul.f32 -1.442695, %v2266_v32  ;;  %v2271_v16 = vadd.f32 %v2261_v55, %v8960_v4 }
 0x48c   :  { %4852 = vtanh.f32 %v7170_v2  ;;  %v7175_v12 = vadd.f32 %v2131_v29, %v2129_v46  ;;  %v4257_v31 = vmul.f32 -1.442695, %v2270_v13 }
 0x48d   :  { %4854 = vpow2.f32 %v4256_v6 }
 0x48e   :  { %4856 = vtanh.f32 %v7175_v12 }
 0x48f   :  { %4858 = vtanh.f32 %v2267_v60 }
 0x493   :  { %v4843_v21 = vpop.eup %4842 }
 0x494   :  { %v2290_v15 = vadd.f32 1.0, %v4843_v21 }
 0x495   :  { %v4845_v37 = vpop.eup %4844 }
 0x496   :  { %v4847_v14 = vpop.eup %4846  ;;  %4860 = vrcp.f32 %v2290_v15  ;;  %v2291_v0 = vadd.f32 1.0, %v4845_v37 }
 0x497   :  { %v4849_v35 = vpop.eup %4848  ;;  %4862 = vpow2.f32 %v4254_v36 }
 0x498   :  { %v4851_v46 = vpop.eup %4850  ;;  %4864 = vrcp.f32 %v2291_v0 }
 0x499   :  { %v4853_v3 = vpop.eup %4852  ;;  %v2293_v29 = vadd.f32 1.0, %v4851_v46  ;;  %4866 = vpow2.f32 %v4257_v31 }
 0x49a   :  { %v4855_v10 = vpop.eup %4854  ;;  %4868 = vtanh.f32 %v2271_v16  ;;  %v2136_v61 = vmul.f32 %v4853_v3, %v4847_v14 }
 0x49b   :  { %v4857_v6 = vpop.eup %4856  ;;  %4870 = vrcp.f32 %v2293_v29  ;;  %v2294_v40 = vadd.f32 1.0, %v4855_v10 }
 0x49c   :  { %v2137_v32 = vmul.f32 %v4857_v6, %v4849_v35  ;;  %v4859_v60 = vpop.eup %4858 }
 0x49d   :  { %4872 = vrcp.f32 %v2294_v40 }
 0x49e   :  { %v2321_v63 = vpack.c.bf16 %v2137_v32, %v2136_v61 }
 0x4a0   :  { %2354 = vmatprep.mubr.bf16.mxu0 %v2321_v63  ;;  %2397 = vmatprep.mubr.bf16.mxu1 %v2321_v63  ;;  %v7199_v63 = vld [vmem:[%s8359_s3 + $0xe8] ss:$16 sps:$4 sm:$0xff]  }
 0x4a3   :  { %v4861_v30 = vpop.eup %4860 }
 0x4a4   :  { %v4863_v13 = vpop.eup %4862  ;;  %v2312_v21 = vmul.f32 %v4861_v30, %v4859_v60  ;;  %v7205_v60 = vld [vmem:[%s8359_s3 + $0xc4] ss:$16 sps:$4 sm:$0xff]   ;;  %v7211_v30 = vld [vmem:[%s8359_s3 + $0xcc] ss:$16 sps:$4 sm:$0xff]  }
 0x4a5   :  { %v4865_v36 = vpop.eup %4864  ;;  %v2292_v0 = vadd.f32 1.0, %v4863_v13  ;;  %v7219_v13 = vld [vmem:[%s8359_s3 + $0xc0] ss:$16 sps:$4 sm:$0xff]  }
 0x4a6   :  { %v4867_v55 = vpop.eup %4866  ;;  %v2310_v15 = vmul.f32 %v4865_v36, %v7053_v27  ;;  %v7231_v36 = vld [vmem:[%s8359_s3 + $0xa4] ss:$16 sps:$4 sm:$0xff]  }
 0x4a7   :  { %v4869_v37 = vpop.eup %4868  ;;  %v2295_v35 = vadd.f32 1.0, %v4867_v55  ;;  %4874 = vrcp.f32 %v2292_v0  ;;  %v7237_v55 = vld [vmem:[%s8359_s3 + $0xac] ss:$16 sps:$4 sm:$0xff]  }
 0x4a8   :  { %v4871_v31 = vpop.eup %4870  ;;  %v7183_v4 = vadd.f32 %v2312_v21, %v2310_v15  ;;  %v7225_v21 = vld [vmem:[%s8359_s3 + $0xc8] ss:$16 sps:$4 sm:$0xff]   ;;  %v7243_v15 = vld [vmem:[%s8359_s3 + $0xa0] ss:$16 sps:$4 sm:$0xff]   ;;  %v7261_v0 = vld [vmem:[%s8359_s3 + $0x8c] ss:$16 sps:$4 sm:$0xff]  }
 0x4a9   :  { %v2313_v16 = vmul.f32 %v4871_v31, %v4869_v37  ;;  %v7249_v37 = vld [vmem:[%s8359_s3 + $0xa8] ss:$16 sps:$4 sm:$0xff]   ;;  %v7255_v31 = vld [vmem:[%s8359_s3 + $0x84] ss:$16 sps:$4 sm:$0xff]  }
 0x4aa   :  { %v4873_v14 = vpop.eup %4872  ;;  %4876 = vtanh.f32 %v7183_v4 }
 0x4ab   :  { %v2311_v46 = vmul.f32 %v4873_v14, %v7057_v5  ;;  %4878 = vrcp.f32 %v2295_v35  ;;  %v7193_v5 = vld [vmem:[%s8359_s3 + $0xe0] ss:$16 sps:$4 sm:$0xff]   ;;  %v7273_v14 = vld [vmem:[%s8359_s3 + $0x88] ss:$16 sps:$4 sm:$0xff]   ;;  %v7279_v35 = vld [vmem:[%s8359_s3 + $0x64] ss:$16 sps:$4 sm:$0xff]  }
 0x4ad   :  { %v7187_v3 = vadd.f32 %v2313_v16, %v2311_v46  ;;  %v7267_v16 = vld [vmem:[%s8359_s3 + $0x80] ss:$16 sps:$4 sm:$0xff]   ;;  %v7285_v46 = vld [vmem:[%s8359_s3 + $0x6c] ss:$16 sps:$4 sm:$0xff]  }
 0x4af   :  { %4880 = vtanh.f32 %v7187_v3 }
 0x4b4   :  { %v4875_v29 = vpop.eup %4874 }
 0x4b7   :  { %v4877_v27 = vpop.eup %4876 }
 0x4b8   :  { %v4879_v10 = vpop.eup %4878  ;;  %v2318_v40 = vmul.f32 %v4877_v27, %v4875_v29  ;;  %v7291_v29 = vld [vmem:[%s8359_s3 + $0x60] ss:$16 sps:$4 sm:$0xff]   ;;  %v7297_v27 = vld [vmem:[%s8359_s3 + $0x68] ss:$16 sps:$4 sm:$0xff]  }
 0x4bc   :  { %v4881_v6 = vpop.eup %4880 }
 0x4bd   :  { %v2319_v61 = vmul.f32 %v4881_v6, %v4879_v10  ;;  %v7303_v10 = vld [vmem:[%s8359_s3 + $0x44] ss:$16 sps:$4 sm:$0xff]   ;;  %v7309_v6 = vld [vmem:[%s8359_s3 + $0x4c] ss:$16 sps:$4 sm:$0xff]  }
 0x4be   :  { %8961 = vst [vmem:[#allocation51_spill] sm:$0xff] %v7303_v10 }
 0x4bf   :  { %v2320_v32 = vpack.c.bf16 %v2319_v61, %v2318_v40  ;;  %v7315_v40 = vld [vmem:[%s8359_s3 + $0x40] ss:$16 sps:$4 sm:$0xff]   ;;  %v7321_v61 = vld [vmem:[%s8359_s3 + $0x48] ss:$16 sps:$4 sm:$0xff]  }
 0x4c0   :  { %8962 = vst [vmem:[#allocation53_spill] sm:$0xff] %v7315_v40 }
 0x4c1   :  { %2355 = vmatmul.mubr.bf16.vlgmr.msra.gmra.mxu0 %v2320_v32  ;;  %2398 = vmatmul.mubr.bf16.vlgmr.msra.gmra.mxu1 %v2320_v32 }
 0x4c2   :  { %2497 = vmatpush1.bf16.msra.mxu0 %v7193_v5  ;;  %2540 = vmatpush1.bf16.msra.mxu1 %v7199_v63 }
 0x4c3   :  { %2498 = vmatprep.subr.bf16.mxu0 %v7205_v60  ;;  %2541 = vmatprep.subr.bf16.mxu1 %v7211_v30 }
 0x4c4   :  { %2528 = vmatprep.mubr.bf16.mxu0 %v8768_v45  ;;  %2571 = vmatprep.mubr.bf16.mxu1 %v8768_v45 }
 0x4c6   :  { %2499 = vmatpush1.bf16.msra.mxu0 %v7219_v13  ;;  %2542 = vmatpush1.bf16.msra.mxu1 %v7225_v21 }
 0x4c7   :  { %2500 = vmatprep.subr.bf16.mxu0 %v7231_v36  ;;  %2543 = vmatprep.subr.bf16.mxu1 %v7237_v55 }
 0x4ca   :  { %2501 = vmatpush1.bf16.msra.mxu0 %v7243_v15  ;;  %2544 = vmatpush1.bf16.msra.mxu1 %v7249_v37 }
 0x4cb   :  { %2502 = vmatprep.subr.bf16.mxu0 %v7255_v31  ;;  %2545 = vmatprep.subr.bf16.mxu1 %v7261_v0 }
 0x4ce   :  { %2503 = vmatpush1.bf16.msra.mxu0 %v7267_v16  ;;  %2546 = vmatpush1.bf16.msra.mxu1 %v7273_v14 }
 0x4cf   :  { %2504 = vmatprep.subr.bf16.mxu0 %v7279_v35  ;;  %2547 = vmatprep.subr.bf16.mxu1 %v7285_v46 }
 0x4d2   :  { %2505 = vmatpush1.bf16.msra.mxu0 %v7291_v29  ;;  %2548 = vmatpush1.bf16.msra.mxu1 %v7297_v27 }
 0x4d3   :  { %2506 = vmatprep.subr.bf16.mxu0 %v7303_v10  ;;  %2549 = vmatprep.subr.bf16.mxu1 %v7309_v6  ;;  %v7327_v10 = vld [vmem:[%s8359_s3 + $0x24] ss:$16 sps:$4 sm:$0xff]  }
 0x4d6   :  { %2507 = vmatpush1.bf16.msra.mxu0 %v7315_v40  ;;  %2550 = vmatpush1.bf16.msra.mxu1 %v7321_v61  ;;  %v7334_v40 = vld [vmem:[%s8359_s3 + $0x20] ss:$16 sps:$4 sm:$0xff]  }
 0x4d7   :  { %2508 = vmatprep.subr.bf16.mxu0 %v7327_v10  ;;  %2551 = vmatprep.subr.bf16.mxu1 %v6608_v42  ;;  %v8963_v42 = vld [vmem:[#allocation33_spill] sm:$0xff] }
 0x4da   :  { %2509 = vmatpush1.bf16.msra.mxu0 %v7334_v40  ;;  %2552 = vmatpush1.bf16.msra.mxu1 %v6615_v11  ;;  %v8964_v11 = vld [vmem:[#allocation34_spill] sm:$0xff] }
 0x4db   :  { %2510 = vmatprep.subr.bf16.mxu0 %v6621_v17  ;;  %2553 = vmatprep.subr.bf16.mxu1 %v6627_v18  ;;  %v8965_v17 = vld [vmem:[#allocation35_spill] sm:$0xff]  ;;  %v8966_v18 = vld [vmem:[#allocation36_spill] sm:$0xff] }
 0x4de   :  { %2511 = vmatpush1.bf16.msra.mxu0 %v6633_v19  ;;  %2554 = vmatpush1.bf16.msra.mxu1 %v6639_v20  ;;  %v8967_v19 = vld [vmem:[#allocation37_spill] sm:$0xff]  ;;  %v8968_v20 = vld [vmem:[#allocation38_spill] sm:$0xff] }
 0x4df   :  { %2640 = vmatprep.subr.bf16.mxu0 %v6645_v22  ;;  %2683 = vmatprep.subr.bf16.mxu1 %v6651_v23  ;;  %v8969_v22 = vld [vmem:[#allocation39_spill] sm:$0xff]  ;;  %v8970_v23 = vld [vmem:[#allocation40_spill] sm:$0xff] }
 0x4e1   :  { %2529 = vmatmul.mubr.bf16.vlgmr.msra.gmra.mxu0 %v2320_v32  ;;  %2572 = vmatmul.mubr.bf16.vlgmr.msra.gmra.mxu1 %v2320_v32 }
 0x4e2   :  { %2641 = vmatpush1.bf16.msra.mxu0 %v6657_v24  ;;  %2684 = vmatpush1.bf16.msra.mxu1 %v6663_v25  ;;  %v8971_v24 = vld [vmem:[#allocation41_spill] sm:$0xff]  ;;  %v8972_v25 = vld [vmem:[#allocation42_spill] sm:$0xff] }
 0x4e3   :  { %2642 = vmatprep.subr.bf16.mxu0 %v6669_v26  ;;  %2685 = vmatprep.subr.bf16.mxu1 %v6675_v28  ;;  %v8973_v26 = vld [vmem:[#allocation43_spill] sm:$0xff]  ;;  %v8974_v28 = vld [vmem:[#allocation45_spill] sm:$0xff] }
 0x4e6   :  { %2643 = vmatpush1.bf16.msra.mxu0 %v8889_v38  ;;  %2686 = vmatpush1.bf16.msra.mxu1 %v8890_v44  ;;  %v8975_v38 = vld [vmem:[#allocation47_spill] sm:$0xff]  ;;  %v8976_v44 = vld [vmem:[#allocation49_spill] sm:$0xff] }
 0x4e7   :  { %2644 = vmatprep.subr.bf16.mxu0 %v8891_v58  ;;  %2687 = vmatprep.subr.bf16.mxu1 %v8892_v33  ;;  %v8977_v58 = vld [vmem:[#allocation44_spill] sm:$0xff]  ;;  %v8978_v33 = vld [vmem:[#allocation46_spill] sm:$0xff] }
 0x4ea   :  { %2645 = vmatpush1.bf16.msra.mxu0 %v8893_v1  ;;  %2688 = vmatpush1.bf16.msra.mxu1 %v8894_v48  ;;  %v8979_v1 = vld [vmem:[#allocation48_spill] sm:$0xff]  ;;  %v8980_v48 = vld [vmem:[#allocation50_spill] sm:$0xff] }
 0x4eb   :  { %2646 = vmatprep.subr.bf16.mxu0 %v8895_v56  ;;  %2689 = vmatprep.subr.bf16.mxu1 %v8896_v59  ;;  %v8981_v56 = vld [vmem:[#allocation99_spill] sm:$0xff]  ;;  %v8982_v59 = vld [vmem:[#allocation100_spill] sm:$0xff] }
 0x4ee   :  { %2647 = vmatpush1.bf16.msra.mxu0 %v8897_v54  ;;  %2690 = vmatpush1.bf16.msra.mxu1 %v8898_v49  ;;  %v8983_v54 = vld [vmem:[#allocation101_spill] sm:$0xff]  ;;  %v8984_v49 = vld [vmem:[#allocation102_spill] sm:$0xff] }
 0x4ef   :  { %2648 = vmatprep.subr.bf16.mxu0 %v8899_v9  ;;  %2691 = vmatprep.subr.bf16.mxu1 %v8900_v51  ;;  %v8985_v9 = vld [vmem:[#allocation103_spill] sm:$0xff]  ;;  %v8986_v51 = vld [vmem:[#allocation104_spill] sm:$0xff] }
 0x4f2   :  { %2649 = vmatpush1.bf16.msra.mxu0 %v8901_v50  ;;  %2692 = vmatpush1.bf16.msra.mxu1 %v8902_v41  ;;  %v8987_v50 = vld [vmem:[#allocation105_spill] sm:$0xff]  ;;  %v8988_v41 = vld [vmem:[#allocation106_spill] sm:$0xff] }
 0x4f3   :  { %2650 = vmatprep.subr.bf16.mxu0 %v8903_v62  ;;  %2693 = vmatprep.subr.bf16.mxu1 %v8904_v34  ;;  %v8989_v62 = vld [vmem:[#allocation107_spill] sm:$0xff]  ;;  %v8990_v34 = vld [vmem:[#allocation108_spill] sm:$0xff] }
 0x4f6   :  { %2651 = vmatpush1.bf16.msra.mxu0 %v8905_v43  ;;  %2694 = vmatpush1.bf16.msra.mxu1 %v8906_v47  ;;  %v8991_v43 = vld [vmem:[#allocation109_spill] sm:$0xff]  ;;  %v8992_v47 = vld [vmem:[#allocation110_spill] sm:$0xff] }
 0x4f7   :  { %2652 = vmatprep.subr.bf16.mxu0 %v8907_v39  ;;  %2695 = vmatprep.subr.bf16.mxu1 %v8908_v53  ;;  %v8993_v39 = vld [vmem:[#allocation111_spill] sm:$0xff]  ;;  %v8994_v53 = vld [vmem:[#allocation112_spill] sm:$0xff] }
 0x4fa   :  { %2653 = vmatpush1.bf16.msra.mxu0 %v8909_v7  ;;  %2696 = vmatpush1.bf16.msra.mxu1 %v8910_v52  ;;  %v8995_v7 = vld [vmem:[#allocation113_spill] sm:$0xff]  ;;  %v8996_v52 = vld [vmem:[#allocation114_spill] sm:$0xff] }
 0x4fb   :  { %2654 = vmatprep.subr.bf16.mxu0 %v8911_v57  ;;  %2697 = vmatprep.subr.bf16.mxu1 %v8912_v8  ;;  %v7409_v57 = vld [vmem:[%s8359_s3 + $0xe4] ss:$16 sps:$4 sm:$0xff]   ;;  %v7415_v8 = vld [vmem:[%s8359_s3 + $0xec] ss:$16 sps:$4 sm:$0xff]  }
 0x4fc   :  { %8997 = vst [vmem:[#allocation55_spill] sm:$0xff] %v7409_v57  ;;  %8998 = vst [vmem:[#allocation57_spill] sm:$0xff] %v7415_v8 }
 0x4fe   :  { %2655 = vmatpush1.bf16.msra.mxu0 %v8963_v42  ;;  %2698 = vmatpush1.bf16.msra.mxu1 %v8964_v11  ;;  %v8999_v42 = vld [vmem:[#allocation5_spill] sm:$0xff] }
 0x4ff   :  { %2656 = vmatprep.subr.bf16.mxu0 %v8965_v17  ;;  %2699 = vmatprep.subr.bf16.mxu1 %v8966_v18 }
 0x502   :  { %2657 = vmatpush2.bf16.msra.mxu0 %v8967_v19  ;;  %2700 = vmatpush2.bf16.msra.mxu1 %v8968_v20  ;;  %v9000_v20 = vld [vmem:[#allocation6_spill] sm:$0xff] }
 0x503   :  { %2658 = vmatprep.subr.bf16.mxu0 %v8969_v22  ;;  %2701 = vmatprep.subr.bf16.mxu1 %v8970_v23 }
 0x506   :  { %2659 = vmatpush2.bf16.msra.mxu0 %v8971_v24  ;;  %2702 = vmatpush2.bf16.msra.mxu1 %v8972_v25 }
 0x507   :  { %2660 = vmatprep.subr.bf16.mxu0 %v8973_v26  ;;  %2703 = vmatprep.subr.bf16.mxu1 %v8974_v28 }
 0x50a   :  { %2661 = vmatpush2.bf16.msra.mxu0 %v8975_v38  ;;  %2704 = vmatpush2.bf16.msra.mxu1 %v8976_v44 }
 0x50b   :  { %2662 = vmatprep.subr.bf16.mxu0 %v8977_v58  ;;  %2705 = vmatprep.subr.bf16.mxu1 %v8978_v33 }
 0x50e   :  { %2663 = vmatpush2.bf16.msra.mxu0 %v8979_v1  ;;  %2706 = vmatpush2.bf16.msra.mxu1 %v8980_v48  ;;  %v9001_v1 = vld [vmem:[#allocation7_spill] sm:$0xff] }
 0x50f   :  { %2664 = vmatprep.subr.bf16.mxu0 %v8981_v56  ;;  %2707 = vmatprep.subr.bf16.mxu1 %v8982_v59 }
 0x512   :  { %2665 = vmatpush2.bf16.msra.mxu0 %v8983_v54  ;;  %2708 = vmatpush2.bf16.msra.mxu1 %v8984_v49 }
 0x513   :  { %2666 = vmatprep.subr.bf16.mxu0 %v8985_v9  ;;  %2709 = vmatprep.subr.bf16.mxu1 %v8986_v51  ;;  %v9002_v9 = vld [vmem:[#allocation8_spill] sm:$0xff] }
 0x516   :  { %2667 = vmatpush2.bf16.msra.mxu0 %v8987_v50  ;;  %2710 = vmatpush2.bf16.msra.mxu1 %v8988_v41 }
 0x517   :  { %2668 = vmatprep.subr.bf16.mxu0 %v8989_v62  ;;  %2711 = vmatprep.subr.bf16.mxu1 %v8990_v34 }
 0x51a   :  { %2669 = vmatpush2.bf16.msra.mxu0 %v8991_v43  ;;  %2712 = vmatpush2.bf16.msra.mxu1 %v8992_v47 }
 0x51b   :  { %2670 = vmatprep.subr.bf16.mxu0 %v8993_v39  ;;  %2713 = vmatprep.subr.bf16.mxu1 %v8994_v53 }
 0x51e   :  { %2671 = vmatpush2.bf16.msra.mxu0 %v8995_v7  ;;  %2714 = vmatpush2.bf16.msra.mxu1 %v8996_v52 }
 0x51f   :  { %2814 = vmatprep.subr.bf16.mxu0 %v7409_v57  ;;  %2857 = vmatprep.subr.bf16.mxu1 %v7415_v8 }
 0x581   :  { %v2356_v32 = vpop.f32.mrf.mxu0  ;;  %v2399_v17 = vpop.f32.mrf.mxu1 }
 0x582   :  { %v2357_v11 = vadd.f32 %v2356_v32, %v8999_v42  ;;  %v2400_v48 = vadd.f32 %v2399_v17, %v9001_v1  ;;  %v9003_v17 = vld [vmem:[#allocation67_spill] sm:$0xff] }
 0x583   :  { %v2358_v18 = vpop.f32.mrf.mxu0  ;;  %v2401_v25 = vpop.f32.mrf.mxu1 }
 0x584   :  { %v4258_v19 = vmul.f32 -1.442695, %v2357_v11  ;;  %v2359_v22 = vadd.f32 %v2358_v18, %v9000_v20  ;;  %v4260_v59 = vmul.f32 -1.442695, %v2400_v48  ;;  %v2402_v51 = vadd.f32 %v2401_v25, %v9002_v9  ;;  %v9004_v25 = vld [vmem:[#allocation69_spill] sm:$0xff] }
 0x585   :  { %v2360_v23 = vpop.f32.mrf.mxu0  ;;  %v2403_v58 = vpop.f32.mrf.mxu1 }
 0x586   :  { %4882 = vpow2.f32 %v4258_v19  ;;  %v4259_v24 = vmul.f32 -1.442695, %v2359_v22  ;;  %v2361_v26 = vadd.f32 %v2360_v23, %v8999_v42  ;;  %v2404_v56 = vadd.f32 %v2403_v58, %v9001_v1 }
 0x587   :  { %v2362_v28 = vpop.f32.mrf.mxu0  ;;  %v2405_v41 = vpop.f32.mrf.mxu1 }
 0x588   :  { %4884 = vpow2.f32 %v4259_v24  ;;  %v4261_v38 = vmul.f32 -1.442695, %v2361_v26  ;;  %v2363_v44 = vadd.f32 %v2362_v28, %v9000_v20  ;;  %v4263_v54 = vmul.f32 -1.442695, %v2404_v56 }
 0x589   :  { %v2406_v47 = vadd.f32 %v2405_v41, %v9002_v9 }
 0x58a   :  { %4886 = vpow2.f32 %v4261_v38  ;;  %v4262_v33 = vmul.f32 -1.442695, %v2363_v44 }
 0x58c   :  { %4888 = vpow2.f32 %v4262_v33 }
 0x58d   :  { %4890 = vpow2.f32 %v4260_v59 }
 0x58e   :  { %4892 = vpow2.f32 %v4263_v54  ;;  %v9005_v54 = vld [vmem:[#allocation71_spill] sm:$0xff] }
 0x593   :  { %v4883_v49 = vpop.eup %4882 }
 0x594   :  { %v2426_v50 = vadd.f32 1.0, %v4883_v49 }
 0x595   :  { %v4885_v62 = vpop.eup %4884 }
 0x596   :  { %4894 = vrcp.f32 %v2426_v50  ;;  %v2427_v34 = vadd.f32 1.0, %v4885_v62 }
 0x597   :  { %v4887_v43 = vpop.eup %4886  ;;  %4896 = vtanh.f32 %v2402_v51 }
 0x598   :  { %4898 = vrcp.f32 %v2427_v34  ;;  %v2429_v39 = vadd.f32 1.0, %v4887_v43 }
 0x599   :  { %v4889_v53 = vpop.eup %4888 }
 0x59a   :  { %4900 = vrcp.f32 %v2429_v39  ;;  %v2430_v7 = vadd.f32 1.0, %v4889_v53  ;;  %v4891_v52 = vpop.eup %4890 }
 0x59b   :  { %4902 = vtanh.f32 %v2406_v47  ;;  %v4893_v11 = vpop.eup %4892  ;;  %v2428_v38 = vadd.f32 1.0, %v4891_v52  ;;  %v9006_v47 = vld [vmem:[#allocation73_spill] sm:$0xff] }
 0x59c   :  { %4904 = vrcp.f32 %v2430_v7  ;;  %v2431_v58 = vadd.f32 1.0, %v4893_v11 }
 0x5a1   :  { %v2530_v32 = vpop.f32.mrf.mxu0  ;;  %v2573_v56 = vpop.f32.mrf.mxu1 }
 0x5a2   :  { %v2582_v18 = vadd.f32 %v2530_v32, %v9003_v17  ;;  %v9007_v17 = vld [vmem:[#allocation68_spill] sm:$0xff] }
 0x5a3   :  { %v4895_v19 = vpop.eup %4894  ;;  %v2532_v22 = vpop.f32.mrf.mxu0 }
 0x5a4   :  { %v4897_v23 = vpop.eup %4896  ;;  %v4265_v24 = vmul.f32 -1.442695, %v2582_v18  ;;  %v2583_v26 = vadd.f32 %v2532_v22, %v9004_v25  ;;  %v2575_v7 = vpop.f32.mrf.mxu1  ;;  %v2584_v18 = vadd.f32 %v2573_v56, %v9007_v17 }
 0x5a5   :  { %v4899_v28 = vpop.eup %4898  ;;  %v2448_v44 = vmul.f32 %v4897_v23, %v4895_v19  ;;  %v2534_v33 = vpop.f32.mrf.mxu0  ;;  %v9008_v19 = vld [vmem:[#allocation70_spill] sm:$0xff]  ;;  %v9009_v23 = vld [vmem:[#allocation72_spill] sm:$0xff] }
 0x5a6   :  { %v2446_v48 = vmul.f32 %v4899_v28, %v7170_v2  ;;  %4906 = vpow2.f32 %v4265_v24  ;;  %v4266_v59 = vmul.f32 -1.442695, %v2583_v26  ;;  %v2586_v49 = vadd.f32 %v2534_v33, %v9005_v54  ;;  %v2577_v11 = vpop.f32.mrf.mxu1 }
 0x5a7   :  { %v4901_v51 = vpop.eup %4900  ;;  %v2536_v50 = vpop.f32.mrf.mxu0  ;;  %v2585_v22 = vadd.f32 %v2575_v7, %v9008_v19  ;;  %v2588_v24 = vadd.f32 %v2577_v11, %v9009_v23 }
 0x5a8   :  { %v4903_v41 = vpop.eup %4902  ;;  %v7430_v62 = vadd.f32 %v2448_v44, %v2446_v48  ;;  %4908 = vpow2.f32 %v4266_v59  ;;  %v4268_v34 = vmul.f32 -1.442695, %v2586_v49  ;;  %v2587_v39 = vadd.f32 %v2536_v50, %v9006_v47  ;;  %v2579_v26 = vpop.f32.mrf.mxu1  ;;  %v9010_v48 = vld [vmem:[#allocation74_spill] sm:$0xff] }
 0x5a9   :  { %v4905_v43 = vpop.eup %4904  ;;  %4910 = vrcp.f32 %v2428_v38  ;;  %v2449_v2 = vmul.f32 %v4903_v41, %v4901_v51  ;;  %v4270_v44 = vmul.f32 -1.442695, %v2588_v24  ;;  %v2589_v59 = vadd.f32 %v2579_v26, %v9010_v48 }
 0x5aa   :  { %4912 = vrcp.f32 %v2431_v58  ;;  %v2447_v53 = vmul.f32 %v4905_v43, %v7175_v12  ;;  %v4269_v52 = vmul.f32 -1.442695, %v2587_v39  ;;  %v4267_v12 = vmul.f32 -1.442695, %v2584_v18 }
 0x5ab   :  { %4914 = vpow2.f32 %v4268_v34 }
 0x5ac   :  { %4916 = vtanh.f32 %v7430_v62  ;;  %v7435_v32 = vadd.f32 %v2449_v2, %v2447_v53 }
 0x5ad   :  { %4918 = vpow2.f32 %v4269_v52 }
 0x5ae   :  { %4920 = vtanh.f32 %v7435_v32 }
 0x5af   :  { %4922 = vtanh.f32 %v2585_v22 }
 0x5b3   :  { %v4907_v25 = vpop.eup %4906 }
 0x5b4   :  { %v2608_v28 = vadd.f32 1.0, %v4907_v25 }
 0x5b5   :  { %v4909_v38 = vpop.eup %4908 }
 0x5b6   :  { %v4911_v58 = vpop.eup %4910  ;;  %4924 = vrcp.f32 %v2608_v28  ;;  %v2609_v33 = vadd.f32 1.0, %v4909_v38 }
 0x5b7   :  { %v4913_v54 = vpop.eup %4912  ;;  %4926 = vpow2.f32 %v4267_v12 }
 0x5b8   :  { %v4915_v49 = vpop.eup %4914  ;;  %4928 = vrcp.f32 %v2609_v33 }
 0x5b9   :  { %v4917_v56 = vpop.eup %4916  ;;  %v2611_v51 = vadd.f32 1.0, %v4915_v49  ;;  %4930 = vpow2.f32 %v4270_v44  ;;  %v9012_v49 = vld [vmem:[#allocation53_spill] sm:$0xff] }
 0x5ba   :  { %v4919_v50 = vpop.eup %4918  ;;  %4932 = vtanh.f32 %v2589_v59  ;;  %v2454_v43 = vmul.f32 %v4917_v56, %v4911_v58  ;;  %v7478_v56 = vld [vmem:[%s8359_s3 + $0x2c] ss:$16 sps:$4 sm:$0xff]  }
 0x5bb   :  { %v4921_v41 = vpop.eup %4920  ;;  %4934 = vrcp.f32 %v2611_v51  ;;  %v2612_v34 = vadd.f32 1.0, %v4919_v50  ;;  %v7485_v51 = vld [vmem:[%s8359_s3 + $0x28] ss:$16 sps:$4 sm:$0xff]   ;;  %v7491_v50 = vld [vmem:[%s8359_s3 + $0x4] ss:$16 sps:$4 sm:$0xff]  }
 0x5bc   :  { %v2455_v47 = vmul.f32 %v4921_v41, %v4913_v54  ;;  %v4923_v53 = vpop.eup %4922  ;;  %v7497_v41 = vld [vmem:[%s8359_s3 + $0xc] ss:$16 sps:$4 sm:$0xff]  }
 0x5bd   :  { %4936 = vrcp.f32 %v2612_v34  ;;  %v7503_v34 = vld [vmem:[%s8359_s3] ss:$16 sps:$4 sm:$0xff]  }
 0x5be   :  { %v2639_v39 = vpack.c.bf16 %v2455_v47, %v2454_v43  ;;  %v7509_v43 = vld [vmem:[%s8359_s3 + $0x8] ss:$16 sps:$4 sm:$0xff]   ;;  %v7515_v47 = vld [vmem:[%s8360_s4 + $0xe4] ss:$16 sps:$4 sm:$0xff]  }
 0x5c0   :  { %2672 = vmatprep.mubr.bf16.mxu0 %v2639_v39  ;;  %2715 = vmatprep.mubr.bf16.mxu1 %v2639_v39  ;;  %v7521_v39 = vld [vmem:[%s8360_s4 + $0xec] ss:$16 sps:$4 sm:$0xff]  }
 0x5c3   :  { %v4925_v2 = vpop.eup %4924 }
 0x5c4   :  { %v4927_v7 = vpop.eup %4926  ;;  %v2630_v52 = vmul.f32 %v4925_v2, %v4923_v53  ;;  %v7527_v53 = vld [vmem:[%s8360_s4 + $0xe0] ss:$16 sps:$4 sm:$0xff]   ;;  %v7533_v2 = vld [vmem:[%s8360_s4 + $0xe8] ss:$16 sps:$4 sm:$0xff]  }
 0x5c5   :  { %v4929_v11 = vpop.eup %4928  ;;  %v2610_v23 = vadd.f32 1.0, %v4927_v7  ;;  %v7539_v7 = vld [vmem:[%s8360_s4 + $0xc4] ss:$16 sps:$4 sm:$0xff]  }
 0x5c6   :  { %v4931_v17 = vpop.eup %4930  ;;  %v2628_v18 = vmul.f32 %v4929_v11, %v7183_v4  ;;  %v7551_v11 = vld [vmem:[%s8360_s4 + $0xc0] ss:$16 sps:$4 sm:$0xff]  }
 0x5c7   :  { %v4933_v19 = vpop.eup %4932  ;;  %v2613_v26 = vadd.f32 1.0, %v4931_v17  ;;  %4938 = vrcp.f32 %v2610_v23  ;;  %9013 = vst [vmem:[#allocation52_spill] sm:$0xff] %v7551_v11  ;;  %v7557_v17 = vld [vmem:[%s8360_s4 + $0xc8] ss:$16 sps:$4 sm:$0xff]  }
 0x5c8   :  { %v4935_v22 = vpop.eup %4934  ;;  %v7443_v24 = vadd.f32 %v2630_v52, %v2628_v18  ;;  %v7545_v52 = vld [vmem:[%s8360_s4 + $0xcc] ss:$16 sps:$4 sm:$0xff]   ;;  %9014 = vst [vmem:[#allocation54_spill] sm:$0xff] %v7557_v17  ;;  %v7563_v18 = vld [vmem:[%s8360_s4 + $0xa4] ss:$16 sps:$4 sm:$0xff]  }
 0x5c9   :  { %v2631_v25 = vmul.f32 %v4935_v22, %v4933_v19  ;;  %9015 = vst [vmem:[#allocation56_spill] sm:$0xff] %v7563_v18  ;;  %v7569_v19 = vld [vmem:[%s8360_s4 + $0xac] ss:$16 sps:$4 sm:$0xff]   ;;  %v7575_v22 = vld [vmem:[%s8360_s4 + $0xa0] ss:$16 sps:$4 sm:$0xff]  }
 0x5ca   :  { %v4937_v12 = vpop.eup %4936  ;;  %4940 = vtanh.f32 %v7443_v24  ;;  %9016 = vst [vmem:[#allocation58_spill] sm:$0xff] %v7569_v19  ;;  %9017 = vst [vmem:[#allocation9_spill] sm:$0xff] %v7575_v22  ;;  %v7581_v23 = vld [vmem:[%s8360_s4 + $0xa8] ss:$16 sps:$4 sm:$0xff]  }
 0x5cb   :  { %v2629_v28 = vmul.f32 %v4937_v12, %v7187_v3  ;;  %4942 = vrcp.f32 %v2613_v26  ;;  %v9011_v3 = vld [vmem:[#allocation51_spill] sm:$0xff]  ;;  %9018 = vst [vmem:[#allocation10_spill] sm:$0xff] %v7581_v23  ;;  %v7593_v12 = vld [vmem:[%s8360_s4 + $0x8c] ss:$16 sps:$4 sm:$0xff]  }
 0x5cc   :  { %9020 = vst [vmem:[#allocation12_spill] sm:$0xff] %v7593_v12  ;;  %v7599_v26 = vld [vmem:[%s8360_s4 + $0x80] ss:$16 sps:$4 sm:$0xff]  }
 0x5cd   :  { %v7447_v38 = vadd.f32 %v2631_v25, %v2629_v28  ;;  %v7587_v25 = vld [vmem:[%s8360_s4 + $0x84] ss:$16 sps:$4 sm:$0xff]   ;;  %9021 = vst [vmem:[#allocation13_spill] sm:$0xff] %v7599_v26  ;;  %v7605_v28 = vld [vmem:[%s8360_s4 + $0x88] ss:$16 sps:$4 sm:$0xff]  }
 0x5ce   :  { %9019 = vst [vmem:[#allocation11_spill] sm:$0xff] %v7587_v25  ;;  %9022 = vst [vmem:[#allocation14_spill] sm:$0xff] %v7605_v28 }
 0x5cf   :  { %4944 = vtanh.f32 %v7447_v38 }
 0x5d4   :  { %v4939_v44 = vpop.eup %4938 }
 0x5d7   :  { %v4941_v4 = vpop.eup %4940 }
 0x5d8   :  { %v4943_v58 = vpop.eup %4942  ;;  %v2636_v48 = vmul.f32 %v4941_v4, %v4939_v44  ;;  %v7611_v44 = vld [vmem:[%s8360_s4 + $0x64] ss:$16 sps:$4 sm:$0xff]   ;;  %v7617_v4 = vld [vmem:[%s8360_s4 + $0x6c] ss:$16 sps:$4 sm:$0xff]  }
 0x5d9   :  { %9023 = vst [vmem:[#allocation15_spill] sm:$0xff] %v7611_v44  ;;  %9024 = vst [vmem:[#allocation16_spill] sm:$0xff] %v7617_v4 }
 0x5dc   :  { %v4945_v33 = vpop.eup %4944 }
 0x5dd   :  { %v2637_v59 = vmul.f32 %v4945_v33, %v4943_v58  ;;  %v7623_v58 = vld [vmem:[%s8360_s4 + $0x60] ss:$16 sps:$4 sm:$0xff]   ;;  %v7629_v33 = vld [vmem:[%s8360_s4 + $0x68] ss:$16 sps:$4 sm:$0xff]  }
 0x5de   :  { %9025 = vst [vmem:[#allocation17_spill] sm:$0xff] %v7623_v58  ;;  %9026 = vst [vmem:[#allocation18_spill] sm:$0xff] %v7629_v33 }
 0x5df   :  { %v2638_v54 = vpack.c.bf16 %v2637_v59, %v2636_v48  ;;  %v7635_v48 = vld [vmem:[%s8360_s4 + $0x44] ss:$16 sps:$4 sm:$0xff]   ;;  %v7641_v59 = vld [vmem:[%s8360_s4 + $0x4c] ss:$16 sps:$4 sm:$0xff]  }
 0x5e0   :  { %9027 = vst [vmem:[#allocation19_spill] sm:$0xff] %v7635_v48  ;;  %9028 = vst [vmem:[#allocation20_spill] sm:$0xff] %v7641_v59 }
 0x5e1   :  { %2673 = vmatmul.mubr.bf16.vlgmr.msra.gmra.mxu0 %v2638_v54  ;;  %2716 = vmatmul.mubr.bf16.vlgmr.msra.gmra.mxu1 %v2638_v54 }
 0x5e2   :  { %2815 = vmatpush1.bf16.msra.mxu0 %v7193_v5  ;;  %2858 = vmatpush1.bf16.msra.mxu1 %v7199_v63 }
 0x5e3   :  { %2816 = vmatprep.subr.bf16.mxu0 %v7205_v60  ;;  %2859 = vmatprep.subr.bf16.mxu1 %v7211_v30 }
 0x5e4   :  { %2846 = vmatprep.mubr.bf16.mxu0 %v8768_v45  ;;  %2889 = vmatprep.mubr.bf16.mxu1 %v8768_v45 }
 0x5e6   :  { %2817 = vmatpush1.bf16.msra.mxu0 %v7219_v13  ;;  %2860 = vmatpush1.bf16.msra.mxu1 %v7225_v21 }
 0x5e7   :  { %2818 = vmatprep.subr.bf16.mxu0 %v7231_v36  ;;  %2861 = vmatprep.subr.bf16.mxu1 %v7237_v55 }
 0x5ea   :  { %2819 = vmatpush1.bf16.msra.mxu0 %v7243_v15  ;;  %2862 = vmatpush1.bf16.msra.mxu1 %v7249_v37 }
 0x5eb   :  { %2820 = vmatprep.subr.bf16.mxu0 %v7255_v31  ;;  %2863 = vmatprep.subr.bf16.mxu1 %v7261_v0 }
 0x5ee   :  { %2821 = vmatpush1.bf16.msra.mxu0 %v7267_v16  ;;  %2864 = vmatpush1.bf16.msra.mxu1 %v7273_v14 }
 0x5ef   :  { %2822 = vmatprep.subr.bf16.mxu0 %v7279_v35  ;;  %2865 = vmatprep.subr.bf16.mxu1 %v7285_v46 }
 0x5f2   :  { %2823 = vmatpush1.bf16.msra.mxu0 %v7291_v29  ;;  %2866 = vmatpush1.bf16.msra.mxu1 %v7297_v27 }
 0x5f3   :  { %2824 = vmatprep.subr.bf16.mxu0 %v9011_v3  ;;  %2867 = vmatprep.subr.bf16.mxu1 %v7309_v6 }
 0x5f6   :  { %2825 = vmatpush1.bf16.msra.mxu0 %v9012_v49  ;;  %2868 = vmatpush1.bf16.msra.mxu1 %v7321_v61 }
 0x5f7   :  { %2826 = vmatprep.subr.bf16.mxu0 %v7327_v10  ;;  %2869 = vmatprep.subr.bf16.mxu1 %v7478_v56 }
 0x5fa   :  { %2827 = vmatpush1.bf16.msra.mxu0 %v7334_v40  ;;  %2870 = vmatpush1.bf16.msra.mxu1 %v7485_v51 }
 0x5fb   :  { %2828 = vmatprep.subr.bf16.mxu0 %v7491_v50  ;;  %2871 = vmatprep.subr.bf16.mxu1 %v7497_v41 }
 0x5fe   :  { %2829 = vmatpush1.bf16.msra.mxu0 %v7503_v34  ;;  %2872 = vmatpush1.bf16.msra.mxu1 %v7509_v43 }
 0x5ff   :  { %2958 = vmatprep.subr.bf16.mxu0 %v7515_v47  ;;  %3001 = vmatprep.subr.bf16.mxu1 %v7521_v39 }
 0x601   :  { %2847 = vmatmul.mubr.bf16.vlgmr.msra.gmra.mxu0 %v2638_v54  ;;  %2890 = vmatmul.mubr.bf16.vlgmr.msra.gmra.mxu1 %v2638_v54  ;;  %v7647_v54 = vld [vmem:[%s8360_s4 + $0x40] ss:$16 sps:$4 sm:$0xff]  }
 0x602   :  { %2959 = vmatpush1.bf16.msra.mxu0 %v7527_v53  ;;  %3002 = vmatpush1.bf16.msra.mxu1 %v7533_v2  ;;  %9029 = vst [vmem:[#allocation21_spill] sm:$0xff] %v7647_v54 }
 0x603   :  { %2960 = vmatprep.subr.bf16.mxu0 %v7539_v7  ;;  %3003 = vmatprep.subr.bf16.mxu1 %v7545_v52 }
 0x606   :  { %2961 = vmatpush1.bf16.msra.mxu0 %v7551_v11  ;;  %3004 = vmatpush1.bf16.msra.mxu1 %v7557_v17 }
 0x607   :  { %2962 = vmatprep.subr.bf16.mxu0 %v7563_v18  ;;  %3005 = vmatprep.subr.bf16.mxu1 %v7569_v19 }
 0x60a   :  { %2963 = vmatpush1.bf16.msra.mxu0 %v7575_v22  ;;  %3006 = vmatpush1.bf16.msra.mxu1 %v7581_v23 }
 0x60b   :  { %2964 = vmatprep.subr.bf16.mxu0 %v7587_v25  ;;  %3007 = vmatprep.subr.bf16.mxu1 %v7593_v12 }
 0x60e   :  { %2965 = vmatpush1.bf16.msra.mxu0 %v7599_v26  ;;  %3008 = vmatpush1.bf16.msra.mxu1 %v7605_v28 }
 0x60f   :  { %2966 = vmatprep.subr.bf16.mxu0 %v7611_v44  ;;  %3009 = vmatprep.subr.bf16.mxu1 %v7617_v4 }
 0x612   :  { %2967 = vmatpush1.bf16.msra.mxu0 %v7623_v58  ;;  %3010 = vmatpush1.bf16.msra.mxu1 %v7629_v33  ;;  %v7653_v33 = vld [vmem:[%s8360_s4 + $0x48] ss:$16 sps:$4 sm:$0xff]  }
 0x613   :  { %2968 = vmatprep.subr.bf16.mxu0 %v7635_v48  ;;  %3011 = vmatprep.subr.bf16.mxu1 %v7641_v59  ;;  %9030 = vst [vmem:[#allocation22_spill] sm:$0xff] %v7653_v33  ;;  %v7659_v48 = vld [vmem:[%s8360_s4 + $0x24] ss:$16 sps:$4 sm:$0xff]   ;;  %v7665_v59 = vld [vmem:[%s8360_s4 + $0x2c] ss:$16 sps:$4 sm:$0xff]  }
 0x614   :  { %9031 = vst [vmem:[#allocation23_spill] sm:$0xff] %v7659_v48  ;;  %9032 = vst [vmem:[#allocation24_spill] sm:$0xff] %v7665_v59 }
 0x616   :  { %2969 = vmatpush1.bf16.msra.mxu0 %v7647_v54  ;;  %3012 = vmatpush1.bf16.msra.mxu1 %v7653_v33  ;;  %v7671_v54 = vld [vmem:[%s8360_s4 + $0x20] ss:$16 sps:$4 sm:$0xff]   ;;  %v7677_v33 = vld [vmem:[%s8360_s4 + $0x28] ss:$16 sps:$4 sm:$0xff]  }
 0x617   :  { %2970 = vmatprep.subr.bf16.mxu0 %v7659_v48  ;;  %3013 = vmatprep.subr.bf16.mxu1 %v7665_v59  ;;  %9033 = vst [vmem:[#allocation25_spill] sm:$0xff] %v7671_v54  ;;  %9034 = vst [vmem:[#allocation26_spill] sm:$0xff] %v7677_v33  ;;  %v7683_v48 = vld [vmem:[%s8360_s4 + $0x4] ss:$16 sps:$4 sm:$0xff]   ;;  %v7689_v59 = vld [vmem:[%s8360_s4 + $0xc] ss:$16 sps:$4 sm:$0xff]  }
 0x618   :  { %9035 = vst [vmem:[#allocation27_spill] sm:$0xff] %v7683_v48  ;;  %9036 = vst [vmem:[#allocation28_spill] sm:$0xff] %v7689_v59 }
 0x61a   :  { %2971 = vmatpush1.bf16.msra.mxu0 %v7671_v54  ;;  %3014 = vmatpush1.bf16.msra.mxu1 %v7677_v33  ;;  %v7695_v54 = vld [vmem:[%s8360_s4] ss:$16 sps:$4 sm:$0xff]   ;;  %v7701_v33 = vld [vmem:[%s8360_s4 + $0x8] ss:$16 sps:$4 sm:$0xff]  }
 0x61b   :  { %2972 = vmatprep.subr.bf16.mxu0 %v7683_v48  ;;  %3015 = vmatprep.subr.bf16.mxu1 %v7689_v59  ;;  %9037 = vst [vmem:[#allocation29_spill] sm:$0xff] %v7695_v54  ;;  %9038 = vst [vmem:[#allocation30_spill] sm:$0xff] %v7701_v33  ;;  %v7707_v48 = vld [vmem:[%s8360_s4 + $0x1e4] ss:$16 sps:$4 sm:$0xff]   ;;  %v7713_v59 = vld [vmem:[%s8360_s4 + $0x1ec] ss:$16 sps:$4 sm:$0xff]  }
 0x61c   :  { %9039 = vst [vmem:[#allocation31_spill] sm:$0xff] %v7707_v48  ;;  %9040 = vst [vmem:[#allocation32_spill] sm:$0xff] %v7713_v59 }
 0x61e   :  { %2973 = vmatpush1.bf16.msra.mxu0 %v7695_v54  ;;  %3016 = vmatpush1.bf16.msra.mxu1 %v7701_v33  ;;  %v7719_v54 = vld [vmem:[%s8360_s4 + $0x1e0] ss:$16 sps:$4 sm:$0xff]   ;;  %v7725_v33 = vld [vmem:[%s8360_s4 + $0x1e8] ss:$16 sps:$4 sm:$0xff]  }
 0x61f   :  { %2974 = vmatprep.subr.bf16.mxu0 %v7707_v48  ;;  %3017 = vmatprep.subr.bf16.mxu1 %v7713_v59  ;;  %9041 = vst [vmem:[#allocation3_spill] sm:$0xff] %v7719_v54  ;;  %9042 = vst [vmem:[#allocation4_spill] sm:$0xff] %v7725_v33  ;;  %v7731_v48 = vld [vmem:[%s8360_s4 + $0x1c4] ss:$16 sps:$4 sm:$0xff]   ;;  %v7737_v59 = vld [vmem:[%s8360_s4 + $0x1cc] ss:$16 sps:$4 sm:$0xff]  }
 0x620   :  { %9043 = vst [vmem:[#allocation59_spill] sm:$0xff] %v7731_v48  ;;  %9044 = vst [vmem:[#allocation61_spill] sm:$0xff] %v7737_v59 }
 0x622   :  { %2975 = vmatpush2.bf16.msra.mxu0 %v7719_v54  ;;  %3018 = vmatpush2.bf16.msra.mxu1 %v7725_v33  ;;  %v7743_v54 = vld [vmem:[%s8360_s4 + $0x1c0] ss:$16 sps:$4 sm:$0xff]   ;;  %v7749_v33 = vld [vmem:[%s8360_s4 + $0x1c8] ss:$16 sps:$4 sm:$0xff]  }
 0x623   :  { %2976 = vmatprep.subr.bf16.mxu0 %v7731_v48  ;;  %3019 = vmatprep.subr.bf16.mxu1 %v7737_v59  ;;  %9045 = vst [vmem:[#allocation63_spill] sm:$0xff] %v7743_v54  ;;  %9046 = vst [vmem:[#allocation65_spill] sm:$0xff] %v7749_v33  ;;  %v7755_v48 = vld [vmem:[%s8360_s4 + $0x1a4] ss:$16 sps:$4 sm:$0xff]   ;;  %v7761_v59 = vld [vmem:[%s8360_s4 + $0x1ac] ss:$16 sps:$4 sm:$0xff]  }
 0x624   :  { %9047 = vst [vmem:[#allocation60_spill] sm:$0xff] %v7755_v48  ;;  %9048 = vst [vmem:[#allocation62_spill] sm:$0xff] %v7761_v59 }
 0x626   :  { %2977 = vmatpush2.bf16.msra.mxu0 %v7743_v54  ;;  %3020 = vmatpush2.bf16.msra.mxu1 %v7749_v33  ;;  %v7767_v54 = vld [vmem:[%s8360_s4 + $0x1a0] ss:$16 sps:$4 sm:$0xff]   ;;  %v7773_v33 = vld [vmem:[%s8360_s4 + $0x1a8] ss:$16 sps:$4 sm:$0xff]  }
 0x627   :  { %2978 = vmatprep.subr.bf16.mxu0 %v7755_v48  ;;  %3021 = vmatprep.subr.bf16.mxu1 %v7761_v59  ;;  %9049 = vst [vmem:[#allocation64_spill] sm:$0xff] %v7767_v54  ;;  %9050 = vst [vmem:[#allocation66_spill] sm:$0xff] %v7773_v33  ;;  %v7779_v48 = vld [vmem:[%s8360_s4 + $0x184] ss:$16 sps:$4 sm:$0xff]   ;;  %v7785_v59 = vld [vmem:[%s8360_s4 + $0x18c] ss:$16 sps:$4 sm:$0xff]  }
 0x628   :  { %9051 = vst [vmem:[#allocation33_spill] sm:$0xff] %v7779_v48  ;;  %9052 = vst [vmem:[#allocation34_spill] sm:$0xff] %v7785_v59 }
 0x62a   :  { %2979 = vmatpush2.bf16.msra.mxu0 %v7767_v54  ;;  %3022 = vmatpush2.bf16.msra.mxu1 %v7773_v33  ;;  %v7791_v54 = vld [vmem:[%s8360_s4 + $0x180] ss:$16 sps:$4 sm:$0xff]   ;;  %v7797_v33 = vld [vmem:[%s8360_s4 + $0x188] ss:$16 sps:$4 sm:$0xff]  }
 0x62b   :  { %2980 = vmatprep.subr.bf16.mxu0 %v7779_v48  ;;  %3023 = vmatprep.subr.bf16.mxu1 %v7785_v59  ;;  %9053 = vst [vmem:[#allocation35_spill] sm:$0xff] %v7791_v54  ;;  %9054 = vst [vmem:[#allocation36_spill] sm:$0xff] %v7797_v33  ;;  %v7803_v48 = vld [vmem:[%s8360_s4 + $0x164] ss:$16 sps:$4 sm:$0xff]   ;;  %v7809_v59 = vld [vmem:[%s8360_s4 + $0x16c] ss:$16 sps:$4 sm:$0xff]  }
 0x62c   :  { %9055 = vst [vmem:[#allocation37_spill] sm:$0xff] %v7803_v48  ;;  %9056 = vst [vmem:[#allocation38_spill] sm:$0xff] %v7809_v59 }
 0x62e   :  { %2981 = vmatpush2.bf16.msra.mxu0 %v7791_v54  ;;  %3024 = vmatpush2.bf16.msra.mxu1 %v7797_v33  ;;  %v7815_v54 = vld [vmem:[%s8360_s4 + $0x160] ss:$16 sps:$4 sm:$0xff]   ;;  %v7821_v33 = vld [vmem:[%s8360_s4 + $0x168] ss:$16 sps:$4 sm:$0xff]  }
 0x62f   :  { %2982 = vmatprep.subr.bf16.mxu0 %v7803_v48  ;;  %3025 = vmatprep.subr.bf16.mxu1 %v7809_v59  ;;  %9057 = vst [vmem:[#allocation39_spill] sm:$0xff] %v7815_v54  ;;  %9058 = vst [vmem:[#allocation40_spill] sm:$0xff] %v7821_v33  ;;  %v7827_v48 = vld [vmem:[%s8360_s4 + $0x144] ss:$16 sps:$4 sm:$0xff]   ;;  %v7833_v59 = vld [vmem:[%s8360_s4 + $0x14c] ss:$16 sps:$4 sm:$0xff]  }
 0x630   :  { %9059 = vst [vmem:[#allocation41_spill] sm:$0xff] %v7827_v48  ;;  %9060 = vst [vmem:[#allocation42_spill] sm:$0xff] %v7833_v59 }
 0x632   :  { %2983 = vmatpush2.bf16.msra.mxu0 %v7815_v54  ;;  %3026 = vmatpush2.bf16.msra.mxu1 %v7821_v33  ;;  %v7839_v54 = vld [vmem:[%s8360_s4 + $0x140] ss:$16 sps:$4 sm:$0xff]   ;;  %v7845_v33 = vld [vmem:[%s8360_s4 + $0x148] ss:$16 sps:$4 sm:$0xff]  }
 0x633   :  { %2984 = vmatprep.subr.bf16.mxu0 %v7827_v48  ;;  %3027 = vmatprep.subr.bf16.mxu1 %v7833_v59  ;;  %9061 = vst [vmem:[#allocation43_spill] sm:$0xff] %v7839_v54  ;;  %9062 = vst [vmem:[#allocation45_spill] sm:$0xff] %v7845_v33  ;;  %v7851_v48 = vld [vmem:[%s8360_s4 + $0x124] ss:$16 sps:$4 sm:$0xff]   ;;  %v7857_v59 = vld [vmem:[%s8360_s4 + $0x12c] ss:$16 sps:$4 sm:$0xff]  }
 0x634   :  { %9063 = vst [vmem:[#allocation47_spill] sm:$0xff] %v7851_v48  ;;  %9064 = vst [vmem:[#allocation49_spill] sm:$0xff] %v7857_v59 }
 0x636   :  { %2985 = vmatpush2.bf16.msra.mxu0 %v7839_v54  ;;  %3028 = vmatpush2.bf16.msra.mxu1 %v7845_v33  ;;  %v7863_v54 = vld [vmem:[%s8360_s4 + $0x120] ss:$16 sps:$4 sm:$0xff]   ;;  %v7869_v33 = vld [vmem:[%s8360_s4 + $0x128] ss:$16 sps:$4 sm:$0xff]  }
 0x637   :  { %2986 = vmatprep.subr.bf16.mxu0 %v7851_v48  ;;  %3029 = vmatprep.subr.bf16.mxu1 %v7857_v59  ;;  %9065 = vst [vmem:[#allocation44_spill] sm:$0xff] %v7863_v54  ;;  %9066 = vst [vmem:[#allocation46_spill] sm:$0xff] %v7869_v33  ;;  %v7875_v48 = vld [vmem:[%s8360_s4 + $0x104] ss:$16 sps:$4 sm:$0xff]   ;;  %v7881_v59 = vld [vmem:[%s8360_s4 + $0x10c] ss:$16 sps:$4 sm:$0xff]  }
 0x638   :  { %9067 = vst [vmem:[#allocation48_spill] sm:$0xff] %v7875_v48  ;;  %9068 = vst [vmem:[#allocation50_spill] sm:$0xff] %v7881_v59 }
 0x63a   :  { %2987 = vmatpush2.bf16.msra.mxu0 %v7863_v54  ;;  %3030 = vmatpush2.bf16.msra.mxu1 %v7869_v33  ;;  %v7887_v54 = vld [vmem:[%s8360_s4 + $0x100] ss:$16 sps:$4 sm:$0xff]   ;;  %v7893_v33 = vld [vmem:[%s8360_s4 + $0x108] ss:$16 sps:$4 sm:$0xff]  }
 0x63b   :  { %2988 = vmatprep.subr.bf16.mxu0 %v7875_v48  ;;  %3031 = vmatprep.subr.bf16.mxu1 %v7881_v59  ;;  %9069 = vst [vmem:[#allocation99_spill] sm:$0xff] %v7887_v54  ;;  %9070 = vst [vmem:[#allocation100_spill] sm:$0xff] %v7893_v33 }
 0x63e   :  { %2989 = vmatpush2.bf16.msra.mxu0 %v7887_v54  ;;  %3032 = vmatpush2.bf16.msra.mxu1 %v7893_v33 }
 0x63f   :  { %3132 = vmatprep.subr.bf16.mxu0 %v7409_v57  ;;  %3175 = vmatprep.subr.bf16.mxu1 %v7415_v8 }
 0x6a1   :  { %v2674_v48 = vpop.f32.mrf.mxu0  ;;  %v2717_v58 = vpop.f32.mrf.mxu1 }
 0x6a2   :  { %v2675_v59 = vadd.f32 %v2674_v48, %v8999_v42  ;;  %v2718_v48 = vadd.f32 %v2717_v58, %v9001_v1 }
 0x6a3   :  { %v2676_v4 = vpop.f32.mrf.mxu0  ;;  %v2719_v12 = vpop.f32.mrf.mxu1 }
 0x6a4   :  { %v4271_v44 = vmul.f32 -1.442695, %v2675_v59  ;;  %v2677_v28 = vadd.f32 %v2676_v4, %v9000_v20  ;;  %v4273_v4 = vmul.f32 -1.442695, %v2718_v48 }
 0x6a5   :  { %v2678_v54 = vpop.f32.mrf.mxu0  ;;  %v2721_v8 = vpop.f32.mrf.mxu1 }
 0x6a6   :  { %4946 = vpow2.f32 %v4271_v44  ;;  %v4272_v26 = vmul.f32 -1.442695, %v2677_v28  ;;  %v2679_v25 = vadd.f32 %v2678_v54, %v8999_v42  ;;  %v2722_v59 = vadd.f32 %v2721_v8, %v9001_v1  ;;  %v9072_v1 = vld [vmem:[#allocation77_spill] sm:$0xff] }
 0x6a7   :  { %v2680_v23 = vpop.f32.mrf.mxu0  ;;  %v2720_v28 = vadd.f32 %v2719_v12, %v9002_v9  ;;  %v2723_v54 = vpop.f32.mrf.mxu1 }
 0x6a8   :  { %4948 = vpow2.f32 %v4272_v26  ;;  %v4274_v33 = vmul.f32 -1.442695, %v2679_v25  ;;  %v2681_v57 = vadd.f32 %v2680_v23, %v9000_v20  ;;  %v4276_v19 = vmul.f32 -1.442695, %v2722_v59  ;;  %v9071_v59 = vld [vmem:[#allocation75_spill] sm:$0xff] }
 0x6aa   :  { %4950 = vpow2.f32 %v4274_v33  ;;  %v4275_v22 = vmul.f32 -1.442695, %v2681_v57  ;;  %v2724_v57 = vadd.f32 %v2723_v54, %v9002_v9 }
 0x6ac   :  { %4952 = vpow2.f32 %v4275_v22 }
 0x6ad   :  { %4954 = vpow2.f32 %v4273_v4 }
 0x6ae   :  { %4956 = vpow2.f32 %v4276_v19 }
 0x6b3   :  { %v4947_v44 = vpop.eup %4946 }
 0x6b4   :  { %v2744_v18 = vadd.f32 1.0, %v4947_v44 }
 0x6b5   :  { %v4949_v26 = vpop.eup %4948 }
 0x6b6   :  { %4958 = vrcp.f32 %v2744_v18  ;;  %v2745_v23 = vadd.f32 1.0, %v4949_v26 }
 0x6b7   :  { %v4951_v25 = vpop.eup %4950  ;;  %4960 = vtanh.f32 %v2720_v28 }
 0x6b8   :  { %4962 = vrcp.f32 %v2745_v23  ;;  %v2747_v22 = vadd.f32 1.0, %v4951_v25 }
 0x6b9   :  { %v4953_v58 = vpop.eup %4952 }
 0x6ba   :  { %4964 = vrcp.f32 %v2747_v22  ;;  %v2748_v8 = vadd.f32 1.0, %v4953_v58  ;;  %v4955_v33 = vpop.eup %4954 }
 0x6bb   :  { %4966 = vtanh.f32 %v2724_v57  ;;  %v4957_v48 = vpop.eup %4956  ;;  %v2746_v54 = vadd.f32 1.0, %v4955_v33  ;;  %v9074_v33 = vld [vmem:[#allocation81_spill] sm:$0xff] }
 0x6bc   :  { %4968 = vrcp.f32 %v2748_v8  ;;  %v2749_v25 = vadd.f32 1.0, %v4957_v48  ;;  %v9073_v8 = vld [vmem:[#allocation79_spill] sm:$0xff] }
 0x6c1   :  { %v2848_v12 = vpop.f32.mrf.mxu0  ;;  %v2891_v57 = vpop.f32.mrf.mxu1 }
 0x6c2   :  { %v2900_v4 = vadd.f32 %v2848_v12, %v9071_v59 }
 0x6c3   :  { %v4959_v44 = vpop.eup %4958  ;;  %v2850_v19 = vpop.f32.mrf.mxu0 }
 0x6c4   :  { %v4961_v18 = vpop.eup %4960  ;;  %v4278_v26 = vmul.f32 -1.442695, %v2900_v4  ;;  %v2901_v28 = vadd.f32 %v2850_v19, %v9072_v1 }
 0x6c5   :  { %v4963_v20 = vpop.eup %4962  ;;  %v2766_v23 = vmul.f32 %v4961_v18, %v4959_v44  ;;  %v2852_v9 = vpop.f32.mrf.mxu0 }
 0x6c6   :  { %v2764_v22 = vmul.f32 %v4963_v20, %v7430_v62  ;;  %4970 = vpow2.f32 %v4278_v26  ;;  %v4279_v58 = vmul.f32 -1.442695, %v2901_v28  ;;  %v2904_v42 = vadd.f32 %v2852_v9, %v9073_v8  ;;  %v2893_v62 = vpop.f32.mrf.mxu1  ;;  %v9076_v28 = vld [vmem:[#allocation78_spill] sm:$0xff] }
 0x6c7   :  { %v4965_v17 = vpop.eup %4964  ;;  %v2854_v12 = vpop.f32.mrf.mxu0 }
 0x6c8   :  { %v4967_v59 = vpop.eup %4966  ;;  %v7910_v11 = vadd.f32 %v2766_v23, %v2764_v22  ;;  %4972 = vpow2.f32 %v4279_v58  ;;  %v4281_v4 = vmul.f32 -1.442695, %v2904_v42  ;;  %v2905_v44 = vadd.f32 %v2854_v12, %v9074_v33  ;;  %v2895_v18 = vpop.f32.mrf.mxu1  ;;  %v9075_v42 = vld [vmem:[#allocation76_spill] sm:$0xff] }
 0x6c9   :  { %v4969_v1 = vpop.eup %4968  ;;  %4974 = vrcp.f32 %v2746_v54  ;;  %v2767_v20 = vmul.f32 %v4967_v59, %v4965_v17  ;;  %v2902_v26 = vadd.f32 %v2891_v57, %v9075_v42  ;;  %v2903_v54 = vadd.f32 %v2893_v62, %v9076_v28  ;;  %v9077_v23 = vld [vmem:[#allocation80_spill] sm:$0xff] }
 0x6ca   :  { %4976 = vrcp.f32 %v2749_v25  ;;  %v2765_v48 = vmul.f32 %v4969_v1, %v7435_v32  ;;  %v4282_v19 = vmul.f32 -1.442695, %v2905_v44  ;;  %v2906_v25 = vadd.f32 %v2895_v18, %v9077_v23  ;;  %v2897_v17 = vpop.f32.mrf.mxu1  ;;  %v9078_v1 = vld [vmem:[#allocation82_spill] sm:$0xff] }
 0x6cb   :  { %4978 = vpow2.f32 %v4281_v4  ;;  %v4280_v32 = vmul.f32 -1.442695, %v2902_v26  ;;  %v2907_v33 = vadd.f32 %v2897_v17, %v9078_v1 }
 0x6cc   :  { %4980 = vtanh.f32 %v7910_v11  ;;  %v7915_v9 = vadd.f32 %v2767_v20, %v2765_v48  ;;  %v4283_v12 = vmul.f32 -1.442695, %v2906_v25 }
 0x6cd   :  { %4982 = vpow2.f32 %v4282_v19 }
 0x6ce   :  { %4984 = vtanh.f32 %v7915_v9 }
 0x6cf   :  { %4986 = vtanh.f32 %v2903_v54 }
 0x6d3   :  { %v4971_v22 = vpop.eup %4970 }
 0x6d4   :  { %v2926_v58 = vadd.f32 1.0, %v4971_v22 }
 0x6d5   :  { %v4973_v8 = vpop.eup %4972 }
 0x6d6   :  { %v4975_v59 = vpop.eup %4974  ;;  %4988 = vrcp.f32 %v2926_v58  ;;  %v2927_v4 = vadd.f32 1.0, %v4973_v8 }
 0x6d7   :  { %v4977_v44 = vpop.eup %4976  ;;  %4990 = vpow2.f32 %v4280_v32 }
 0x6d8   :  { %v4979_v48 = vpop.eup %4978  ;;  %4992 = vrcp.f32 %v2927_v4 }
 0x6d9   :  { %v4981_v57 = vpop.eup %4980  ;;  %v2929_v20 = vadd.f32 1.0, %v4979_v48  ;;  %4994 = vpow2.f32 %v4283_v12 }
 0x6da   :  { %v4983_v62 = vpop.eup %4982  ;;  %4996 = vtanh.f32 %v2907_v33  ;;  %v2772_v42 = vmul.f32 %v4981_v57, %v4975_v59 }
 0x6db   :  { %v4985_v19 = vpop.eup %4984  ;;  %4998 = vrcp.f32 %v2929_v20  ;;  %v2930_v18 = vadd.f32 1.0, %v4983_v62 }
 0x6dc   :  { %v2773_v26 = vmul.f32 %v4985_v19, %v4977_v44  ;;  %v4987_v54 = vpop.eup %4986 }
 0x6dd   :  { %5000 = vrcp.f32 %v2930_v18 }
 0x6de   :  { %v2957_v28 = vpack.c.bf16 %v2773_v26, %v2772_v42 }
 0x6e0   :  { %2990 = vmatprep.mubr.bf16.mxu0 %v2957_v28  ;;  %3033 = vmatprep.mubr.bf16.mxu1 %v2957_v28  ;;  %v9104_v28 = vld [vmem:[#allocation30_spill] sm:$0xff] }
 0x6e3   :  { %v4989_v23 = vpop.eup %4988 }
 0x6e4   :  { %v4991_v25 = vpop.eup %4990  ;;  %v2948_v22 = vmul.f32 %v4989_v23, %v4987_v54  ;;  %v9105_v54 = vld [vmem:[#allocation31_spill] sm:$0xff]  ;;  %v9106_v23 = vld [vmem:[#allocation32_spill] sm:$0xff] }
 0x6e5   :  { %v4993_v32 = vpop.eup %4992  ;;  %v2928_v4 = vadd.f32 1.0, %v4991_v25  ;;  %v9107_v25 = vld [vmem:[#allocation3_spill] sm:$0xff] }
 0x6e6   :  { %v4995_v17 = vpop.eup %4994  ;;  %v2946_v58 = vmul.f32 %v4993_v32, %v7443_v24  ;;  %v9109_v32 = vld [vmem:[#allocation59_spill] sm:$0xff] }
 0x6e7   :  { %v4997_v8 = vpop.eup %4996  ;;  %v2931_v44 = vadd.f32 1.0, %v4995_v17  ;;  %5002 = vrcp.f32 %v2928_v4  ;;  %v9110_v17 = vld [vmem:[#allocation61_spill] sm:$0xff]  ;;  %v9114_v4 = vld [vmem:[#allocation62_spill] sm:$0xff] }
 0x6e8   :  { %v4999_v12 = vpop.eup %4998  ;;  %v7923_v1 = vadd.f32 %v2948_v22, %v2946_v58  ;;  %v9108_v22 = vld [vmem:[#allocation4_spill] sm:$0xff]  ;;  %v9111_v58 = vld [vmem:[#allocation63_spill] sm:$0xff] }
 0x6e9   :  { %v2949_v33 = vmul.f32 %v4999_v12, %v4997_v8  ;;  %v9112_v8 = vld [vmem:[#allocation65_spill] sm:$0xff]  ;;  %v9113_v12 = vld [vmem:[#allocation60_spill] sm:$0xff] }
 0x6ea   :  { %v5001_v59 = vpop.eup %5000  ;;  %5004 = vtanh.f32 %v7923_v1 }
 0x6eb   :  { %v2947_v48 = vmul.f32 %v5001_v59, %v7447_v38  ;;  %5006 = vrcp.f32 %v2931_v44  ;;  %v9101_v38 = vld [vmem:[#allocation27_spill] sm:$0xff]  ;;  %v9116_v59 = vld [vmem:[#allocation66_spill] sm:$0xff]  ;;  %v9117_v44 = vld [vmem:[#allocation33_spill] sm:$0xff] }
 0x6ed   :  { %v7927_v57 = vadd.f32 %v2949_v33, %v2947_v48  ;;  %v9115_v33 = vld [vmem:[#allocation64_spill] sm:$0xff]  ;;  %v9118_v48 = vld [vmem:[#allocation34_spill] sm:$0xff] }
 0x6ef   :  { %5008 = vtanh.f32 %v7927_v57 }
 0x6f4   :  { %v5003_v20 = vpop.eup %5002 }
 0x6f7   :  { %v5005_v24 = vpop.eup %5004 }
 0x6f8   :  { %v5007_v62 = vpop.eup %5006  ;;  %v2954_v18 = vmul.f32 %v5005_v24, %v5003_v20  ;;  %v9119_v20 = vld [vmem:[#allocation35_spill] sm:$0xff]  ;;  %v9120_v24 = vld [vmem:[#allocation36_spill] sm:$0xff] }
 0x6fc   :  { %v5009_v19 = vpop.eup %5008 }
 0x6fd   :  { %v2955_v42 = vmul.f32 %v5009_v19, %v5007_v62  ;;  %v9121_v62 = vld [vmem:[#allocation37_spill] sm:$0xff]  ;;  %v9122_v19 = vld [vmem:[#allocation38_spill] sm:$0xff] }
 0x6ff   :  { %v2956_v26 = vpack.c.bf16 %v2955_v42, %v2954_v18  ;;  %v9123_v18 = vld [vmem:[#allocation39_spill] sm:$0xff]  ;;  %v9124_v42 = vld [vmem:[#allocation40_spill] sm:$0xff] }
 0x701   :  { %2991 = vmatmul.mubr.bf16.vlgmr.msra.gmra.mxu0 %v2956_v26  ;;  %3034 = vmatmul.mubr.bf16.vlgmr.msra.gmra.mxu1 %v2956_v26 }
 0x702   :  { %3133 = vmatpush1.bf16.msra.mxu0 %v7193_v5  ;;  %3176 = vmatpush1.bf16.msra.mxu1 %v7199_v63  ;;  %v9079_v5 = vld [vmem:[#allocation52_spill] sm:$0xff]  ;;  %v9080_v63 = vld [vmem:[#allocation54_spill] sm:$0xff] }
 0x703   :  { %3134 = vmatprep.subr.bf16.mxu0 %v7205_v60  ;;  %3177 = vmatprep.subr.bf16.mxu1 %v7211_v30  ;;  %v9081_v60 = vld [vmem:[#allocation56_spill] sm:$0xff]  ;;  %v9082_v30 = vld [vmem:[#allocation58_spill] sm:$0xff] }
 0x704   :  { %3164 = vmatprep.mubr.bf16.mxu0 %v8768_v45  ;;  %3207 = vmatprep.mubr.bf16.mxu1 %v8768_v45 }
 0x706   :  { %3135 = vmatpush1.bf16.msra.mxu0 %v7219_v13  ;;  %3178 = vmatpush1.bf16.msra.mxu1 %v7225_v21  ;;  %v9083_v13 = vld [vmem:[#allocation9_spill] sm:$0xff]  ;;  %v9084_v21 = vld [vmem:[#allocation10_spill] sm:$0xff] }
 0x707   :  { %3136 = vmatprep.subr.bf16.mxu0 %v7231_v36  ;;  %3179 = vmatprep.subr.bf16.mxu1 %v7237_v55  ;;  %v9085_v36 = vld [vmem:[#allocation11_spill] sm:$0xff]  ;;  %v9086_v55 = vld [vmem:[#allocation12_spill] sm:$0xff] }
 0x70a   :  { %3137 = vmatpush1.bf16.msra.mxu0 %v7243_v15  ;;  %3180 = vmatpush1.bf16.msra.mxu1 %v7249_v37  ;;  %v9087_v15 = vld [vmem:[#allocation13_spill] sm:$0xff]  ;;  %v9088_v37 = vld [vmem:[#allocation14_spill] sm:$0xff] }
 0x70b   :  { %3138 = vmatprep.subr.bf16.mxu0 %v7255_v31  ;;  %3181 = vmatprep.subr.bf16.mxu1 %v7261_v0  ;;  %v9089_v31 = vld [vmem:[#allocation15_spill] sm:$0xff]  ;;  %v9090_v0 = vld [vmem:[#allocation16_spill] sm:$0xff] }
 0x70e   :  { %3139 = vmatpush1.bf16.msra.mxu0 %v7267_v16  ;;  %3182 = vmatpush1.bf16.msra.mxu1 %v7273_v14  ;;  %v9091_v16 = vld [vmem:[#allocation17_spill] sm:$0xff]  ;;  %v9092_v14 = vld [vmem:[#allocation18_spill] sm:$0xff] }
 0x70f   :  { %3140 = vmatprep.subr.bf16.mxu0 %v7279_v35  ;;  %3183 = vmatprep.subr.bf16.mxu1 %v7285_v46  ;;  %v9093_v35 = vld [vmem:[#allocation19_spill] sm:$0xff]  ;;  %v9094_v46 = vld [vmem:[#allocation20_spill] sm:$0xff] }
 0x712   :  { %3141 = vmatpush1.bf16.msra.mxu0 %v7291_v29  ;;  %3184 = vmatpush1.bf16.msra.mxu1 %v7297_v27  ;;  %v9095_v29 = vld [vmem:[#allocation21_spill] sm:$0xff]  ;;  %v9096_v27 = vld [vmem:[#allocation22_spill] sm:$0xff] }
 0x713   :  { %3142 = vmatprep.subr.bf16.mxu0 %v9011_v3  ;;  %3185 = vmatprep.subr.bf16.mxu1 %v7309_v6  ;;  %v9098_v6 = vld [vmem:[#allocation24_spill] sm:$0xff] }
 0x714   :  { %v9102_v3 = vld [vmem:[#allocation28_spill] sm:$0xff] }
 0x716   :  { %3143 = vmatpush1.bf16.msra.mxu0 %v9012_v49  ;;  %3186 = vmatpush1.bf16.msra.mxu1 %v7321_v61  ;;  %v9100_v61 = vld [vmem:[#allocation26_spill] sm:$0xff]  ;;  %v9103_v49 = vld [vmem:[#allocation29_spill] sm:$0xff] }
 0x717   :  { %3144 = vmatprep.subr.bf16.mxu0 %v7327_v10  ;;  %3187 = vmatprep.subr.bf16.mxu1 %v7478_v56  ;;  %v9097_v10 = vld [vmem:[#allocation23_spill] sm:$0xff] }
 0x71a   :  { %3145 = vmatpush1.bf16.msra.mxu0 %v7334_v40  ;;  %3188 = vmatpush1.bf16.msra.mxu1 %v7485_v51  ;;  %v9099_v40 = vld [vmem:[#allocation25_spill] sm:$0xff] }
 0x71b   :  { %3146 = vmatprep.subr.bf16.mxu0 %v7491_v50  ;;  %3189 = vmatprep.subr.bf16.mxu1 %v7497_v41 }
 0x71e   :  { %3147 = vmatpush1.bf16.msra.mxu0 %v7503_v34  ;;  %3190 = vmatpush1.bf16.msra.mxu1 %v7509_v43 }
 0x71f   :  { %3276 = vmatprep.subr.bf16.mxu0 %v7515_v47  ;;  %3319 = vmatprep.subr.bf16.mxu1 %v7521_v39 }
 0x721   :  { %3165 = vmatmul.mubr.bf16.vlgmr.msra.gmra.mxu0 %v2956_v26  ;;  %3208 = vmatmul.mubr.bf16.vlgmr.msra.gmra.mxu1 %v2956_v26  ;;  %v9125_v26 = vld [vmem:[#allocation41_spill] sm:$0xff] }
 0x722   :  { %3277 = vmatpush1.bf16.msra.mxu0 %v7527_v53  ;;  %3320 = vmatpush1.bf16.msra.mxu1 %v7533_v2 }
 0x723   :  { %3278 = vmatprep.subr.bf16.mxu0 %v7539_v7  ;;  %3321 = vmatprep.subr.bf16.mxu1 %v7545_v52 }
 0x726   :  { %3279 = vmatpush1.bf16.msra.mxu0 %v9079_v5  ;;  %3322 = vmatpush1.bf16.msra.mxu1 %v9080_v63 }
 0x727   :  { %3280 = vmatprep.subr.bf16.mxu0 %v9081_v60  ;;  %3323 = vmatprep.subr.bf16.mxu1 %v9082_v30 }
 0x72a   :  { %3281 = vmatpush1.bf16.msra.mxu0 %v9083_v13  ;;  %3324 = vmatpush1.bf16.msra.mxu1 %v9084_v21 }
 0x72b   :  { %3282 = vmatprep.subr.bf16.mxu0 %v9085_v36  ;;  %3325 = vmatprep.subr.bf16.mxu1 %v9086_v55 }
 0x72e   :  { %3283 = vmatpush1.bf16.msra.mxu0 %v9087_v15  ;;  %3326 = vmatpush1.bf16.msra.mxu1 %v9088_v37 }
 0x72f   :  { %3284 = vmatprep.subr.bf16.mxu0 %v9089_v31  ;;  %3327 = vmatprep.subr.bf16.mxu1 %v9090_v0 }
 0x732   :  { %3285 = vmatpush1.bf16.msra.mxu0 %v9091_v16  ;;  %3328 = vmatpush1.bf16.msra.mxu1 %v9092_v14 }
 0x733   :  { %3286 = vmatprep.subr.bf16.mxu0 %v9093_v35  ;;  %3329 = vmatprep.subr.bf16.mxu1 %v9094_v46 }
 0x736   :  { %3287 = vmatpush1.bf16.msra.mxu0 %v9095_v29  ;;  %3330 = vmatpush1.bf16.msra.mxu1 %v9096_v27 }
 0x737   :  { %3288 = vmatprep.subr.bf16.mxu0 %v9097_v10  ;;  %3331 = vmatprep.subr.bf16.mxu1 %v9098_v6 }
 0x73a   :  { %3289 = vmatpush1.bf16.msra.mxu0 %v9099_v40  ;;  %3332 = vmatpush1.bf16.msra.mxu1 %v9100_v61 }
 0x73b   :  { %3290 = vmatprep.subr.bf16.mxu0 %v9101_v38  ;;  %3333 = vmatprep.subr.bf16.mxu1 %v9102_v3 }
 0x73e   :  { %3291 = vmatpush1.bf16.msra.mxu0 %v9103_v49  ;;  %3334 = vmatpush1.bf16.msra.mxu1 %v9104_v28 }
 0x73f   :  { %3292 = vmatprep.subr.bf16.mxu0 %v9105_v54  ;;  %3335 = vmatprep.subr.bf16.mxu1 %v9106_v23 }
 0x742   :  { %3293 = vmatpush2.bf16.msra.mxu0 %v9107_v25  ;;  %3336 = vmatpush2.bf16.msra.mxu1 %v9108_v22 }
 0x743   :  { %3294 = vmatprep.subr.bf16.mxu0 %v9109_v32  ;;  %3337 = vmatprep.subr.bf16.mxu1 %v9110_v17 }
 0x746   :  { %3295 = vmatpush2.bf16.msra.mxu0 %v9111_v58  ;;  %3338 = vmatpush2.bf16.msra.mxu1 %v9112_v8  ;;  %v9140_v8 = vld [vmem:[#allocation6_spill] sm:$0xff] }
 0x747   :  { %3296 = vmatprep.subr.bf16.mxu0 %v9113_v12  ;;  %3339 = vmatprep.subr.bf16.mxu1 %v9114_v4 }
 0x74a   :  { %3297 = vmatpush2.bf16.msra.mxu0 %v9115_v33  ;;  %3340 = vmatpush2.bf16.msra.mxu1 %v9116_v59  ;;  %v9126_v33 = vld [vmem:[#allocation42_spill] sm:$0xff]  ;;  %v9127_v59 = vld [vmem:[#allocation43_spill] sm:$0xff] }
 0x74b   :  { %3298 = vmatprep.subr.bf16.mxu0 %v9117_v44  ;;  %3341 = vmatprep.subr.bf16.mxu1 %v9118_v48  ;;  %v9128_v44 = vld [vmem:[#allocation45_spill] sm:$0xff]  ;;  %v9129_v48 = vld [vmem:[#allocation47_spill] sm:$0xff] }
 0x74e   :  { %3299 = vmatpush2.bf16.msra.mxu0 %v9119_v20  ;;  %3342 = vmatpush2.bf16.msra.mxu1 %v9120_v24  ;;  %v9130_v20 = vld [vmem:[#allocation49_spill] sm:$0xff]  ;;  %v9131_v24 = vld [vmem:[#allocation44_spill] sm:$0xff] }
 0x74f   :  { %3300 = vmatprep.subr.bf16.mxu0 %v9121_v62  ;;  %3343 = vmatprep.subr.bf16.mxu1 %v9122_v19  ;;  %v9132_v62 = vld [vmem:[#allocation46_spill] sm:$0xff]  ;;  %v9133_v19 = vld [vmem:[#allocation48_spill] sm:$0xff] }
 0x752   :  { %3301 = vmatpush2.bf16.msra.mxu0 %v9123_v18  ;;  %3344 = vmatpush2.bf16.msra.mxu1 %v9124_v42  ;;  %v9134_v18 = vld [vmem:[#allocation50_spill] sm:$0xff]  ;;  %v9135_v42 = vld [vmem:[#allocation99_spill] sm:$0xff] }
 0x753   :  { %3302 = vmatprep.subr.bf16.mxu0 %v9125_v26  ;;  %3345 = vmatprep.subr.bf16.mxu1 %v9126_v33  ;;  %v9136_v26 = vld [vmem:[#allocation100_spill] sm:$0xff]  ;;  %v9137_v33 = vld [vmem:[#allocation55_spill] sm:$0xff] }
 0x756   :  { %3303 = vmatpush2.bf16.msra.mxu0 %v9127_v59  ;;  %3346 = vmatpush2.bf16.msra.mxu1 %v9128_v44  ;;  %v9138_v59 = vld [vmem:[#allocation57_spill] sm:$0xff] }
 0x757   :  { %3304 = vmatprep.subr.bf16.mxu0 %v9129_v48  ;;  %3347 = vmatprep.subr.bf16.mxu1 %v9130_v20  ;;  %v9139_v48 = vld [vmem:[#allocation5_spill] sm:$0xff] }
 0x75a   :  { %3305 = vmatpush2.bf16.msra.mxu0 %v9131_v24  ;;  %3348 = vmatpush2.bf16.msra.mxu1 %v9132_v62 }
 0x75b   :  { %3306 = vmatprep.subr.bf16.mxu0 %v9133_v19  ;;  %3349 = vmatprep.subr.bf16.mxu1 %v9134_v18 }
 0x75e   :  { %3307 = vmatpush2.bf16.msra.mxu0 %v9135_v42  ;;  %3350 = vmatpush2.bf16.msra.mxu1 %v9136_v26 }
 0x75f   :  { %3450 = vmatprep.subr.bf16.mxu0 %v9137_v33  ;;  %3493 = vmatprep.subr.bf16.mxu1 %v9138_v59 }
 0x7c1   :  { %v2992_v44 = vpop.f32.mrf.mxu0  ;;  %v3035_v20 = vpop.f32.mrf.mxu1 }
 0x7c2   :  { %v2993_v4 = vadd.f32 %v2992_v44, %v9139_v48  ;;  %v9141_v44 = vld [vmem:[#allocation7_spill] sm:$0xff] }
 0x7c3   :  { %v2994_v12 = vpop.f32.mrf.mxu0  ;;  %v3037_v18 = vpop.f32.mrf.mxu1  ;;  %v3036_v22 = vadd.f32 %v3035_v20, %v9141_v44 }
 0x7c4   :  { %v4284_v24 = vmul.f32 -1.442695, %v2993_v4  ;;  %v2995_v62 = vadd.f32 %v2994_v12, %v9140_v8 }
 0x7c5   :  { %v2996_v58 = vpop.f32.mrf.mxu0  ;;  %v3039_v59 = vpop.f32.mrf.mxu1  ;;  %v4286_v12 = vmul.f32 -1.442695, %v3036_v22 }
 0x7c6   :  { %5010 = vpow2.f32 %v4284_v24  ;;  %v4285_v19 = vmul.f32 -1.442695, %v2995_v62  ;;  %v2997_v42 = vadd.f32 %v2996_v58, %v9139_v48  ;;  %v3040_v4 = vadd.f32 %v3039_v59, %v9141_v44  ;;  %v9142_v62 = vld [vmem:[#allocation8_spill] sm:$0xff]  ;;  %v9144_v44 = vld [vmem:[#allocation85_spill] sm:$0xff] }
 0x7c7   :  { %v2998_v17 = vpop.f32.mrf.mxu0  ;;  %v3038_v23 = vadd.f32 %v3037_v18, %v9142_v62  ;;  %v3041_v58 = vpop.f32.mrf.mxu1 }
 0x7c8   :  { %5012 = vpow2.f32 %v4285_v19  ;;  %v4287_v26 = vmul.f32 -1.442695, %v2997_v42  ;;  %v2999_v33 = vadd.f32 %v2998_v17, %v9140_v8  ;;  %v4289_v25 = vmul.f32 -1.442695, %v3040_v4  ;;  %v9143_v4 = vld [vmem:[#allocation83_spill] sm:$0xff] }
 0x7ca   :  { %5014 = vpow2.f32 %v4287_v26  ;;  %v4288_v32 = vmul.f32 -1.442695, %v2999_v33  ;;  %v3042_v26 = vadd.f32 %v3041_v58, %v9142_v62 }
 0x7cc   :  { %5016 = vpow2.f32 %v4288_v32 }
 0x7cd   :  { %5018 = vpow2.f32 %v4286_v12 }
 0x7ce   :  { %5020 = vpow2.f32 %v4289_v25 }
 0x7d3   :  { %v5011_v24 = vpop.eup %5010 }
 0x7d4   :  { %v3062_v54 = vadd.f32 1.0, %v5011_v24 }
 0x7d5   :  { %v5013_v19 = vpop.eup %5012 }
 0x7d6   :  { %5022 = vrcp.f32 %v3062_v54  ;;  %v3063_v17 = vadd.f32 1.0, %v5013_v19 }
 0x7d7   :  { %v5015_v42 = vpop.eup %5014  ;;  %5024 = vtanh.f32 %v3038_v23 }
 0x7d8   :  { %5026 = vrcp.f32 %v3063_v17  ;;  %v3065_v32 = vadd.f32 1.0, %v5015_v42 }
 0x7d9   :  { %v5017_v20 = vpop.eup %5016 }
 0x7da   :  { %5028 = vrcp.f32 %v3065_v32  ;;  %v3066_v22 = vadd.f32 1.0, %v5017_v20  ;;  %v5019_v33 = vpop.eup %5018 }
 0x7db   :  { %5030 = vtanh.f32 %v3042_v26  ;;  %v5021_v59 = vpop.eup %5020  ;;  %v3064_v58 = vadd.f32 1.0, %v5019_v33  ;;  %v9146_v33 = vld [vmem:[#allocation89_spill] sm:$0xff] }
 0x7dc   :  { %5032 = vrcp.f32 %v3066_v22  ;;  %v3067_v42 = vadd.f32 1.0, %v5021_v59  ;;  %v9145_v22 = vld [vmem:[#allocation87_spill] sm:$0xff] }
 0x7e1   :  { %v3166_v18 = vpop.f32.mrf.mxu0  ;;  %v3209_v26 = vpop.f32.mrf.mxu1 }
 0x7e2   :  { %v3218_v12 = vadd.f32 %v3166_v18, %v9143_v4 }
 0x7e3   :  { %v5023_v24 = vpop.eup %5022  ;;  %v3168_v25 = vpop.f32.mrf.mxu0 }
 0x7e4   :  { %v5025_v54 = vpop.eup %5024  ;;  %v4291_v19 = vmul.f32 -1.442695, %v3218_v12  ;;  %v3219_v23 = vadd.f32 %v3168_v25, %v9144_v44 }
 0x7e5   :  { %v5027_v8 = vpop.eup %5026  ;;  %v3084_v17 = vmul.f32 %v5025_v54, %v5023_v24  ;;  %v3170_v62 = vpop.f32.mrf.mxu0 }
 0x7e6   :  { %v3082_v32 = vmul.f32 %v5027_v8, %v7910_v11  ;;  %5034 = vpow2.f32 %v4291_v19  ;;  %v4292_v20 = vmul.f32 -1.442695, %v3219_v23  ;;  %v3222_v48 = vadd.f32 %v3170_v62, %v9145_v22  ;;  %v3211_v8 = vpop.f32.mrf.mxu1  ;;  %v9148_v23 = vld [vmem:[#allocation86_spill] sm:$0xff] }
 0x7e7   :  { %v5029_v28 = vpop.eup %5028  ;;  %v3172_v18 = vpop.f32.mrf.mxu0 }
 0x7e8   :  { %v5031_v4 = vpop.eup %5030  ;;  %v8040_v49 = vadd.f32 %v3084_v17, %v3082_v32  ;;  %5036 = vpow2.f32 %v4292_v20  ;;  %v4294_v12 = vmul.f32 -1.442695, %v3222_v48  ;;  %v3223_v24 = vadd.f32 %v3172_v18, %v9146_v33  ;;  %v3213_v54 = vpop.f32.mrf.mxu1  ;;  %v9147_v48 = vld [vmem:[#allocation84_spill] sm:$0xff] }
 0x7e9   :  { %v5033_v44 = vpop.eup %5032  ;;  %5038 = vrcp.f32 %v3064_v58  ;;  %v3085_v11 = vmul.f32 %v5031_v4, %v5029_v28  ;;  %v3220_v19 = vadd.f32 %v3209_v26, %v9147_v48  ;;  %v3221_v58 = vadd.f32 %v3211_v8, %v9148_v23  ;;  %v9149_v17 = vld [vmem:[#allocation88_spill] sm:$0xff] }
 0x7ea   :  { %5040 = vrcp.f32 %v3067_v42  ;;  %v3083_v59 = vmul.f32 %v5033_v44, %v7915_v9  ;;  %v4295_v25 = vmul.f32 -1.442695, %v3223_v24  ;;  %v3224_v42 = vadd.f32 %v3213_v54, %v9149_v17  ;;  %v3215_v28 = vpop.f32.mrf.mxu1  ;;  %v9150_v44 = vld [vmem:[#allocation90_spill] sm:$0xff] }
 0x7eb   :  { %5042 = vpow2.f32 %v4294_v12  ;;  %v4293_v9 = vmul.f32 -1.442695, %v3220_v19  ;;  %v3225_v33 = vadd.f32 %v3215_v28, %v9150_v44 }
 0x7ec   :  { %5044 = vtanh.f32 %v8040_v49  ;;  %v8045_v62 = vadd.f32 %v3085_v11, %v3083_v59  ;;  %v4296_v18 = vmul.f32 -1.442695, %v3224_v42 }
 0x7ed   :  { %5046 = vpow2.f32 %v4295_v25 }
 0x7ee   :  { %5048 = vtanh.f32 %v8045_v62 }
 0x7ef   :  { %5050 = vtanh.f32 %v3221_v58 }
 0x7f3   :  { %v5035_v32 = vpop.eup %5034 }
 0x7f4   :  { %v3244_v20 = vadd.f32 1.0, %v5035_v32 }
 0x7f5   :  { %v5037_v22 = vpop.eup %5036 }
 0x7f6   :  { %v5039_v4 = vpop.eup %5038  ;;  %5052 = vrcp.f32 %v3244_v20  ;;  %v3245_v12 = vadd.f32 1.0, %v5037_v22 }
 0x7f7   :  { %v5041_v24 = vpop.eup %5040  ;;  %5054 = vpow2.f32 %v4293_v9 }
 0x7f8   :  { %v5043_v59 = vpop.eup %5042  ;;  %5056 = vrcp.f32 %v3245_v12 }
 0x7f9   :  { %v5045_v26 = vpop.eup %5044  ;;  %v3247_v11 = vadd.f32 1.0, %v5043_v59  ;;  %5058 = vpow2.f32 %v4296_v18 }
 0x7fa   :  { %v5047_v8 = vpop.eup %5046  ;;  %5060 = vtanh.f32 %v3225_v33  ;;  %v3090_v48 = vmul.f32 %v5045_v26, %v5039_v4 }
 0x7fb   :  { %v5049_v25 = vpop.eup %5048  ;;  %5062 = vrcp.f32 %v3247_v11  ;;  %v3248_v54 = vadd.f32 1.0, %v5047_v8 }
 0x7fc   :  { %v3091_v19 = vmul.f32 %v5049_v25, %v5041_v24  ;;  %v5051_v58 = vpop.eup %5050 }
 0x7fd   :  { %5064 = vrcp.f32 %v3248_v54 }
 0x7fe   :  { %v3275_v23 = vpack.c.bf16 %v3091_v19, %v3090_v48 }
 0x800   :  { %3308 = vmatprep.mubr.bf16.mxu0 %v3275_v23  ;;  %3351 = vmatprep.mubr.bf16.mxu1 %v3275_v23  ;;  %v5363_v23 = vld [vmem:[%s8359_s3 + $0xe8] ss:$16 sps:$4 sm:$0xff]  }
 0x803   :  { %v5053_v17 = vpop.eup %5052 }
 0x804   :  { %v5055_v42 = vpop.eup %5054  ;;  %v3266_v32 = vmul.f32 %v5053_v17, %v5051_v58  ;;  %v5364_v58 = vld [vmem:[%s8359_s3 + $0xc4] ss:$16 sps:$4 sm:$0xff]   ;;  %v5365_v17 = vld [vmem:[%s8359_s3 + $0xcc] ss:$16 sps:$4 sm:$0xff]  }
 0x805   :  { %v5057_v9 = vpop.eup %5056  ;;  %v3246_v12 = vadd.f32 1.0, %v5055_v42  ;;  %v5366_v42 = vld [vmem:[%s8359_s3 + $0xc0] ss:$16 sps:$4 sm:$0xff]  }
 0x806   :  { %v5059_v28 = vpop.eup %5058  ;;  %v3264_v20 = vmul.f32 %v5057_v9, %v7923_v1  ;;  %v5368_v9 = vld [vmem:[%s8359_s3 + $0xa4] ss:$16 sps:$4 sm:$0xff]  }
 0x807   :  { %v5061_v22 = vpop.eup %5060  ;;  %v3249_v24 = vadd.f32 1.0, %v5059_v28  ;;  %5066 = vrcp.f32 %v3246_v12  ;;  %v5369_v28 = vld [vmem:[%s8359_s3 + $0xac] ss:$16 sps:$4 sm:$0xff]   ;;  %v5374_v12 = vld [vmem:[%s8359_s3 + $0x80] ss:$16 sps:$4 sm:$0xff]  }
 0x808   :  { %v5063_v18 = vpop.eup %5062  ;;  %v8053_v44 = vadd.f32 %v3266_v32, %v3264_v20  ;;  %v5367_v32 = vld [vmem:[%s8359_s3 + $0xc8] ss:$16 sps:$4 sm:$0xff]  }
 0x809   :  { %v3267_v33 = vmul.f32 %v5063_v18, %v5061_v22  ;;  %v5371_v20 = vld [vmem:[%s8359_s3 + $0xa8] ss:$16 sps:$4 sm:$0xff]   ;;  %v5372_v22 = vld [vmem:[%s8359_s3 + $0x84] ss:$16 sps:$4 sm:$0xff]   ;;  %v5373_v18 = vld [vmem:[%s8359_s3 + $0x8c] ss:$16 sps:$4 sm:$0xff]  }
 0x80a   :  { %v5065_v4 = vpop.eup %5064  ;;  %5068 = vtanh.f32 %v8053_v44 }
 0x80b   :  { %v3265_v59 = vmul.f32 %v5065_v4, %v7927_v57  ;;  %5070 = vrcp.f32 %v3249_v24  ;;  %v5362_v57 = vld [vmem:[%s8359_s3 + $0xe0] ss:$16 sps:$4 sm:$0xff]   ;;  %v5376_v4 = vld [vmem:[%s8359_s3 + $0x64] ss:$16 sps:$4 sm:$0xff]   ;;  %v5377_v24 = vld [vmem:[%s8359_s3 + $0x6c] ss:$16 sps:$4 sm:$0xff]  }
 0x80d   :  { %v8057_v26 = vadd.f32 %v3267_v33, %v3265_v59  ;;  %v5375_v33 = vld [vmem:[%s8359_s3 + $0x88] ss:$16 sps:$4 sm:$0xff]   ;;  %v5378_v59 = vld [vmem:[%s8359_s3 + $0x60] ss:$16 sps:$4 sm:$0xff]  }
 0x80f   :  { %5072 = vtanh.f32 %v8057_v26 }
 0x814   :  { %v5067_v11 = vpop.eup %5066 }
 0x817   :  { %v5069_v1 = vpop.eup %5068 }
 0x818   :  { %v5071_v8 = vpop.eup %5070  ;;  %v3272_v54 = vmul.f32 %v5069_v1, %v5067_v11  ;;  %v5379_v11 = vld [vmem:[%s8359_s3 + $0x68] ss:$16 sps:$4 sm:$0xff]   ;;  %v5380_v1 = vld [vmem:[%s8359_s3 + $0x44] ss:$16 sps:$4 sm:$0xff]  }
 0x81c   :  { %v5073_v25 = vpop.eup %5072 }
 0x81d   :  { %v3273_v48 = vmul.f32 %v5073_v25, %v5071_v8  ;;  %v5381_v8 = vld [vmem:[%s8359_s3 + $0x4c] ss:$16 sps:$4 sm:$0xff]   ;;  %v5382_v25 = vld [vmem:[%s8359_s3 + $0x40] ss:$16 sps:$4 sm:$0xff]  }
 0x81f   :  { %v3274_v19 = vpack.c.bf16 %v3273_v48, %v3272_v54  ;;  %v5383_v54 = vld [vmem:[%s8359_s3 + $0x48] ss:$16 sps:$4 sm:$0xff]   ;;  %v5384_v48 = vld [vmem:[%s8359_s3 + $0x24] ss:$16 sps:$4 sm:$0xff]  }
 0x821   :  { %3309 = vmatmul.mubr.bf16.vlgmr.msra.gmra.mxu0 %v3274_v19  ;;  %3352 = vmatmul.mubr.bf16.vlgmr.msra.gmra.mxu1 %v3274_v19 }
 0x822   :  { %3451 = vmatpush1.bf16.msra.mxu0 %v5362_v57  ;;  %3494 = vmatpush1.bf16.msra.mxu1 %v5363_v23  ;;  %v5385_v57 = vld [vmem:[%s8359_s3 + $0x20] ss:$16 sps:$4 sm:$0xff]  }
 0x823   :  { %3452 = vmatprep.subr.bf16.mxu0 %v5364_v58  ;;  %3495 = vmatprep.subr.bf16.mxu1 %v5365_v17 }
 0x824   :  { %3482 = vmatprep.mubr.bf16.mxu0 %v8768_v45  ;;  %3525 = vmatprep.mubr.bf16.mxu1 %v8768_v45  ;;  %v5370_v45 = vld [vmem:[%s8359_s3 + $0xa0] ss:$16 sps:$4 sm:$0xff]  }
 0x826   :  { %3453 = vmatpush1.bf16.msra.mxu0 %v5366_v42  ;;  %3496 = vmatpush1.bf16.msra.mxu1 %v5367_v32  ;;  %v9186_v42 = vld [vmem:[#allocation6_spill] sm:$0xff] }
 0x827   :  { %3454 = vmatprep.subr.bf16.mxu0 %v5368_v9  ;;  %3497 = vmatprep.subr.bf16.mxu1 %v5369_v28 }
 0x82a   :  { %3455 = vmatpush1.bf16.msra.mxu0 %v5370_v45  ;;  %3498 = vmatpush1.bf16.msra.mxu1 %v5371_v20 }
 0x82b   :  { %3456 = vmatprep.subr.bf16.mxu0 %v5372_v22  ;;  %3499 = vmatprep.subr.bf16.mxu1 %v5373_v18 }
 0x82e   :  { %3457 = vmatpush1.bf16.msra.mxu0 %v5374_v12  ;;  %3500 = vmatpush1.bf16.msra.mxu1 %v5375_v33 }
 0x82f   :  { %3458 = vmatprep.subr.bf16.mxu0 %v5376_v4  ;;  %3501 = vmatprep.subr.bf16.mxu1 %v5377_v24  ;;  %v9187_v24 = vld [vmem:[#allocation7_spill] sm:$0xff] }
 0x832   :  { %3459 = vmatpush1.bf16.msra.mxu0 %v5378_v59  ;;  %3502 = vmatpush1.bf16.msra.mxu1 %v5379_v11 }
 0x833   :  { %3460 = vmatprep.subr.bf16.mxu0 %v5380_v1  ;;  %3503 = vmatprep.subr.bf16.mxu1 %v5381_v8 }
 0x836   :  { %3461 = vmatpush1.bf16.msra.mxu0 %v5382_v25  ;;  %3504 = vmatpush1.bf16.msra.mxu1 %v5383_v54  ;;  %v9188_v54 = vld [vmem:[#allocation8_spill] sm:$0xff] }
 0x837   :  { %3462 = vmatprep.subr.bf16.mxu0 %v5384_v48  ;;  %3505 = vmatprep.subr.bf16.mxu1 %v7478_v56  ;;  %v9151_v56 = vld [vmem:[#allocation29_spill] sm:$0xff] }
 0x83a   :  { %3463 = vmatpush1.bf16.msra.mxu0 %v5385_v57  ;;  %3506 = vmatpush1.bf16.msra.mxu1 %v7485_v51  ;;  %v9152_v51 = vld [vmem:[#allocation30_spill] sm:$0xff] }
 0x83b   :  { %3464 = vmatprep.subr.bf16.mxu0 %v7491_v50  ;;  %3507 = vmatprep.subr.bf16.mxu1 %v7497_v41  ;;  %v9153_v50 = vld [vmem:[#allocation31_spill] sm:$0xff]  ;;  %v9154_v41 = vld [vmem:[#allocation32_spill] sm:$0xff] }
 0x83e   :  { %3465 = vmatpush1.bf16.msra.mxu0 %v7503_v34  ;;  %3508 = vmatpush1.bf16.msra.mxu1 %v7509_v43  ;;  %v9155_v34 = vld [vmem:[#allocation3_spill] sm:$0xff]  ;;  %v9156_v43 = vld [vmem:[#allocation4_spill] sm:$0xff] }
 0x83f   :  { %3594 = vmatprep.subr.bf16.mxu0 %v7515_v47  ;;  %3637 = vmatprep.subr.bf16.mxu1 %v7521_v39  ;;  %v9157_v47 = vld [vmem:[#allocation59_spill] sm:$0xff]  ;;  %v9158_v39 = vld [vmem:[#allocation61_spill] sm:$0xff] }
 0x841   :  { %3483 = vmatmul.mubr.bf16.vlgmr.msra.gmra.mxu0 %v3274_v19  ;;  %3526 = vmatmul.mubr.bf16.vlgmr.msra.gmra.mxu1 %v3274_v19 }
 0x842   :  { %3595 = vmatpush1.bf16.msra.mxu0 %v7527_v53  ;;  %3638 = vmatpush1.bf16.msra.mxu1 %v7533_v2  ;;  %v9159_v53 = vld [vmem:[#allocation63_spill] sm:$0xff]  ;;  %v9160_v2 = vld [vmem:[#allocation65_spill] sm:$0xff] }
 0x843   :  { %3596 = vmatprep.subr.bf16.mxu0 %v7539_v7  ;;  %3639 = vmatprep.subr.bf16.mxu1 %v7545_v52  ;;  %v9161_v7 = vld [vmem:[#allocation60_spill] sm:$0xff]  ;;  %v9162_v52 = vld [vmem:[#allocation62_spill] sm:$0xff] }
 0x846   :  { %3597 = vmatpush1.bf16.msra.mxu0 %v9079_v5  ;;  %3640 = vmatpush1.bf16.msra.mxu1 %v9080_v63  ;;  %v9163_v5 = vld [vmem:[#allocation64_spill] sm:$0xff]  ;;  %v9164_v63 = vld [vmem:[#allocation66_spill] sm:$0xff] }
 0x847   :  { %3598 = vmatprep.subr.bf16.mxu0 %v9081_v60  ;;  %3641 = vmatprep.subr.bf16.mxu1 %v9082_v30  ;;  %v9165_v60 = vld [vmem:[#allocation33_spill] sm:$0xff]  ;;  %v9166_v30 = vld [vmem:[#allocation34_spill] sm:$0xff] }
 0x84a   :  { %3599 = vmatpush1.bf16.msra.mxu0 %v9083_v13  ;;  %3642 = vmatpush1.bf16.msra.mxu1 %v9084_v21  ;;  %v9167_v13 = vld [vmem:[#allocation35_spill] sm:$0xff]  ;;  %v9168_v21 = vld [vmem:[#allocation36_spill] sm:$0xff] }
 0x84b   :  { %3600 = vmatprep.subr.bf16.mxu0 %v9085_v36  ;;  %3643 = vmatprep.subr.bf16.mxu1 %v9086_v55  ;;  %v9169_v36 = vld [vmem:[#allocation37_spill] sm:$0xff]  ;;  %v9170_v55 = vld [vmem:[#allocation38_spill] sm:$0xff] }
 0x84e   :  { %3601 = vmatpush1.bf16.msra.mxu0 %v9087_v15  ;;  %3644 = vmatpush1.bf16.msra.mxu1 %v9088_v37  ;;  %v9171_v15 = vld [vmem:[#allocation39_spill] sm:$0xff]  ;;  %v9172_v37 = vld [vmem:[#allocation40_spill] sm:$0xff] }
 0x84f   :  { %3602 = vmatprep.subr.bf16.mxu0 %v9089_v31  ;;  %3645 = vmatprep.subr.bf16.mxu1 %v9090_v0  ;;  %v9173_v31 = vld [vmem:[#allocation41_spill] sm:$0xff]  ;;  %v9174_v0 = vld [vmem:[#allocation42_spill] sm:$0xff] }
 0x852   :  { %3603 = vmatpush1.bf16.msra.mxu0 %v9091_v16  ;;  %3646 = vmatpush1.bf16.msra.mxu1 %v9092_v14  ;;  %v9175_v16 = vld [vmem:[#allocation43_spill] sm:$0xff]  ;;  %v9176_v14 = vld [vmem:[#allocation45_spill] sm:$0xff] }
 0x853   :  { %3604 = vmatprep.subr.bf16.mxu0 %v9093_v35  ;;  %3647 = vmatprep.subr.bf16.mxu1 %v9094_v46  ;;  %v9177_v35 = vld [vmem:[#allocation47_spill] sm:$0xff]  ;;  %v9178_v46 = vld [vmem:[#allocation49_spill] sm:$0xff] }
 0x856   :  { %3605 = vmatpush1.bf16.msra.mxu0 %v9095_v29  ;;  %3648 = vmatpush1.bf16.msra.mxu1 %v9096_v27  ;;  %v9179_v29 = vld [vmem:[#allocation44_spill] sm:$0xff]  ;;  %v9180_v27 = vld [vmem:[#allocation46_spill] sm:$0xff] }
 0x857   :  { %3606 = vmatprep.subr.bf16.mxu0 %v9097_v10  ;;  %3649 = vmatprep.subr.bf16.mxu1 %v9098_v6  ;;  %v9181_v10 = vld [vmem:[#allocation48_spill] sm:$0xff]  ;;  %v9182_v6 = vld [vmem:[#allocation50_spill] sm:$0xff] }
 0x85a   :  { %3607 = vmatpush1.bf16.msra.mxu0 %v9099_v40  ;;  %3650 = vmatpush1.bf16.msra.mxu1 %v9100_v61  ;;  %v9183_v40 = vld [vmem:[#allocation99_spill] sm:$0xff]  ;;  %v9184_v61 = vld [vmem:[#allocation100_spill] sm:$0xff] }
 0x85b   :  { %3608 = vmatprep.subr.bf16.mxu0 %v9101_v38  ;;  %3651 = vmatprep.subr.bf16.mxu1 %v9102_v3  ;;  %v9185_v3 = vld [vmem:[#allocation5_spill] sm:$0xff] }
 0x85e   :  { %3609 = vmatpush1.bf16.msra.mxu0 %v9151_v56  ;;  %3652 = vmatpush1.bf16.msra.mxu1 %v9152_v51 }
 0x85f   :  { %3610 = vmatprep.subr.bf16.mxu0 %v9153_v50  ;;  %3653 = vmatprep.subr.bf16.mxu1 %v9154_v41 }
 0x862   :  { %3611 = vmatpush2.bf16.msra.mxu0 %v9155_v34  ;;  %3654 = vmatpush2.bf16.msra.mxu1 %v9156_v43 }
 0x863   :  { %3612 = vmatprep.subr.bf16.mxu0 %v9157_v47  ;;  %3655 = vmatprep.subr.bf16.mxu1 %v9158_v39 }
 0x866   :  { %3613 = vmatpush2.bf16.msra.mxu0 %v9159_v53  ;;  %3656 = vmatpush2.bf16.msra.mxu1 %v9160_v2 }
 0x867   :  { %3614 = vmatprep.subr.bf16.mxu0 %v9161_v7  ;;  %3657 = vmatprep.subr.bf16.mxu1 %v9162_v52  ;;  %v9189_v52 = vld [vmem:[#allocation91_spill] sm:$0xff] }
 0x86a   :  { %3615 = vmatpush2.bf16.msra.mxu0 %v9163_v5  ;;  %3658 = vmatpush2.bf16.msra.mxu1 %v9164_v63 }
 0x86b   :  { %3616 = vmatprep.subr.bf16.mxu0 %v9165_v60  ;;  %3659 = vmatprep.subr.bf16.mxu1 %v9166_v30 }
 0x86e   :  { %3617 = vmatpush2.bf16.msra.mxu0 %v9167_v13  ;;  %3660 = vmatpush2.bf16.msra.mxu1 %v9168_v21  ;;  %v9190_v21 = vld [vmem:[#allocation93_spill] sm:$0xff] }
 0x86f   :  { %3618 = vmatprep.subr.bf16.mxu0 %v9169_v36  ;;  %3661 = vmatprep.subr.bf16.mxu1 %v9170_v55 }
 0x872   :  { %3619 = vmatpush2.bf16.msra.mxu0 %v9171_v15  ;;  %3662 = vmatpush2.bf16.msra.mxu1 %v9172_v37 }
 0x873   :  { %3620 = vmatprep.subr.bf16.mxu0 %v9173_v31  ;;  %3663 = vmatprep.subr.bf16.mxu1 %v9174_v0 }
 0x876   :  { %3621 = vmatpush2.bf16.msra.mxu0 %v9175_v16  ;;  %3664 = vmatpush2.bf16.msra.mxu1 %v9176_v14 }
 0x877   :  { %3622 = vmatprep.subr.bf16.mxu0 %v9177_v35  ;;  %3665 = vmatprep.subr.bf16.mxu1 %v9178_v46  ;;  %v9191_v46 = vld [vmem:[#allocation95_spill] sm:$0xff] }
 0x87a   :  { %3623 = vmatpush2.bf16.msra.mxu0 %v9179_v29  ;;  %3666 = vmatpush2.bf16.msra.mxu1 %v9180_v27 }
 0x87b   :  { %3624 = vmatprep.subr.bf16.mxu0 %v9181_v10  ;;  %3667 = vmatprep.subr.bf16.mxu1 %v9182_v6 }
 0x87e   :  { %3625 = vmatpush2.bf16.msra.mxu0 %v9183_v40  ;;  %3668 = vmatpush2.bf16.msra.mxu1 %v9184_v61 }
 0x8e1   :  { %v3310_v38 = vpop.f32.mrf.mxu0  ;;  %v3353_v23 = vpop.f32.mrf.mxu1 }
 0x8e2   :  { %v3311_v19 = vadd.f32 %v3310_v38, %v9185_v3  ;;  %v3354_v59 = vadd.f32 %v3353_v23, %v9187_v24 }
 0x8e3   :  { %v3312_v58 = vpop.f32.mrf.mxu0  ;;  %v3355_v45 = vpop.f32.mrf.mxu1 }
 0x8e4   :  { %v4297_v17 = vmul.f32 -1.442695, %v3311_v19  ;;  %v3313_v32 = vadd.f32 %v3312_v58, %v9186_v42  ;;  %v4299_v1 = vmul.f32 -1.442695, %v3354_v59  ;;  %v3356_v48 = vadd.f32 %v3355_v45, %v9188_v54  ;;  %v9192_v19 = vld [vmem:[#allocation97_spill] sm:$0xff] }
 0x8e5   :  { %v3314_v9 = vpop.f32.mrf.mxu0  ;;  %v3357_v33 = vpop.f32.mrf.mxu1 }
 0x8e6   :  { %5074 = vpow2.f32 %v4297_v17  ;;  %v4298_v28 = vmul.f32 -1.442695, %v3313_v32  ;;  %v3315_v20 = vadd.f32 %v3314_v9, %v9185_v3  ;;  %v3358_v11 = vadd.f32 %v3357_v33, %v9187_v24  ;;  %v9195_v33 = vld [vmem:[#allocation96_spill] sm:$0xff] }
 0x8e7   :  { %v3316_v22 = vpop.f32.mrf.mxu0  ;;  %v3359_v56 = vpop.f32.mrf.mxu1 }
 0x8e8   :  { %5076 = vpow2.f32 %v4298_v28  ;;  %v4300_v18 = vmul.f32 -1.442695, %v3315_v20  ;;  %v3317_v12 = vadd.f32 %v3316_v22, %v9186_v42  ;;  %v4302_v8 = vmul.f32 -1.442695, %v3358_v11  ;;  %v9193_v28 = vld [vmem:[#allocation92_spill] sm:$0xff] }
 0x8e9   :  { %v3360_v34 = vadd.f32 %v3359_v56, %v9188_v54 }
 0x8ea   :  { %5078 = vpow2.f32 %v4300_v18  ;;  %v4301_v4 = vmul.f32 -1.442695, %v3317_v12  ;;  %v9194_v18 = vld [vmem:[#allocation94_spill] sm:$0xff] }
 0x8ec   :  { %5080 = vpow2.f32 %v4301_v4 }
 0x8ed   :  { %5082 = vpow2.f32 %v4299_v1 }
 0x8ee   :  { %5084 = vpow2.f32 %v4302_v8 }
 0x8f3   :  { %v5075_v25 = vpop.eup %5074 }
 0x8f4   :  { %v3380_v57 = vadd.f32 1.0, %v5075_v25 }
 0x8f5   :  { %v5077_v51 = vpop.eup %5076 }
 0x8f6   :  { %5086 = vrcp.f32 %v3380_v57  ;;  %v3381_v50 = vadd.f32 1.0, %v5077_v51  ;;  %v9196_v57 = vld [vmem:[#allocation98_spill] sm:$0xff] }
 0x8f7   :  { %v5079_v41 = vpop.eup %5078  ;;  %5088 = vtanh.f32 %v3356_v48 }
 0x8f8   :  { %5090 = vrcp.f32 %v3381_v50  ;;  %v3383_v43 = vadd.f32 1.0, %v5079_v41 }
 0x8f9   :  { %v5081_v47 = vpop.eup %5080 }
 0x8fa   :  { %5092 = vrcp.f32 %v3383_v43  ;;  %v3384_v39 = vadd.f32 1.0, %v5081_v47  ;;  %v5083_v53 = vpop.eup %5082 }
 0x8fb   :  { %5094 = vtanh.f32 %v3360_v34  ;;  %v5085_v7 = vpop.eup %5084  ;;  %v3382_v15 = vadd.f32 1.0, %v5083_v53 }
 0x8fc   :  { %5096 = vrcp.f32 %v3384_v39  ;;  %v3385_v31 = vadd.f32 1.0, %v5085_v7 }
 0x901   :  { %v3484_v2 = vpop.f32.mrf.mxu0  ;;  %v3527_v14 = vpop.f32.mrf.mxu1 }
 0x902   :  { %v3536_v5 = vadd.f32 %v3484_v2, %v9189_v52  ;;  %v3538_v45 = vadd.f32 %v3527_v14, %v9193_v28  ;;  %v4641_v28 = vld [vmem:[%s8363_s6] sm:$0xff]  }
 0x903   :  { %v5087_v63 = vpop.eup %5086  ;;  %v3486_v60 = vpop.f32.mrf.mxu0 }
 0x904   :  { %v5089_v30 = vpop.eup %5088  ;;  %v4304_v13 = vmul.f32 -1.442695, %v3536_v5  ;;  %v3537_v36 = vadd.f32 %v3486_v60, %v9190_v21  ;;  %v3529_v17 = vpop.f32.mrf.mxu1  ;;  %v4306_v22 = vmul.f32 -1.442695, %v3538_v45  ;;  %v4642_v45 = vld [vmem:[%s8364_s8 + $0x38] sm:$0xff]  }
 0x905   :  { %v5091_v55 = vpop.eup %5090  ;;  %v3402_v37 = vmul.f32 %v5089_v30, %v5087_v63  ;;  %v3488_v0 = vpop.f32.mrf.mxu0  ;;  %v3539_v12 = vadd.f32 %v3529_v17, %v9194_v18  ;;  %v4639_v17 = vld [vmem:[%s8363_s6 + $0x10] sm:$0xff]   ;;  %v4645_v18 = vld [vmem:[%s8364_s8 + $0x20] sm:$0xff]  }
 0x906   :  { %v3400_v16 = vmul.f32 %v5091_v55, %v8040_v49  ;;  %5098 = vpow2.f32 %v4304_v13  ;;  %v4305_v35 = vmul.f32 -1.442695, %v3537_v36  ;;  %v3540_v29 = vadd.f32 %v3488_v0, %v9191_v46  ;;  %v3531_v20 = vpop.f32.mrf.mxu1 }
 0x907   :  { %v5093_v27 = vpop.eup %5092  ;;  %v3490_v10 = vpop.f32.mrf.mxu0  ;;  %v3542_v4 = vadd.f32 %v3531_v20, %v9195_v33  ;;  %v4643_v20 = vld [vmem:[%s8364_s8 + $0x30] sm:$0xff]  }
 0x908   :  { %v5095_v6 = vpop.eup %5094  ;;  %v8216_v40 = vadd.f32 %v3402_v37, %v3400_v16  ;;  %5100 = vpow2.f32 %v4305_v35  ;;  %v4307_v61 = vmul.f32 -1.442695, %v3540_v29  ;;  %v3541_v23 = vadd.f32 %v3490_v10, %v9192_v19  ;;  %v3533_v59 = vpop.f32.mrf.mxu1 }
 0x909   :  { %v5097_v38 = vpop.eup %5096  ;;  %5102 = vrcp.f32 %v3382_v15  ;;  %v3403_v49 = vmul.f32 %v5095_v6, %v5093_v27  ;;  %v4309_v8 = vmul.f32 -1.442695, %v3542_v4  ;;  %v3543_v56 = vadd.f32 %v3533_v59, %v9196_v57 }
 0x90a   :  { %5104 = vrcp.f32 %v3385_v31  ;;  %v3401_v58 = vmul.f32 %v5097_v38, %v8045_v62  ;;  %v4308_v32 = vmul.f32 -1.442695, %v3541_v23  ;;  %v4634_v38 = vld [vmem:[%s8363_s6 + $0x38] sm:$0xff]   ;;  %v5388_v19 = vmov 0.0   ;;  %v4636_v23 = vld [vmem:[%s8363_s6 + $0x28] sm:$0xff]  }
 0x90b   :  { %5106 = vpow2.f32 %v4307_v61  ;;  %4370 = vmatprep.subr.bf16.mxu0 %v5388_v19  ;;  %4390 = vmatprep.subr.bf16.mxu1 %v5388_v19 }
 0x90c   :  { %5108 = vtanh.f32 %v8216_v40  ;;  %v8221_v9 = vadd.f32 %v3403_v49, %v3401_v58  ;;  %v4637_v58 = vld [vmem:[%s8363_s6 + $0x20] sm:$0xff]   ;;  %v4638_v49 = vld [vmem:[%s8363_s6 + $0x18] sm:$0xff]  }
 0x90d   :  { %5110 = vpow2.f32 %v4308_v32  ;;  %v4640_v32 = vld [vmem:[%s8363_s6 + $0x8] sm:$0xff]  }
 0x90e   :  { %5112 = vtanh.f32 %v8221_v9 }
 0x90f   :  { %5114 = vpow2.f32 %v4306_v22  ;;  %v4644_v22 = vld [vmem:[%s8364_s8 + $0x28] sm:$0xff]  }
 0x910   :  { %5116 = vtanh.f32 %v3539_v12  ;;  %v4646_v12 = vld [vmem:[%s8364_s8 + $0x18] sm:$0xff]  }
 0x913   :  { %v5099_v62 = vpop.eup %5098 }
 0x914   :  { %v3562_v11 = vadd.f32 1.0, %v5099_v62 }
 0x915   :  { %v5101_v1 = vpop.eup %5100 }
 0x916   :  { %v5103_v25 = vpop.eup %5102  ;;  %5118 = vrcp.f32 %v3562_v11  ;;  %v3563_v48 = vadd.f32 1.0, %v5101_v1 }
 0x917   :  { %v5105_v51 = vpop.eup %5104 }
 0x918   :  { %v5107_v50 = vpop.eup %5106  ;;  %5120 = vrcp.f32 %v3563_v48 }
 0x919   :  { %v5109_v41 = vpop.eup %5108  ;;  %v3565_v34 = vadd.f32 1.0, %v5107_v50  ;;  %5122 = vpow2.f32 %v4309_v8 }
 0x91a   :  { %v5111_v43 = vpop.eup %5110  ;;  %5124 = vtanh.f32 %v3543_v56  ;;  %v3408_v53 = vmul.f32 %v5109_v41, %v5103_v25 }
 0x91b   :  { %v5113_v47 = vpop.eup %5112  ;;  %5126 = vrcp.f32 %v3565_v34  ;;  %v3566_v39 = vadd.f32 1.0, %v5111_v43 }
 0x91c   :  { %v3409_v2 = vmul.f32 %v5113_v47, %v5105_v51  ;;  %v5115_v52 = vpop.eup %5114 }
 0x91d   :  { %5128 = vrcp.f32 %v3566_v39  ;;  %v5117_v5 = vpop.eup %5116  ;;  %v3564_v13 = vadd.f32 1.0, %v5115_v52 }
 0x91e   :  { %v3593_v7 = vpack.c.bf16 %v3409_v2, %v3408_v53 }
 0x91f   :  { %5130 = vrcp.f32 %v3564_v13 }
 0x920   :  { %3626 = vmatprep.mubr.bf16.mxu0 %v3593_v7  ;;  %3669 = vmatprep.mubr.bf16.mxu1 %v3593_v7 }
 0x923   :  { %v5119_v63 = vpop.eup %5118 }
 0x924   :  { %v3584_v60 = vmul.f32 %v5119_v63, %v5117_v5 }
 0x925   :  { %v5121_v30 = vpop.eup %5120 }
 0x926   :  { %v5123_v21 = vpop.eup %5122  ;;  %v3582_v36 = vmul.f32 %v5121_v30, %v8053_v44 }
 0x927   :  { %v5125_v55 = vpop.eup %5124  ;;  %v3567_v16 = vadd.f32 1.0, %v5123_v21 }
 0x928   :  { %v5127_v15 = vpop.eup %5126  ;;  %v3586_v37 = vadd.f32 %v3584_v60, %v3582_v36 }
 0x929   :  { %v3585_v31 = vmul.f32 %v5127_v15, %v5125_v55 }
 0x92a   :  { %v5129_v0 = vpop.eup %5128  ;;  %5132 = vtanh.f32 %v3586_v37 }
 0x92b   :  { %v3583_v14 = vmul.f32 %v5129_v0, %v8057_v26  ;;  %5134 = vrcp.f32 %v3567_v16  ;;  %v4635_v26 = vld [vmem:[%s8363_s6 + $0x30] sm:$0xff]  }
 0x92c   :  { %v5131_v46 = vpop.eup %5130 }
 0x92d   :  { %v3587_v35 = vadd.f32 %v3585_v31, %v3583_v14 }
 0x92f   :  { %5136 = vtanh.f32 %v3587_v35 }
 0x937   :  { %v5133_v29 = vpop.eup %5132 }
 0x938   :  { %v3590_v27 = vmul.f32 %v5133_v29, %v5131_v46  ;;  %v5135_v10 = vpop.eup %5134 }
 0x93c   :  { %v5137_v6 = vpop.eup %5136 }
 0x93d   :  { %v3591_v61 = vmul.f32 %v5137_v6, %v5135_v10 }
 0x93f   :  { %v3592_v44 = vpack.c.bf16 %v3591_v61, %v3590_v27 }
 0x941   :  { %3627 = vmatmul.mubr.bf16.vlgmr.msra.gmra.mxu0 %v3592_v44  ;;  %3670 = vmatmul.mubr.bf16.vlgmr.msra.gmra.mxu1 %v3592_v44 }
 0x942   :  { %4371 = vmatpush3.bf16.msra.mxu0 %v4634_v38  ;;  %4386 = vmatprep.mubr.msk.bf16.mxu0 %vm5389_vm0, %v5388_v19 }
 0x943   :  { %4372 = vmatprep.subr.bf16.mxu0 %v5388_v19  ;;  %4406 = vmatprep.mubr.msk.bf16.mxu1 %vm5389_vm0, %v5388_v19 }
 0x944   :  { %4391 = vmatpush3.bf16.msra.mxu1 %v4642_v45  ;;  %v4652_v45 = vld [vmem:[%s8365_s10 + $0x28] sm:$0xff]  }
 0x945   :  { %4392 = vmatprep.subr.bf16.mxu1 %v5388_v19 }
 0x946   :  { %4373 = vmatpush3.bf16.msra.mxu0 %v4635_v26 }
 0x947   :  { %4374 = vmatprep.subr.bf16.mxu0 %v5388_v19 }
 0x948   :  { %4393 = vmatpush3.bf16.msra.mxu1 %v4643_v20  ;;  %v4653_v20 = vld [vmem:[%s8365_s10 + $0x20] sm:$0xff]  }
 0x949   :  { %4394 = vmatprep.subr.bf16.mxu1 %v5388_v19 }
 0x94a   :  { %4375 = vmatpush3.bf16.msra.mxu0 %v4636_v23 }
 0x94b   :  { %4376 = vmatprep.subr.bf16.mxu0 %v5388_v19 }
 0x94c   :  { %4395 = vmatpush3.bf16.msra.mxu1 %v4644_v22  ;;  %v4654_v22 = vld [vmem:[%s8365_s10 + $0x18] sm:$0xff]  }
 0x94d   :  { %4396 = vmatprep.subr.bf16.mxu1 %v5388_v19 }
 0x94e   :  { %4377 = vmatpush3.bf16.msra.mxu0 %v4637_v58 }
 0x94f   :  { %4378 = vmatprep.subr.bf16.mxu0 %v5388_v19 }
 0x950   :  { %4397 = vmatpush3.bf16.msra.mxu1 %v4645_v18  ;;  %v4316_v18 = vld [vmem:[%s8366_s7] ss:$0 sm:$0xff] }
 0x951   :  { %4398 = vmatprep.subr.bf16.mxu1 %v5388_v19 }
 0x952   :  { %4379 = vmatpush3.bf16.msra.mxu0 %v4638_v49  ;;  %v4648_v49 = vld [vmem:[%s8364_s8 + $0x8] sm:$0xff]  }
 0x953   :  { %4380 = vmatprep.subr.bf16.mxu0 %v5388_v19 }
 0x954   :  { %4399 = vmatpush3.bf16.msra.mxu1 %v4646_v12 }
 0x955   :  { %4400 = vmatprep.subr.bf16.mxu1 %v5388_v19 }
 0x956   :  { %4381 = vmatpush3.bf16.msra.mxu0 %v4639_v17  ;;  %v4649_v17 = vld [vmem:[%s8364_s8] sm:$0xff]  }
 0x957   :  { %4382 = vmatprep.subr.bf16.mxu0 %v5388_v19 }
 0x95a   :  { %4383 = vmatpush3.bf16.msra.mxu0 %v4640_v32  ;;  %v4650_v32 = vld [vmem:[%s8365_s10 + $0x38] sm:$0xff]  }
 0x95b   :  { %4384 = vmatprep.subr.bf16.mxu0 %v5388_v19 }
 0x95e   :  { %4385 = vmatpush3.bf16.msra.mxu0 %v4641_v28  ;;  %v4651_v28 = vld [vmem:[%s8365_s10 + $0x30] sm:$0xff]  }
 0x95f   :  { %4410 = vmatprep.subr.bf16.mxu0 %v5388_v19 }
 0xa01   :  { %v3628_v33 = vpop.f32.mrf.mxu0  ;;  %v3671_v8 = vpop.f32.mrf.mxu1 }
 0xa02   :  { %v3629_v4 = vadd.f32 %v3628_v33, %v9185_v3  ;;  %v3672_v34 = vadd.f32 %v3671_v8, %v9187_v24 }
 0xa03   :  { %v3630_v62 = vpop.f32.mrf.mxu0  ;;  %v3673_v50 = vpop.f32.mrf.mxu1 }
 0xa04   :  { %v4310_v59 = vmul.f32 -1.442695, %v3629_v4  ;;  %v3631_v11 = vadd.f32 %v3630_v62, %v9186_v42  ;;  %v4312_v47 = vmul.f32 -1.442695, %v3672_v34  ;;  %v3674_v2 = vadd.f32 %v3673_v50, %v9188_v54 }
 0xa05   :  { %v3632_v1 = vpop.f32.mrf.mxu0  ;;  %v3675_v43 = vpop.f32.mrf.mxu1 }
 0xa06   :  { %5138 = vpow2.f32 %v4310_v59  ;;  %v4311_v25 = vmul.f32 -1.442695, %v3631_v11  ;;  %v3633_v48 = vadd.f32 %v3632_v1, %v9185_v3  ;;  %v3676_v39 = vadd.f32 %v3675_v43, %v9187_v24 }
 0xa07   :  { %v3634_v57 = vpop.f32.mrf.mxu0  ;;  %v3677_v3 = vpop.f32.mrf.mxu1 }
 0xa08   :  { %5140 = vpow2.f32 %v4311_v25  ;;  %v4313_v56 = vmul.f32 -1.442695, %v3633_v48  ;;  %v3635_v51 = vadd.f32 %v3634_v57, %v9186_v42  ;;  %v4315_v5 = vmul.f32 -1.442695, %v3676_v39  ;;  %v4655_v48 = vld [vmem:[%s8365_s10 + $0x10] sm:$0xff]   ;;  %v4656_v57 = vld [vmem:[%s8365_s10 + $0x8] sm:$0xff]  }
 0xa09   :  { %v3678_v60 = vadd.f32 %v3677_v3, %v9188_v54 }
 0xa0a   :  { %5142 = vpow2.f32 %v4313_v56  ;;  %v4314_v41 = vmul.f32 -1.442695, %v3635_v51  ;;  %v4657_v56 = vld [vmem:[%s8365_s10] sm:$0xff]  }
 0xa0b   :  { %v4325_v51 = vld [vmem:[%s8367_s9] ss:$0 sm:$0xff] }
 0xa0c   :  { %5144 = vpow2.f32 %v4314_v41 }
 0xa0d   :  { %5146 = vpow2.f32 %v4312_v47 }
 0xa13   :  { %v5139_v53 = vpop.eup %5138 }
 0xa14   :  { %v3698_v7 = vadd.f32 1.0, %v5139_v53 }
 0xa15   :  { %v5141_v52 = vpop.eup %5140 }
 0xa16   :  { %5148 = vrcp.f32 %v3698_v7  ;;  %v3699_v42 = vadd.f32 1.0, %v5141_v52 }
 0xa17   :  { %v5143_v63 = vpop.eup %5142  ;;  %5150 = vtanh.f32 %v3674_v2 }
 0xa18   :  { %5152 = vrcp.f32 %v3699_v42  ;;  %v3701_v30 = vadd.f32 1.0, %v5143_v63 }
 0xa19   :  { %v5145_v13 = vpop.eup %5144  ;;  %5154 = vpow2.f32 %v4315_v5 }
 0xa1a   :  { %5156 = vrcp.f32 %v3701_v30  ;;  %v3702_v24 = vadd.f32 1.0, %v5145_v13  ;;  %v5147_v21 = vpop.eup %5146 }
 0xa1b   :  { %5158 = vtanh.f32 %v3678_v60  ;;  %v3700_v14 = vadd.f32 1.0, %v5147_v21 }
 0xa1c   :  { %5160 = vrcp.f32 %v3702_v24 }
 0xa1d   :  { %5162 = vrcp.f32 %v3700_v14 }
 0xa23   :  { %v5149_v36 = vpop.eup %5148 }
 0xa24   :  { %v5151_v55 = vpop.eup %5150 }
 0xa25   :  { %v5153_v15 = vpop.eup %5152  ;;  %v3720_v0 = vmul.f32 %v5151_v55, %v5149_v36 }
 0xa26   :  { %v5155_v37 = vpop.eup %5154  ;;  %v3718_v31 = vmul.f32 %v5153_v15, %v8216_v40 }
 0xa27   :  { %v5157_v16 = vpop.eup %5156  ;;  %v3703_v29 = vadd.f32 1.0, %v5155_v37 }
 0xa28   :  { %v5159_v35 = vpop.eup %5158  ;;  %v3722_v54 = vadd.f32 %v3720_v0, %v3718_v31 }
 0xa29   :  { %v5161_v46 = vpop.eup %5160  ;;  %v3721_v10 = vmul.f32 %v5159_v35, %v5157_v16 }
 0xa2a   :  { %v3719_v27 = vmul.f32 %v5161_v46, %v8221_v9  ;;  %5164 = vtanh.f32 %v3722_v54  ;;  %v5163_v61 = vpop.eup %5162  ;;  %v4647_v9 = vld [vmem:[%s8364_s8 + $0x10] sm:$0xff]  }
 0xa2b   :  { %5166 = vrcp.f32 %v3703_v29  ;;  %4401 = vmatpush3.bf16.msra.mxu1 %v4647_v9 }
 0xa2c   :  { %v3723_v6 = vadd.f32 %v3721_v10, %v3719_v27  ;;  %4402 = vmatprep.subr.bf16.mxu1 %v5388_v19 }
 0xa2e   :  { %5168 = vtanh.f32 %v3723_v6 }
 0xa2f   :  { %4403 = vmatpush3.bf16.msra.mxu1 %v4648_v49 }
 0xa30   :  { %4404 = vmatprep.subr.bf16.mxu1 %v5388_v19 }
 0xa33   :  { %4405 = vmatpush3.bf16.msra.mxu1 %v4649_v17 }
 0xa37   :  { %v5165_v44 = vpop.eup %5164 }
 0xa38   :  { %v5167_v38 = vpop.eup %5166  ;;  %v3726_v40 = vmul.f32 %v5165_v44, %v5163_v61 }
 0xa3b   :  { %v5169_v26 = vpop.eup %5168 }
 0xa3c   :  { %v3727_v23 = vmul.f32 %v5169_v26, %v5167_v38 }
 0xa3e   :  { %v3728_v58 = vpack.c.bf16 %v3727_v23, %v3726_v40 }
 0xa40   :  { %4387 = vmatmul.mubr.bf16.vlgmr.msra.gmra.mxu0 %v3728_v58 }
 0xa41   :  { %4426 = vmatprep.mubr.msk.bf16.mxu0 %vm5389_vm0, %v5388_v19  ;;  %4411 = vmatpush3.bf16.msra.mxu0 %v4650_v32 }
 0xa42   :  { %4412 = vmatprep.subr.bf16.mxu0 %v5388_v19 }
 0xa45   :  { %4413 = vmatpush3.bf16.msra.mxu0 %v4651_v28 }
 0xa46   :  { %4414 = vmatprep.subr.bf16.mxu0 %v5388_v19 }
 0xa49   :  { %4415 = vmatpush3.bf16.msra.mxu0 %v4652_v45 }
 0xa4a   :  { %4416 = vmatprep.subr.bf16.mxu0 %v5388_v19 }
 0xa4d   :  { %4417 = vmatpush3.bf16.msra.mxu0 %v4653_v20 }
 0xa4e   :  { %4418 = vmatprep.subr.bf16.mxu0 %v5388_v19 }
 0xa51   :  { %4419 = vmatpush3.bf16.msra.mxu0 %v4654_v22 }
 0xa52   :  { %4420 = vmatprep.subr.bf16.mxu0 %v5388_v19 }
 0xa55   :  { %4421 = vmatpush3.bf16.msra.mxu0 %v4655_v48 }
 0xa56   :  { %4422 = vmatprep.subr.bf16.mxu0 %v5388_v19 }
 0xa59   :  { %4423 = vmatpush3.bf16.msra.mxu0 %v4656_v57 }
 0xa5a   :  { %4424 = vmatprep.subr.bf16.mxu0 %v5388_v19  ;;  %v4334_v19 = vld [vmem:[%s8368_s11] ss:$0 sm:$0xff] }
 0xa5d   :  { %4425 = vmatpush3.bf16.msra.mxu0 %v4657_v56 }
 0xb00   :  { %v3834_v12 = vpop.f32.mrf.mxu0 }
 0xb01   :  { %v3835_v4 = vadd.f32 %v4316_v18, %v3834_v12 }
 0xb02   :  { %v4388_v33 = vpop.f32.mrf.mxu0 }
 0xb03   :  { %v3841_v1 = vmax.f32 %v3835_v4, 0.0 }
 0xb04   :  { %v3837_v62 = vpop.f32.mrf.mxu0 }
 0xb05   :  { %v3838_v59 = vadd.f32 %v4316_v18, %v3837_v62 }
 0xb06   :  { %v4389_v11 = vpop.f32.mrf.mxu0 }
 0xb07   :  { %v3842_v8 = vmax.f32 %v3838_v59, 0.0 }
 0xb09   :  { %v3843_v25 = vpack.c.bf16 %v3842_v8, %v3841_v1 }
 0xb0b   :  { %4407 = vmatmul.mubr.bf16.vlgmr.msra.gmra.mxu1 %v3843_v25 }
 0xbcb   :  { %v3949_v50 = vpop.f32.mrf.mxu1 }
 0xbcc   :  { %v3950_v34 = vadd.f32 %v4325_v51, %v3949_v50 }
 0xbcd   :  { %v4408_v41 = vpop.f32.mrf.mxu1 }
 0xbce   :  { %v3956_v53 = vmax.f32 %v3950_v34, 0.0 }
 0xbcf   :  { %v3952_v43 = vpop.f32.mrf.mxu1 }
 0xbd0   :  { %v3953_v47 = vadd.f32 %v4325_v51, %v3952_v43 }
 0xbd1   :  { %v4409_v39 = vpop.f32.mrf.mxu1 }
 0xbd2   :  { %v3957_v2 = vmax.f32 %v3953_v47, 0.0 }
 0xbd4   :  { %v3958_v7 = vpack.c.bf16 %v3957_v2, %v3956_v53 }
 0xbd6   :  { %4427 = vmatmul.mubr.bf16.vlgmr.msra.gmra.mxu0 %v3958_v7 }
 0xc96   :  { %v4064_v3 = vpop.f32.mrf.mxu0 }
 0xc97   :  { %v4065_v52 = vadd.f32 %v4334_v19, %v4064_v3 }
 0xc98   :  { %v4428_v5 = vpop.f32.mrf.mxu0 }
 0xc99   :  { %4071 = vst [vmem:[%s8369_s12] sm:$0xff] %v4065_v52 }
 0xc9a   :  { %v4067_v42 = vpop.f32.mrf.mxu0 }
 0xc9b   :  { %v4068_v63 = vadd.f32 %v4334_v19, %v4067_v42 }
 0xc9c   :  { %v4429_v60 = vpop.f32.mrf.mxu0 }
 0xc9d   :  { %4072 = vst [vmem:[%s8369_s12 + $0x8] sm:$0xff] %v4068_v63 }

</bundles_post_ra>
